<compile_context>
chip_gen: v7x
topology: tpu7x:2x2x1
jax: 0.10.0
libtpu: 0.0.40
codegen_flags: <defaults>
</compile_context>

<pallas_src>
import math

import jax
import jax.numpy as jnp
from jax.experimental import pallas as pl
from jax.experimental.pallas import tpu as pltpu

GN_EPS = 1e-5


def _vmem_limit_bytes():
    # v5e/v6e have 128 MiB physical VMEM -> allow ~96-100 MiB; v7x (64 MiB)
    # keeps the conservative 32 MiB scoped default.
    try:
        cap = int(pltpu.get_tpu_info().vmem_capacity_bytes)
    except Exception:
        return 32 * 1024 * 1024
    if cap <= 64 * 1024 * 1024:
        return 32 * 1024 * 1024
    return min((cap * 3) // 4, 100 * 1024 * 1024)


# ----------------------------------------------------------------------------
# Kernel 1: fused pairwise sq-distance + iterative k-min + relative coords.
# (B,N,3),(B,3,N) -> rel (B,K,3,N) with rel[b,k,:,n] = nbr_k(n) - point(n).
# ----------------------------------------------------------------------------
def _pick_row_tile(n):
    if n % 128 != 0:
        return n                        # small / ragged N: single row tile
    if n % 256 == 0 and n < 8192:
        return 256                      # bigger tiles where VMEM allows
    return 128                          # bound (TM, N) temporaries for large N


def make_knn_rel_kernel(N, num_neighbor, dilation, ignore_nearest):
    offset = 1 if ignore_nearest else 0
    k_total = offset + (num_neighbor - 1) * dilation + 1
    keep = {offset + j * dilation: j for j in range(num_neighbor)}

    def kernel(rows_ref, cols_ref, rel_ref):
        r = rows_ref[0].astype(jnp.float32)            # (TM, 3) query tile
        c = cols_ref[0].astype(jnp.float32)            # (3, N)  all points, lane-dense

        # Pairwise squared distances: 3-term VPU broadcast (exact 0 diagonal).
        d = None
        for ci in range(3):
            diff = r[:, ci:ci + 1] - c[ci:ci + 1, :]   # (TM, N)
            d = diff * diff if d is None else d + diff * diff

        col_f = jax.lax.broadcasted_iota(jnp.int32, d.shape, 1).astype(jnp.float32)
        inf = jnp.float32(jnp.inf)

        # Iterative k-min with smallest-index tie-break (matches top_k order);
        # self (exact-zero distance) is extracted first and skipped when
        # ignore_nearest; dilation skips are handled by the static keep map.
        for t in range(k_total):
            mv = jnp.min(d, axis=1, keepdims=True)                          # (TM,1)
            mi = jnp.min(jnp.where(d == mv, col_f, float(N)),
                         axis=1, keepdims=True)                             # (TM,1)
            sel = col_f == mi                                               # 1 hit/row
            if t in keep:
                j = keep[t]
                for ci in range(3):
                    nbr = jnp.sum(jnp.where(sel, c[ci:ci + 1, :], 0.0),
                                  axis=1, keepdims=True)                    # (TM,1)
                    rel_ref[0, j, ci, :] = (nbr - r[:, ci:ci + 1])[:, 0]
            d = jnp.where(sel, inf, d)

    return kernel, k_total


def knn_relative_coords(points_nc, points_cn, num_neighbor, dilation=1,
                        ignore_nearest=True):
    # eval-mode behaviour: strided (non-random) dilation sampling.
    # TODO(synk): training-mode random dilation sampling not implemented.
    B, N, C = points_nc.shape
    K = num_neighbor
    TM = _pick_row_tile(N)
    kernel, k_total = make_knn_rel_kernel(N, num_neighbor, dilation, ignore_nearest)
    assert k_total <= N, "need k_total <= number of points"

    flops = B * N * N * (8 + 4 * k_total)
    bytes_accessed = B * 4 * (2 * 3 * N + K * 3 * N)

    return pl.pallas_call(
        kernel,
        out_shape=jax.ShapeDtypeStruct((B, K, 3, N), jnp.float32),
        grid=(B, N // TM),
        in_specs=[
            pl.BlockSpec((1, TM, C), lambda b, i: (b, i, 0)),
            pl.BlockSpec((1, C, N), lambda b, i: (b, 0, 0)),
        ],
        out_specs=pl.BlockSpec((1, K, 3, TM), lambda b, i: (b, 0, 0, i)),
        compiler_params=pltpu.CompilerParams(
            dimension_semantics=("parallel", "parallel"),
            vmem_limit_bytes=_vmem_limit_bytes(),
        ),
        cost_estimate=pl.CostEstimate(
            flops=int(flops), transcendentals=0,
            bytes_accessed=int(bytes_accessed)),
    )(points_nc, points_cn)


# ----------------------------------------------------------------------------
# Kernel 2: fused pointnet1 -> max over K -> pointnet2 on lane-dense slabs.
# ----------------------------------------------------------------------------
def _group_mask(cout, groups):
    dg = cout // groups
    rid = jax.lax.broadcasted_iota(jnp.int32, (cout, cout), 0) // dg
    cid = jax.lax.broadcasted_iota(jnp.int32, (cout, cout), 1) // dg
    return (rid == cid).astype(jnp.float32)


def _gn_elu(ys, gamma, beta, cout, groups, grp_mask):
    """Single-pass GroupNorm + ELU over a list of (cout, N) slabs (joint stats)."""
    n_pos = sum(int(y.shape[1]) for y in ys)
    cnt = float((cout // groups) * n_pos)
    s1 = None
    s2 = None
    for y in ys:                                   # one sweep: sum and sum-of-squares
        a = jnp.sum(y, axis=1, keepdims=True)      # (cout, 1)
        b = jnp.sum(y * y, axis=1, keepdims=True)  # (cout, 1)
        s1 = a if s1 is None else s1 + a
        s2 = b if s2 is None else s2 + b
    gsum = jnp.dot(grp_mask, s1, preferred_element_type=jnp.float32)
    gsq = jnp.dot(grp_mask, s2, preferred_element_type=jnp.float32)
    mean = gsum / cnt
    var = jnp.maximum(gsq / cnt - mean * mean, 0.0)   # single-pass variance (f32)
    scale = gamma * jax.lax.rsqrt(var + GN_EPS)
    shift = beta - mean * scale
    out = []
    for y in ys:
        z = y * scale + shift                         # fused GN affine
        out.append(jnp.where(z > 0.0, z, jnp.expm1(jnp.minimum(z, 0.0))))  # ELU(1)
    return out


def make_pointnet_kernel(N, K, dims1, dims2, groups):
    def kernel(pts_ref, rel_ref, w_ref, a_ref, out_ref):
        masks = {}
        for _, cout in dims1 + dims2:
            if cout not in masks:
                masks[cout] = _group_mask(cout, groups)

        pts = pts_ref[0].astype(jnp.float32)               # (3, N)

        # pointnet1 layer 0: split the (cout0, 6) weight into absolute /
        # relative halves; the absolute-coordinate matmul is shared by all K
        # neighbor slabs so the (6, K*N) feature slab is never materialized.
        cin0, cout0 = dims1[0]
        w0 = w_ref[0, :cout0, :cin0].astype(jnp.float32)   # (cout0, 6)
        aff0 = a_ref[0, :cout0, :].astype(jnp.float32)     # (cout0, 3)
        y_abs = jnp.dot(w0[:, :3], pts,
                        preferred_element_type=jnp.float32) + aff0[:, 0:1]
        ys = []
        for k in range(K):
            rel_k = rel_ref[0, k].astype(jnp.float32)      # (3, N)
            ys.append(y_abs + jnp.dot(w0[:, 3:cin0], rel_k,
                                      preferred_element_type=jnp.float32))
        xs = _gn_elu(ys, aff0[:, 1:2], aff0[:, 2:3], cout0, groups, masks[cout0])

        li = 1
        for cin, cout in dims1[1:]:                        # pointnet1, remaining layers
            w = w_ref[li, :cout, :cin].astype(jnp.float32)
            aff = a_ref[li, :cout, :].astype(jnp.float32)
            ys = [jnp.dot(w, x, preferred_element_type=jnp.float32) + aff[:, 0:1]
                  for x in xs]
            xs = _gn_elu(ys, aff[:, 1:2], aff[:, 2:3], cout, groups, masks[cout])
            li += 1

        # max over K neighbors: K-1 elementwise maxima over (C, N) slabs.
        m = xs[0]
        for k in range(1, K):
            m = jnp.maximum(m, xs[k])

        for cin, cout in dims2:                            # pointnet2 (1x1 conv1d)
            w = w_ref[li, :cout, :cin].astype(jnp.float32)
            aff = a_ref[li, :cout, :].astype(jnp.float32)
            y = jnp.dot(w, m, preferred_element_type=jnp.float32) + aff[:, 0:1]
            m = _gn_elu([y], aff[:, 1:2], aff[:, 2:3], cout, groups, masks[cout])[0]
            li += 1

        out_ref[0] = m.astype(out_ref.dtype)               # (D2_last, N) lane-dense
    return kernel


def run_pointnets(points_cn, rel, w_packed, a_packed, dims1, dims2, groups):
    B, _, N = points_cn.shape
    K = rel.shape[1]
    d_out = dims2[-1][1]
    kernel = make_pointnet_kernel(N, K, dims1, dims2, groups)

    flops = 2 * B * (sum(ci * co for ci, co in dims1) * K * N
                     + sum(ci * co for ci, co in dims2) * N)
    trans = B * (sum(co for _, co in dims1) * K * N
                 + sum(co for _, co in dims2) * N)
    bytes_accessed = (4 * B * (3 * N + 3 * K * N + d_out * N)
                      + 4 * int(w_packed.size + a_packed.size))

    # TODO(synk): for very large K*N (or dual-TC utilization on v7x at B==1),
    # add an N-tile grid axis with two-pass GroupNorm (stats pass + normalize
    # pass) so the per-sample activation chain need not stay VMEM-resident.
    return pl.pallas_call(
        kernel,
        out_shape=jax.ShapeDtypeStruct((B, d_out, N), jnp.float32),
        grid=(B,),
        in_specs=[
            pl.BlockSpec((1, 3, N), lambda b: (b, 0, 0)),
            pl.BlockSpec((1, K, 3, N), lambda b: (b, 0, 0, 0)),
            pl.BlockSpec(w_packed.shape, lambda b: (0, 0, 0)),
            pl.BlockSpec(a_packed.shape, lambda b: (0, 0, 0)),
        ],
        out_specs=pl.BlockSpec((1, d_out, N), lambda b: (b, 0, 0)),
        compiler_params=pltpu.CompilerParams(
            dimension_semantics=("parallel",),
            vmem_limit_bytes=_vmem_limit_bytes(),
        ),
        cost_estimate=pl.CostEstimate(
            flops=int(flops), transcendentals=int(trans),
            bytes_accessed=int(bytes_accessed)),
    )(points_cn, rel, w_packed, a_packed)


# ----------------------------------------------------------------------------
# Top-level forward (matches the PyTorch module forward in eval mode).
# ----------------------------------------------------------------------------
def absolute_relative_position_embedding(points, w_packed, a_packed, dims1, dims2,
                                         num_neighbor, dilation=1,
                                         ignore_nearest=True, groups=8):
    points_cn = points.astype(jnp.float32)                 # (B, 3, N)
    points_nc = jnp.transpose(points_cn, (0, 2, 1))        # (B, N, 3) row tiles
    rel = knn_relative_coords(points_nc, points_cn, num_neighbor, dilation,
                              ignore_nearest)              # (B, K, 3, N)
    return run_pointnets(points_cn, rel, w_packed, a_packed, dims1, dims2, groups)


# ----------------------------------------------------------------------------
# Parameter init (PyTorch-style conv init) and packing into two flat arrays.
# ----------------------------------------------------------------------------
def init_block_params(key, dims):
    params = []
    for cin, cout in zip(dims[:-1], dims[1:]):
        key, k1, k2 = jax.random.split(key, 3)
        bound = 1.0 / math.sqrt(cin)
        w = jax.random.uniform(k1, (cout, cin), jnp.float32, -bound, bound)
        b = jax.random.uniform(k2, (cout,), jnp.float32, -bound, bound)
        params.append((w, b, jnp.ones((cout,), jnp.float32),
                       jnp.zeros((cout,), jnp.float32)))
    return key, params


def _pad8(x):
    return ((x + 7) // 8) * 8


def pack_params(params1, params2):
    all_p = list(params1) + list(params2)
    L = len(all_p)
    cmax_out = _pad8(max(p[0].shape[0] for p in all_p))
    cmax_in = _pad8(max(p[0].shape[1] for p in all_p))
    w_packed = jnp.zeros((L, cmax_out, cmax_in), jnp.float32)
    a_packed = jnp.zeros((L, cmax_out, 3), jnp.float32)
    dims = []
    for l, (w, b, g, bt) in enumerate(all_p):
        cout, cin = w.shape
        w_packed = w_packed.at[l, :cout, :cin].set(w)
        a_packed = a_packed.at[l, :cout, 0].set(b)
        a_packed = a_packed.at[l, :cout, 1].set(g)
        a_packed = a_packed.at[l, :cout, 2].set(bt)
        dims.append((cin, cout))
    return w_packed, a_packed, dims[:len(params1)], dims[len(params1):]


if __name__ == "__main__":
    B, C, N = 2, 3, 64
    num_neighbor = 8
    input_dim = 2 * C                       # cat([points, neighbors - points])
    output_dims1 = [16, 32]                 # pointnet1 (divisible by groups=8)
    output_dims2 = [32]                     # pointnet2

    key = jax.random.PRNGKey(0)
    key, kp = jax.random.split(key)
    points = jax.random.normal(kp, (B, C, N), jnp.float32)

    key, params1 = init_block_params(key, [input_dim] + output_dims1)
    key, params2 = init_block_params(key, [output_dims1[-1]] + output_dims2)
    w_packed, a_packed, dims1, dims2 = pack_params(params1, params2)

    out = absolute_relative_position_embedding(
        points, w_packed, a_packed, dims1, dims2, num_neighbor,
        dilation=1, ignore_nearest=True, groups=8)
    out = jax.block_until_ready(out)
    assert out.shape == (B, output_dims2[-1], N), out.shape
    assert bool(jnp.all(jnp.isfinite(out)))
    print("KERNEL_OK")
</pallas_src>

<mosaic_0001>
module attributes {stable_mosaic.version = 11 : i64} {
  func.func @kernel(%arg0: i32, %arg1: i32, %arg2: memref<1x64x3xf32, #tpu.memory_space<vmem>>, %arg3: memref<1x3x64xf32, #tpu.memory_space<vmem>>, %arg4: memref<1x8x3x64xf32, #tpu.memory_space<vmem>>) attributes {dimension_semantics = [#tpu.dimension_semantics<parallel>, #tpu.dimension_semantics<parallel>], iteration_bounds = array<i64: 2, 1>, scalar_prefetch = 0 : i64, scratch_operands = 0 : i64, tpu.core_type = #tpu.core_type<tc>, window_params = [{transform_indices = @transform_0, window_bounds = array<i64: 1, 64, 3>}, {transform_indices = @transform_1, window_bounds = array<i64: 1, 3, 64>}, {transform_indices = @transform_2, window_bounds = array<i64: 1, 8, 3, 64>}]} {
    %c0 = arith.constant 0 : index
    %c0_0 = arith.constant 0 : index
    %c0_1 = arith.constant 0 : index
    %0 = vector.load %arg2[%c0, %c0_0, %c0_1] : memref<1x64x3xf32, #tpu.memory_space<vmem>>, vector<1x64x3xf32>
    %1 = vector.shape_cast %0 : vector<1x64x3xf32> to vector<64x3xf32>
    %c0_2 = arith.constant 0 : index
    %c0_3 = arith.constant 0 : index
    %c0_4 = arith.constant 0 : index
    %2 = vector.load %arg3[%c0_2, %c0_3, %c0_4] : memref<1x3x64xf32, #tpu.memory_space<vmem>>, vector<1x3x64xf32>
    %3 = vector.shape_cast %2 : vector<1x3x64xf32> to vector<3x64xf32>
    %4 = vector.extract_strided_slice %1 {offsets = [0, 0], sizes = [64, 1], strides = [1, 1]} : vector<64x3xf32> to vector<64x1xf32>
    %5 = vector.extract_strided_slice %3 {offsets = [0, 0], sizes = [1, 64], strides = [1, 1]} : vector<3x64xf32> to vector<1x64xf32>
    %6 = vector.broadcast %4 : vector<64x1xf32> to vector<64x64xf32>
    %7 = vector.broadcast %5 : vector<1x64xf32> to vector<64x64xf32>
    %8 = arith.subf %6, %7 : vector<64x64xf32>
    %9 = arith.mulf %8, %8 : vector<64x64xf32>
    %10 = vector.extract_strided_slice %1 {offsets = [0, 1], sizes = [64, 1], strides = [1, 1]} : vector<64x3xf32> to vector<64x1xf32>
    %11 = vector.extract_strided_slice %3 {offsets = [1, 0], sizes = [1, 64], strides = [1, 1]} : vector<3x64xf32> to vector<1x64xf32>
    %12 = vector.broadcast %10 : vector<64x1xf32> to vector<64x64xf32>
    %13 = vector.broadcast %11 : vector<1x64xf32> to vector<64x64xf32>
    %14 = arith.subf %12, %13 : vector<64x64xf32>
    %15 = arith.mulf %14, %14 : vector<64x64xf32>
    %16 = arith.addf %9, %15 : vector<64x64xf32>
    %17 = vector.extract_strided_slice %1 {offsets = [0, 2], sizes = [64, 1], strides = [1, 1]} : vector<64x3xf32> to vector<64x1xf32>
    %18 = vector.extract_strided_slice %3 {offsets = [2, 0], sizes = [1, 64], strides = [1, 1]} : vector<3x64xf32> to vector<1x64xf32>
    %19 = vector.broadcast %17 : vector<64x1xf32> to vector<64x64xf32>
    %20 = vector.broadcast %18 : vector<1x64xf32> to vector<64x64xf32>
    %21 = arith.subf %19, %20 : vector<64x64xf32>
    %22 = arith.mulf %21, %21 : vector<64x64xf32>
    %23 = arith.addf %16, %22 : vector<64x64xf32>
    %24 = tpu.iota {dimensions = array<i32: 1>} : vector<64x64xi32>
    %25 = arith.sitofp %24 : vector<64x64xi32> to vector<64x64xf32>
    %cst = arith.constant dense<0x7F800000> : vector<64xf32>
    %26 = vector.multi_reduction <minimumf>, %23, %cst [1] : vector<64x64xf32> to vector<64xf32>
    %27 = vector.shape_cast %26 : vector<64xf32> to vector<64x1xf32>
    %28 = vector.broadcast %27 : vector<64x1xf32> to vector<64x64xf32>
    %29 = arith.cmpf oeq, %23, %28 : vector<64x64xf32>
    %cst_5 = arith.constant 6.400000e+01 : f32
    %30 = vector.broadcast %cst_5 : f32 to vector<64x64xf32>
    %31 = arith.select %29, %25, %30 : vector<64x64xi1>, vector<64x64xf32>
    %cst_6 = arith.constant dense<0x7F800000> : vector<64xf32>
    %32 = vector.multi_reduction <minimumf>, %31, %cst_6 [1] : vector<64x64xf32> to vector<64xf32>
    %33 = vector.shape_cast %32 : vector<64xf32> to vector<64x1xf32>
    %34 = vector.broadcast %33 : vector<64x1xf32> to vector<64x64xf32>
    %35 = arith.cmpf oeq, %25, %34 : vector<64x64xf32>
    %cst_7 = arith.constant 0x7F800000 : f32
    %36 = vector.broadcast %cst_7 : f32 to vector<64x64xf32>
    %37 = arith.select %35, %36, %23 : vector<64x64xi1>, vector<64x64xf32>
    %cst_8 = arith.constant dense<0x7F800000> : vector<64xf32>
    %38 = vector.multi_reduction <minimumf>, %37, %cst_8 [1] : vector<64x64xf32> to vector<64xf32>
    %39 = vector.shape_cast %38 : vector<64xf32> to vector<64x1xf32>
    %40 = vector.broadcast %39 : vector<64x1xf32> to vector<64x64xf32>
    %41 = arith.cmpf oeq, %37, %40 : vector<64x64xf32>
    %cst_9 = arith.constant 6.400000e+01 : f32
    %42 = vector.broadcast %cst_9 : f32 to vector<64x64xf32>
    %43 = arith.select %41, %25, %42 : vector<64x64xi1>, vector<64x64xf32>
    %cst_10 = arith.constant dense<0x7F800000> : vector<64xf32>
    %44 = vector.multi_reduction <minimumf>, %43, %cst_10 [1] : vector<64x64xf32> to vector<64xf32>
    %45 = vector.shape_cast %44 : vector<64xf32> to vector<64x1xf32>
    %46 = vector.broadcast %45 : vector<64x1xf32> to vector<64x64xf32>
    %47 = arith.cmpf oeq, %25, %46 : vector<64x64xf32>
    %48 = vector.extract_strided_slice %3 {offsets = [0, 0], sizes = [1, 64], strides = [1, 1]} : vector<3x64xf32> to vector<1x64xf32>
    %cst_11 = arith.constant 0.000000e+00 : f32
    %49 = vector.shape_cast %48 : vector<1x64xf32> to vector<1x64xf32>
    %50 = vector.broadcast %49 : vector<1x64xf32> to vector<64x64xf32>
    %51 = vector.broadcast %cst_11 : f32 to vector<64x64xf32>
    %52 = arith.select %47, %50, %51 : vector<64x64xi1>, vector<64x64xf32>
    %cst_12 = arith.constant dense<0.000000e+00> : vector<64xf32>
    %53 = vector.multi_reduction <add>, %52, %cst_12 [1] : vector<64x64xf32> to vector<64xf32>
    %54 = vector.shape_cast %53 : vector<64xf32> to vector<64x1xf32>
    %55 = vector.extract_strided_slice %1 {offsets = [0, 0], sizes = [64, 1], strides = [1, 1]} : vector<64x3xf32> to vector<64x1xf32>
    %56 = arith.subf %54, %55 : vector<64x1xf32>
    %57 = vector.shape_cast %56 : vector<64x1xf32> to vector<64xf32>
    %c0_13 = arith.constant 0 : index
    %c0_14 = arith.constant 0 : index
    %c0_15 = arith.constant 0 : index
    %c0_16 = arith.constant 0 : index
    %58 = vector.load %arg4[%c0_13, %c0_14, %c0_15, %c0_16] : memref<1x8x3x64xf32, #tpu.memory_space<vmem>>, vector<1x1x1x64xf32>
    %59 = vector.shape_cast %58 : vector<1x1x1x64xf32> to vector<64xf32>
    %60 = vector.shape_cast %57 : vector<64xf32> to vector<1x1x1x64xf32>
    tpu.vector_store %arg4[%c0_13, %c0_14, %c0_15, %c0_16], %60 {strides = array<i32>} : memref<1x8x3x64xf32, #tpu.memory_space<vmem>>, vector<1x1x1x64xf32>,
    %61 = vector.extract_strided_slice %3 {offsets = [1, 0], sizes = [1, 64], strides = [1, 1]} : vector<3x64xf32> to vector<1x64xf32>
    %cst_17 = arith.constant 0.000000e+00 : f32
    %62 = vector.shape_cast %61 : vector<1x64xf32> to vector<1x64xf32>
    %63 = vector.broadcast %62 : vector<1x64xf32> to vector<64x64xf32>
    %64 = vector.broadcast %cst_17 : f32 to vector<64x64xf32>
    %65 = arith.select %47, %63, %64 : vector<64x64xi1>, vector<64x64xf32>
    %cst_18 = arith.constant dense<0.000000e+00> : vector<64xf32>
    %66 = vector.multi_reduction <add>, %65, %cst_18 [1] : vector<64x64xf32> to vector<64xf32>
    %67 = vector.shape_cast %66 : vector<64xf32> to vector<64x1xf32>
    %68 = vector.extract_strided_slice %1 {offsets = [0, 1], sizes = [64, 1], strides = [1, 1]} : vector<64x3xf32> to vector<64x1xf32>
    %69 = arith.subf %67, %68 : vector<64x1xf32>
    %70 = vector.shape_cast %69 : vector<64x1xf32> to vector<64xf32>
    %c0_19 = arith.constant 0 : index
    %c0_20 = arith.constant 0 : index
    %c1 = arith.constant 1 : index
    %c0_21 = arith.constant 0 : index
    %71 = vector.load %arg4[%c0_19, %c0_20, %c1, %c0_21] : memref<1x8x3x64xf32, #tpu.memory_space<vmem>>, vector<1x1x1x64xf32>
    %72 = vector.shape_cast %71 : vector<1x1x1x64xf32> to vector<64xf32>
    %73 = vector.shape_cast %70 : vector<64xf32> to vector<1x1x1x64xf32>
    tpu.vector_store %arg4[%c0_19, %c0_20, %c1, %c0_21], %73 {strides = array<i32>} : memref<1x8x3x64xf32, #tpu.memory_space<vmem>>, vector<1x1x1x64xf32>,
    %74 = vector.extract_strided_slice %3 {offsets = [2, 0], sizes = [1, 64], strides = [1, 1]} : vector<3x64xf32> to vector<1x64xf32>
    %cst_22 = arith.constant 0.000000e+00 : f32
    %75 = vector.shape_cast %74 : vector<1x64xf32> to vector<1x64xf32>
    %76 = vector.broadcast %75 : vector<1x64xf32> to vector<64x64xf32>
    %77 = vector.broadcast %cst_22 : f32 to vector<64x64xf32>
    %78 = arith.select %47, %76, %77 : vector<64x64xi1>, vector<64x64xf32>
    %cst_23 = arith.constant dense<0.000000e+00> : vector<64xf32>
    %79 = vector.multi_reduction <add>, %78, %cst_23 [1] : vector<64x64xf32> to vector<64xf32>
    %80 = vector.shape_cast %79 : vector<64xf32> to vector<64x1xf32>
    %81 = vector.extract_strided_slice %1 {offsets = [0, 2], sizes = [64, 1], strides = [1, 1]} : vector<64x3xf32> to vector<64x1xf32>
    %82 = arith.subf %80, %81 : vector<64x1xf32>
    %83 = vector.shape_cast %82 : vector<64x1xf32> to vector<64xf32>
    %c0_24 = arith.constant 0 : index
    %c0_25 = arith.constant 0 : index
    %c2 = arith.constant 2 : index
    %c0_26 = arith.constant 0 : index
    %84 = vector.load %arg4[%c0_24, %c0_25, %c2, %c0_26] : memref<1x8x3x64xf32, #tpu.memory_space<vmem>>, vector<1x1x1x64xf32>
    %85 = vector.shape_cast %84 : vector<1x1x1x64xf32> to vector<64xf32>
    %86 = vector.shape_cast %83 : vector<64xf32> to vector<1x1x1x64xf32>
    tpu.vector_store %arg4[%c0_24, %c0_25, %c2, %c0_26], %86 {strides = array<i32>} : memref<1x8x3x64xf32, #tpu.memory_space<vmem>>, vector<1x1x1x64xf32>,
    %cst_27 = arith.constant 0x7F800000 : f32
    %87 = vector.broadcast %cst_27 : f32 to vector<64x64xf32>
    %88 = arith.select %47, %87, %37 : vector<64x64xi1>, vector<64x64xf32>
    %cst_28 = arith.constant dense<0x7F800000> : vector<64xf32>
    %89 = vector.multi_reduction <minimumf>, %88, %cst_28 [1] : vector<64x64xf32> to vector<64xf32>
    %90 = vector.shape_cast %89 : vector<64xf32> to vector<64x1xf32>
    %91 = vector.broadcast %90 : vector<64x1xf32> to vector<64x64xf32>
    %92 = arith.cmpf oeq, %88, %91 : vector<64x64xf32>
    %cst_29 = arith.constant 6.400000e+01 : f32
    %93 = vector.broadcast %cst_29 : f32 to vector<64x64xf32>
    %94 = arith.select %92, %25, %93 : vector<64x64xi1>, vector<64x64xf32>
    %cst_30 = arith.constant dense<0x7F800000> : vector<64xf32>
    %95 = vector.multi_reduction <minimumf>, %94, %cst_30 [1] : vector<64x64xf32> to vector<64xf32>
    %96 = vector.shape_cast %95 : vector<64xf32> to vector<64x1xf32>
    %97 = vector.broadcast %96 : vector<64x1xf32> to vector<64x64xf32>
    %98 = arith.cmpf oeq, %25, %97 : vector<64x64xf32>
    %99 = vector.extract_strided_slice %3 {offsets = [0, 0], sizes = [1, 64], strides = [1, 1]} : vector<3x64xf32> to vector<1x64xf32>
    %cst_31 = arith.constant 0.000000e+00 : f32
    %100 = vector.shape_cast %99 : vector<1x64xf32> to vector<1x64xf32>
    %101 = vector.broadcast %100 : vector<1x64xf32> to vector<64x64xf32>
    %102 = vector.broadcast %cst_31 : f32 to vector<64x64xf32>
    %103 = arith.select %98, %101, %102 : vector<64x64xi1>, vector<64x64xf32>
    %cst_32 = arith.constant dense<0.000000e+00> : vector<64xf32>
    %104 = vector.multi_reduction <add>, %103, %cst_32 [1] : vector<64x64xf32> to vector<64xf32>
    %105 = vector.shape_cast %104 : vector<64xf32> to vector<64x1xf32>
    %106 = vector.extract_strided_slice %1 {offsets = [0, 0], sizes = [64, 1], strides = [1, 1]} : vector<64x3xf32> to vector<64x1xf32>
    %107 = arith.subf %105, %106 : vector<64x1xf32>
    %108 = vector.shape_cast %107 : vector<64x1xf32> to vector<64xf32>
    %c0_33 = arith.constant 0 : index
    %c1_34 = arith.constant 1 : index
    %c0_35 = arith.constant 0 : index
    %c0_36 = arith.constant 0 : index
    %109 = vector.load %arg4[%c0_33, %c1_34, %c0_35, %c0_36] : memref<1x8x3x64xf32, #tpu.memory_space<vmem>>, vector<1x1x1x64xf32>
    %110 = vector.shape_cast %109 : vector<1x1x1x64xf32> to vector<64xf32>
    %111 = vector.shape_cast %108 : vector<64xf32> to vector<1x1x1x64xf32>
    tpu.vector_store %arg4[%c0_33, %c1_34, %c0_35, %c0_36], %111 {strides = array<i32>} : memref<1x8x3x64xf32, #tpu.memory_space<vmem>>, vector<1x1x1x64xf32>,
    %112 = vector.extract_strided_slice %3 {offsets = [1, 0], sizes = [1, 64], strides = [1, 1]} : vector<3x64xf32> to vector<1x64xf32>
    %cst_37 = arith.constant 0.000000e+00 : f32
    %113 = vector.shape_cast %112 : vector<1x64xf32> to vector<1x64xf32>
    %114 = vector.broadcast %113 : vector<1x64xf32> to vector<64x64xf32>
    %115 = vector.broadcast %cst_37 : f32 to vector<64x64xf32>
    %116 = arith.select %98, %114, %115 : vector<64x64xi1>, vector<64x64xf32>
    %cst_38 = arith.constant dense<0.000000e+00> : vector<64xf32>
    %117 = vector.multi_reduction <add>, %116, %cst_38 [1] : vector<64x64xf32> to vector<64xf32>
    %118 = vector.shape_cast %117 : vector<64xf32> to vector<64x1xf32>
    %119 = vector.extract_strided_slice %1 {offsets = [0, 1], sizes = [64, 1], strides = [1, 1]} : vector<64x3xf32> to vector<64x1xf32>
    %120 = arith.subf %118, %119 : vector<64x1xf32>
    %121 = vector.shape_cast %120 : vector<64x1xf32> to vector<64xf32>
    %c0_39 = arith.constant 0 : index
    %c1_40 = arith.constant 1 : index
    %c1_41 = arith.constant 1 : index
    %c0_42 = arith.constant 0 : index
    %122 = vector.load %arg4[%c0_39, %c1_40, %c1_41, %c0_42] : memref<1x8x3x64xf32, #tpu.memory_space<vmem>>, vector<1x1x1x64xf32>
    %123 = vector.shape_cast %122 : vector<1x1x1x64xf32> to vector<64xf32>
    %124 = vector.shape_cast %121 : vector<64xf32> to vector<1x1x1x64xf32>
    tpu.vector_store %arg4[%c0_39, %c1_40, %c1_41, %c0_42], %124 {strides = array<i32>} : memref<1x8x3x64xf32, #tpu.memory_space<vmem>>, vector<1x1x1x64xf32>,
    %125 = vector.extract_strided_slice %3 {offsets = [2, 0], sizes = [1, 64], strides = [1, 1]} : vector<3x64xf32> to vector<1x64xf32>
    %cst_43 = arith.constant 0.000000e+00 : f32
    %126 = vector.shape_cast %125 : vector<1x64xf32> to vector<1x64xf32>
    %127 = vector.broadcast %126 : vector<1x64xf32> to vector<64x64xf32>
    %128 = vector.broadcast %cst_43 : f32 to vector<64x64xf32>
    %129 = arith.select %98, %127, %128 : vector<64x64xi1>, vector<64x64xf32>
    %cst_44 = arith.constant dense<0.000000e+00> : vector<64xf32>
    %130 = vector.multi_reduction <add>, %129, %cst_44 [1] : vector<64x64xf32> to vector<64xf32>
    %131 = vector.shape_cast %130 : vector<64xf32> to vector<64x1xf32>
    %132 = vector.extract_strided_slice %1 {offsets = [0, 2], sizes = [64, 1], strides = [1, 1]} : vector<64x3xf32> to vector<64x1xf32>
    %133 = arith.subf %131, %132 : vector<64x1xf32>
    %134 = vector.shape_cast %133 : vector<64x1xf32> to vector<64xf32>
    %c0_45 = arith.constant 0 : index
    %c1_46 = arith.constant 1 : index
    %c2_47 = arith.constant 2 : index
    %c0_48 = arith.constant 0 : index
    %135 = vector.load %arg4[%c0_45, %c1_46, %c2_47, %c0_48] : memref<1x8x3x64xf32, #tpu.memory_space<vmem>>, vector<1x1x1x64xf32>
    %136 = vector.shape_cast %135 : vector<1x1x1x64xf32> to vector<64xf32>
    %137 = vector.shape_cast %134 : vector<64xf32> to vector<1x1x1x64xf32>
    tpu.vector_store %arg4[%c0_45, %c1_46, %c2_47, %c0_48], %137 {strides = array<i32>} : memref<1x8x3x64xf32, #tpu.memory_space<vmem>>, vector<1x1x1x64xf32>,
    %cst_49 = arith.constant 0x7F800000 : f32
    %138 = vector.broadcast %cst_49 : f32 to vector<64x64xf32>
    %139 = arith.select %98, %138, %88 : vector<64x64xi1>, vector<64x64xf32>
    %cst_50 = arith.constant dense<0x7F800000> : vector<64xf32>
    %140 = vector.multi_reduction <minimumf>, %139, %cst_50 [1] : vector<64x64xf32> to vector<64xf32>
    %141 = vector.shape_cast %140 : vector<64xf32> to vector<64x1xf32>
    %142 = vector.broadcast %141 : vector<64x1xf32> to vector<64x64xf32>
    %143 = arith.cmpf oeq, %139, %142 : vector<64x64xf32>
    %cst_51 = arith.constant 6.400000e+01 : f32
    %144 = vector.broadcast %cst_51 : f32 to vector<64x64xf32>
    %145 = arith.select %143, %25, %144 : vector<64x64xi1>, vector<64x64xf32>
    %cst_52 = arith.constant dense<0x7F800000> : vector<64xf32>
    %146 = vector.multi_reduction <minimumf>, %145, %cst_52 [1] : vector<64x64xf32> to vector<64xf32>
    %147 = vector.shape_cast %146 : vector<64xf32> to vector<64x1xf32>
    %148 = vector.broadcast %147 : vector<64x1xf32> to vector<64x64xf32>
    %149 = arith.cmpf oeq, %25, %148 : vector<64x64xf32>
    %150 = vector.extract_strided_slice %3 {offsets = [0, 0], sizes = [1, 64], strides = [1, 1]} : vector<3x64xf32> to vector<1x64xf32>
    %cst_53 = arith.constant 0.000000e+00 : f32
    %151 = vector.shape_cast %150 : vector<1x64xf32> to vector<1x64xf32>
    %152 = vector.broadcast %151 : vector<1x64xf32> to vector<64x64xf32>
    %153 = vector.broadcast %cst_53 : f32 to vector<64x64xf32>
    %154 = arith.select %149, %152, %153 : vector<64x64xi1>, vector<64x64xf32>
    %cst_54 = arith.constant dense<0.000000e+00> : vector<64xf32>
    %155 = vector.multi_reduction <add>, %154, %cst_54 [1] : vector<64x64xf32> to vector<64xf32>
    %156 = vector.shape_cast %155 : vector<64xf32> to vector<64x1xf32>
    %157 = vector.extract_strided_slice %1 {offsets = [0, 0], sizes = [64, 1], strides = [1, 1]} : vector<64x3xf32> to vector<64x1xf32>
    %158 = arith.subf %156, %157 : vector<64x1xf32>
    %159 = vector.shape_cast %158 : vector<64x1xf32> to vector<64xf32>
    %c0_55 = arith.constant 0 : index
    %c2_56 = arith.constant 2 : index
    %c0_57 = arith.constant 0 : index
    %c0_58 = arith.constant 0 : index
    %160 = vector.load %arg4[%c0_55, %c2_56, %c0_57, %c0_58] : memref<1x8x3x64xf32, #tpu.memory_space<vmem>>, vector<1x1x1x64xf32>
    %161 = vector.shape_cast %160 : vector<1x1x1x64xf32> to vector<64xf32>
    %162 = vector.shape_cast %159 : vector<64xf32> to vector<1x1x1x64xf32>
    tpu.vector_store %arg4[%c0_55, %c2_56, %c0_57, %c0_58], %162 {strides = array<i32>} : memref<1x8x3x64xf32, #tpu.memory_space<vmem>>, vector<1x1x1x64xf32>,
    %163 = vector.extract_strided_slice %3 {offsets = [1, 0], sizes = [1, 64], strides = [1, 1]} : vector<3x64xf32> to vector<1x64xf32>
    %cst_59 = arith.constant 0.000000e+00 : f32
    %164 = vector.shape_cast %163 : vector<1x64xf32> to vector<1x64xf32>
    %165 = vector.broadcast %164 : vector<1x64xf32> to vector<64x64xf32>
    %166 = vector.broadcast %cst_59 : f32 to vector<64x64xf32>
    %167 = arith.select %149, %165, %166 : vector<64x64xi1>, vector<64x64xf32>
    %cst_60 = arith.constant dense<0.000000e+00> : vector<64xf32>
    %168 = vector.multi_reduction <add>, %167, %cst_60 [1] : vector<64x64xf32> to vector<64xf32>
    %169 = vector.shape_cast %168 : vector<64xf32> to vector<64x1xf32>
    %170 = vector.extract_strided_slice %1 {offsets = [0, 1], sizes = [64, 1], strides = [1, 1]} : vector<64x3xf32> to vector<64x1xf32>
    %171 = arith.subf %169, %170 : vector<64x1xf32>
    %172 = vector.shape_cast %171 : vector<64x1xf32> to vector<64xf32>
    %c0_61 = arith.constant 0 : index
    %c2_62 = arith.constant 2 : index
    %c1_63 = arith.constant 1 : index
    %c0_64 = arith.constant 0 : index
    %173 = vector.load %arg4[%c0_61, %c2_62, %c1_63, %c0_64] : memref<1x8x3x64xf32, #tpu.memory_space<vmem>>, vector<1x1x1x64xf32>
    %174 = vector.shape_cast %173 : vector<1x1x1x64xf32> to vector<64xf32>
    %175 = vector.shape_cast %172 : vector<64xf32> to vector<1x1x1x64xf32>
    tpu.vector_store %arg4[%c0_61, %c2_62, %c1_63, %c0_64], %175 {strides = array<i32>} : memref<1x8x3x64xf32, #tpu.memory_space<vmem>>, vector<1x1x1x64xf32>,
    %176 = vector.extract_strided_slice %3 {offsets = [2, 0], sizes = [1, 64], strides = [1, 1]} : vector<3x64xf32> to vector<1x64xf32>
    %cst_65 = arith.constant 0.000000e+00 : f32
    %177 = vector.shape_cast %176 : vector<1x64xf32> to vector<1x64xf32>
    %178 = vector.broadcast %177 : vector<1x64xf32> to vector<64x64xf32>
    %179 = vector.broadcast %cst_65 : f32 to vector<64x64xf32>
    %180 = arith.select %149, %178, %179 : vector<64x64xi1>, vector<64x64xf32>
    %cst_66 = arith.constant dense<0.000000e+00> : vector<64xf32>
    %181 = vector.multi_reduction <add>, %180, %cst_66 [1] : vector<64x64xf32> to vector<64xf32>
    %182 = vector.shape_cast %181 : vector<64xf32> to vector<64x1xf32>
    %183 = vector.extract_strided_slice %1 {offsets = [0, 2], sizes = [64, 1], strides = [1, 1]} : vector<64x3xf32> to vector<64x1xf32>
    %184 = arith.subf %182, %183 : vector<64x1xf32>
    %185 = vector.shape_cast %184 : vector<64x1xf32> to vector<64xf32>
    %c0_67 = arith.constant 0 : index
    %c2_68 = arith.constant 2 : index
    %c2_69 = arith.constant 2 : index
    %c0_70 = arith.constant 0 : index
    %186 = vector.load %arg4[%c0_67, %c2_68, %c2_69, %c0_70] : memref<1x8x3x64xf32, #tpu.memory_space<vmem>>, vector<1x1x1x64xf32>
    %187 = vector.shape_cast %186 : vector<1x1x1x64xf32> to vector<64xf32>
    %188 = vector.shape_cast %185 : vector<64xf32> to vector<1x1x1x64xf32>
    tpu.vector_store %arg4[%c0_67, %c2_68, %c2_69, %c0_70], %188 {strides = array<i32>} : memref<1x8x3x64xf32, #tpu.memory_space<vmem>>, vector<1x1x1x64xf32>,
    %cst_71 = arith.constant 0x7F800000 : f32
    %189 = vector.broadcast %cst_71 : f32 to vector<64x64xf32>
    %190 = arith.select %149, %189, %139 : vector<64x64xi1>, vector<64x64xf32>
    %cst_72 = arith.constant dense<0x7F800000> : vector<64xf32>
    %191 = vector.multi_reduction <minimumf>, %190, %cst_72 [1] : vector<64x64xf32> to vector<64xf32>
    %192 = vector.shape_cast %191 : vector<64xf32> to vector<64x1xf32>
    %193 = vector.broadcast %192 : vector<64x1xf32> to vector<64x64xf32>
    %194 = arith.cmpf oeq, %190, %193 : vector<64x64xf32>
    %cst_73 = arith.constant 6.400000e+01 : f32
    %195 = vector.broadcast %cst_73 : f32 to vector<64x64xf32>
    %196 = arith.select %194, %25, %195 : vector<64x64xi1>, vector<64x64xf32>
    %cst_74 = arith.constant dense<0x7F800000> : vector<64xf32>
    %197 = vector.multi_reduction <minimumf>, %196, %cst_74 [1] : vector<64x64xf32> to vector<64xf32>
    %198 = vector.shape_cast %197 : vector<64xf32> to vector<64x1xf32>
    %199 = vector.broadcast %198 : vector<64x1xf32> to vector<64x64xf32>
    %200 = arith.cmpf oeq, %25, %199 : vector<64x64xf32>
    %201 = vector.extract_strided_slice %3 {offsets = [0, 0], sizes = [1, 64], strides = [1, 1]} : vector<3x64xf32> to vector<1x64xf32>
    %cst_75 = arith.constant 0.000000e+00 : f32
    %202 = vector.shape_cast %201 : vector<1x64xf32> to vector<1x64xf32>
    %203 = vector.broadcast %202 : vector<1x64xf32> to vector<64x64xf32>
    %204 = vector.broadcast %cst_75 : f32 to vector<64x64xf32>
    %205 = arith.select %200, %203, %204 : vector<64x64xi1>, vector<64x64xf32>
    %cst_76 = arith.constant dense<0.000000e+00> : vector<64xf32>
    %206 = vector.multi_reduction <add>, %205, %cst_76 [1] : vector<64x64xf32> to vector<64xf32>
    %207 = vector.shape_cast %206 : vector<64xf32> to vector<64x1xf32>
    %208 = vector.extract_strided_slice %1 {offsets = [0, 0], sizes = [64, 1], strides = [1, 1]} : vector<64x3xf32> to vector<64x1xf32>
    %209 = arith.subf %207, %208 : vector<64x1xf32>
    %210 = vector.shape_cast %209 : vector<64x1xf32> to vector<64xf32>
    %c0_77 = arith.constant 0 : index
    %c3 = arith.constant 3 : index
    %c0_78 = arith.constant 0 : index
    %c0_79 = arith.constant 0 : index
    %211 = vector.load %arg4[%c0_77, %c3, %c0_78, %c0_79] : memref<1x8x3x64xf32, #tpu.memory_space<vmem>>, vector<1x1x1x64xf32>
    %212 = vector.shape_cast %211 : vector<1x1x1x64xf32> to vector<64xf32>
    %213 = vector.shape_cast %210 : vector<64xf32> to vector<1x1x1x64xf32>
    tpu.vector_store %arg4[%c0_77, %c3, %c0_78, %c0_79], %213 {strides = array<i32>} : memref<1x8x3x64xf32, #tpu.memory_space<vmem>>, vector<1x1x1x64xf32>,
    %214 = vector.extract_strided_slice %3 {offsets = [1, 0], sizes = [1, 64], strides = [1, 1]} : vector<3x64xf32> to vector<1x64xf32>
    %cst_80 = arith.constant 0.000000e+00 : f32
    %215 = vector.shape_cast %214 : vector<1x64xf32> to vector<1x64xf32>
    %216 = vector.broadcast %215 : vector<1x64xf32> to vector<64x64xf32>
    %217 = vector.broadcast %cst_80 : f32 to vector<64x64xf32>
    %218 = arith.select %200, %216, %217 : vector<64x64xi1>, vector<64x64xf32>
    %cst_81 = arith.constant dense<0.000000e+00> : vector<64xf32>
    %219 = vector.multi_reduction <add>, %218, %cst_81 [1] : vector<64x64xf32> to vector<64xf32>
    %220 = vector.shape_cast %219 : vector<64xf32> to vector<64x1xf32>
    %221 = vector.extract_strided_slice %1 {offsets = [0, 1], sizes = [64, 1], strides = [1, 1]} : vector<64x3xf32> to vector<64x1xf32>
    %222 = arith.subf %220, %221 : vector<64x1xf32>
    %223 = vector.shape_cast %222 : vector<64x1xf32> to vector<64xf32>
    %c0_82 = arith.constant 0 : index
    %c3_83 = arith.constant 3 : index
    %c1_84 = arith.constant 1 : index
    %c0_85 = arith.constant 0 : index
    %224 = vector.load %arg4[%c0_82, %c3_83, %c1_84, %c0_85] : memref<1x8x3x64xf32, #tpu.memory_space<vmem>>, vector<1x1x1x64xf32>
    %225 = vector.shape_cast %224 : vector<1x1x1x64xf32> to vector<64xf32>
    %226 = vector.shape_cast %223 : vector<64xf32> to vector<1x1x1x64xf32>
    tpu.vector_store %arg4[%c0_82, %c3_83, %c1_84, %c0_85], %226 {strides = array<i32>} : memref<1x8x3x64xf32, #tpu.memory_space<vmem>>, vector<1x1x1x64xf32>,
    %227 = vector.extract_strided_slice %3 {offsets = [2, 0], sizes = [1, 64], strides = [1, 1]} : vector<3x64xf32> to vector<1x64xf32>
    %cst_86 = arith.constant 0.000000e+00 : f32
    %228 = vector.shape_cast %227 : vector<1x64xf32> to vector<1x64xf32>
    %229 = vector.broadcast %228 : vector<1x64xf32> to vector<64x64xf32>
    %230 = vector.broadcast %cst_86 : f32 to vector<64x64xf32>
    %231 = arith.select %200, %229, %230 : vector<64x64xi1>, vector<64x64xf32>
    %cst_87 = arith.constant dense<0.000000e+00> : vector<64xf32>
    %232 = vector.multi_reduction <add>, %231, %cst_87 [1] : vector<64x64xf32> to vector<64xf32>
    %233 = vector.shape_cast %232 : vector<64xf32> to vector<64x1xf32>
    %234 = vector.extract_strided_slice %1 {offsets = [0, 2], sizes = [64, 1], strides = [1, 1]} : vector<64x3xf32> to vector<64x1xf32>
    %235 = arith.subf %233, %234 : vector<64x1xf32>
    %236 = vector.shape_cast %235 : vector<64x1xf32> to vector<64xf32>
    %c0_88 = arith.constant 0 : index
    %c3_89 = arith.constant 3 : index
    %c2_90 = arith.constant 2 : index
    %c0_91 = arith.constant 0 : index
    %237 = vector.load %arg4[%c0_88, %c3_89, %c2_90, %c0_91] : memref<1x8x3x64xf32, #tpu.memory_space<vmem>>, vector<1x1x1x64xf32>
    %238 = vector.shape_cast %237 : vector<1x1x1x64xf32> to vector<64xf32>
    %239 = vector.shape_cast %236 : vector<64xf32> to vector<1x1x1x64xf32>
    tpu.vector_store %arg4[%c0_88, %c3_89, %c2_90, %c0_91], %239 {strides = array<i32>} : memref<1x8x3x64xf32, #tpu.memory_space<vmem>>, vector<1x1x1x64xf32>,
    %cst_92 = arith.constant 0x7F800000 : f32
    %240 = vector.broadcast %cst_92 : f32 to vector<64x64xf32>
    %241 = arith.select %200, %240, %190 : vector<64x64xi1>, vector<64x64xf32>
    %cst_93 = arith.constant dense<0x7F800000> : vector<64xf32>
    %242 = vector.multi_reduction <minimumf>, %241, %cst_93 [1] : vector<64x64xf32> to vector<64xf32>
    %243 = vector.shape_cast %242 : vector<64xf32> to vector<64x1xf32>
    %244 = vector.broadcast %243 : vector<64x1xf32> to vector<64x64xf32>
    %245 = arith.cmpf oeq, %241, %244 : vector<64x64xf32>
    %cst_94 = arith.constant 6.400000e+01 : f32
    %246 = vector.broadcast %cst_94 : f32 to vector<64x64xf32>
    %247 = arith.select %245, %25, %246 : vector<64x64xi1>, vector<64x64xf32>
    %cst_95 = arith.constant dense<0x7F800000> : vector<64xf32>
    %248 = vector.multi_reduction <minimumf>, %247, %cst_95 [1] : vector<64x64xf32> to vector<64xf32>
    %249 = vector.shape_cast %248 : vector<64xf32> to vector<64x1xf32>
    %250 = vector.broadcast %249 : vector<64x1xf32> to vector<64x64xf32>
    %251 = arith.cmpf oeq, %25, %250 : vector<64x64xf32>
    %252 = vector.extract_strided_slice %3 {offsets = [0, 0], sizes = [1, 64], strides = [1, 1]} : vector<3x64xf32> to vector<1x64xf32>
    %cst_96 = arith.constant 0.000000e+00 : f32
    %253 = vector.shape_cast %252 : vector<1x64xf32> to vector<1x64xf32>
    %254 = vector.broadcast %253 : vector<1x64xf32> to vector<64x64xf32>
    %255 = vector.broadcast %cst_96 : f32 to vector<64x64xf32>
    %256 = arith.select %251, %254, %255 : vector<64x64xi1>, vector<64x64xf32>
    %cst_97 = arith.constant dense<0.000000e+00> : vector<64xf32>
    %257 = vector.multi_reduction <add>, %256, %cst_97 [1] : vector<64x64xf32> to vector<64xf32>
    %258 = vector.shape_cast %257 : vector<64xf32> to vector<64x1xf32>
    %259 = vector.extract_strided_slice %1 {offsets = [0, 0], sizes = [64, 1], strides = [1, 1]} : vector<64x3xf32> to vector<64x1xf32>
    %260 = arith.subf %258, %259 : vector<64x1xf32>
    %261 = vector.shape_cast %260 : vector<64x1xf32> to vector<64xf32>
    %c0_98 = arith.constant 0 : index
    %c4 = arith.constant 4 : index
    %c0_99 = arith.constant 0 : index
    %c0_100 = arith.constant 0 : index
    %262 = vector.load %arg4[%c0_98, %c4, %c0_99, %c0_100] : memref<1x8x3x64xf32, #tpu.memory_space<vmem>>, vector<1x1x1x64xf32>
    %263 = vector.shape_cast %262 : vector<1x1x1x64xf32> to vector<64xf32>
    %264 = vector.shape_cast %261 : vector<64xf32> to vector<1x1x1x64xf32>
    tpu.vector_store %arg4[%c0_98, %c4, %c0_99, %c0_100], %264 {strides = array<i32>} : memref<1x8x3x64xf32, #tpu.memory_space<vmem>>, vector<1x1x1x64xf32>,
    %265 = vector.extract_strided_slice %3 {offsets = [1, 0], sizes = [1, 64], strides = [1, 1]} : vector<3x64xf32> to vector<1x64xf32>
    %cst_101 = arith.constant 0.000000e+00 : f32
    %266 = vector.shape_cast %265 : vector<1x64xf32> to vector<1x64xf32>
    %267 = vector.broadcast %266 : vector<1x64xf32> to vector<64x64xf32>
    %268 = vector.broadcast %cst_101 : f32 to vector<64x64xf32>
    %269 = arith.select %251, %267, %268 : vector<64x64xi1>, vector<64x64xf32>
    %cst_102 = arith.constant dense<0.000000e+00> : vector<64xf32>
    %270 = vector.multi_reduction <add>, %269, %cst_102 [1] : vector<64x64xf32> to vector<64xf32>
    %271 = vector.shape_cast %270 : vector<64xf32> to vector<64x1xf32>
    %272 = vector.extract_strided_slice %1 {offsets = [0, 1], sizes = [64, 1], strides = [1, 1]} : vector<64x3xf32> to vector<64x1xf32>
    %273 = arith.subf %271, %272 : vector<64x1xf32>
    %274 = vector.shape_cast %273 : vector<64x1xf32> to vector<64xf32>
    %c0_103 = arith.constant 0 : index
    %c4_104 = arith.constant 4 : index
    %c1_105 = arith.constant 1 : index
    %c0_106 = arith.constant 0 : index
    %275 = vector.load %arg4[%c0_103, %c4_104, %c1_105, %c0_106] : memref<1x8x3x64xf32, #tpu.memory_space<vmem>>, vector<1x1x1x64xf32>
    %276 = vector.shape_cast %275 : vector<1x1x1x64xf32> to vector<64xf32>
    %277 = vector.shape_cast %274 : vector<64xf32> to vector<1x1x1x64xf32>
    tpu.vector_store %arg4[%c0_103, %c4_104, %c1_105, %c0_106], %277 {strides = array<i32>} : memref<1x8x3x64xf32, #tpu.memory_space<vmem>>, vector<1x1x1x64xf32>,
    %278 = vector.extract_strided_slice %3 {offsets = [2, 0], sizes = [1, 64], strides = [1, 1]} : vector<3x64xf32> to vector<1x64xf32>
    %cst_107 = arith.constant 0.000000e+00 : f32
    %279 = vector.shape_cast %278 : vector<1x64xf32> to vector<1x64xf32>
    %280 = vector.broadcast %279 : vector<1x64xf32> to vector<64x64xf32>
    %281 = vector.broadcast %cst_107 : f32 to vector<64x64xf32>
    %282 = arith.select %251, %280, %281 : vector<64x64xi1>, vector<64x64xf32>
    %cst_108 = arith.constant dense<0.000000e+00> : vector<64xf32>
    %283 = vector.multi_reduction <add>, %282, %cst_108 [1] : vector<64x64xf32> to vector<64xf32>
    %284 = vector.shape_cast %283 : vector<64xf32> to vector<64x1xf32>
    %285 = vector.extract_strided_slice %1 {offsets = [0, 2], sizes = [64, 1], strides = [1, 1]} : vector<64x3xf32> to vector<64x1xf32>
    %286 = arith.subf %284, %285 : vector<64x1xf32>
    %287 = vector.shape_cast %286 : vector<64x1xf32> to vector<64xf32>
    %c0_109 = arith.constant 0 : index
    %c4_110 = arith.constant 4 : index
    %c2_111 = arith.constant 2 : index
    %c0_112 = arith.constant 0 : index
    %288 = vector.load %arg4[%c0_109, %c4_110, %c2_111, %c0_112] : memref<1x8x3x64xf32, #tpu.memory_space<vmem>>, vector<1x1x1x64xf32>
    %289 = vector.shape_cast %288 : vector<1x1x1x64xf32> to vector<64xf32>
    %290 = vector.shape_cast %287 : vector<64xf32> to vector<1x1x1x64xf32>
    tpu.vector_store %arg4[%c0_109, %c4_110, %c2_111, %c0_112], %290 {strides = array<i32>} : memref<1x8x3x64xf32, #tpu.memory_space<vmem>>, vector<1x1x1x64xf32>,
    %cst_113 = arith.constant 0x7F800000 : f32
    %291 = vector.broadcast %cst_113 : f32 to vector<64x64xf32>
    %292 = arith.select %251, %291, %241 : vector<64x64xi1>, vector<64x64xf32>
    %cst_114 = arith.constant dense<0x7F800000> : vector<64xf32>
    %293 = vector.multi_reduction <minimumf>, %292, %cst_114 [1] : vector<64x64xf32> to vector<64xf32>
    %294 = vector.shape_cast %293 : vector<64xf32> to vector<64x1xf32>
    %295 = vector.broadcast %294 : vector<64x1xf32> to vector<64x64xf32>
    %296 = arith.cmpf oeq, %292, %295 : vector<64x64xf32>
    %cst_115 = arith.constant 6.400000e+01 : f32
    %297 = vector.broadcast %cst_115 : f32 to vector<64x64xf32>
    %298 = arith.select %296, %25, %297 : vector<64x64xi1>, vector<64x64xf32>
    %cst_116 = arith.constant dense<0x7F800000> : vector<64xf32>
    %299 = vector.multi_reduction <minimumf>, %298, %cst_116 [1] : vector<64x64xf32> to vector<64xf32>
    %300 = vector.shape_cast %299 : vector<64xf32> to vector<64x1xf32>
    %301 = vector.broadcast %300 : vector<64x1xf32> to vector<64x64xf32>
    %302 = arith.cmpf oeq, %25, %301 : vector<64x64xf32>
    %303 = vector.extract_strided_slice %3 {offsets = [0, 0], sizes = [1, 64], strides = [1, 1]} : vector<3x64xf32> to vector<1x64xf32>
    %cst_117 = arith.constant 0.000000e+00 : f32
    %304 = vector.shape_cast %303 : vector<1x64xf32> to vector<1x64xf32>
    %305 = vector.broadcast %304 : vector<1x64xf32> to vector<64x64xf32>
    %306 = vector.broadcast %cst_117 : f32 to vector<64x64xf32>
    %307 = arith.select %302, %305, %306 : vector<64x64xi1>, vector<64x64xf32>
    %cst_118 = arith.constant dense<0.000000e+00> : vector<64xf32>
    %308 = vector.multi_reduction <add>, %307, %cst_118 [1] : vector<64x64xf32> to vector<64xf32>
    %309 = vector.shape_cast %308 : vector<64xf32> to vector<64x1xf32>
    %310 = vector.extract_strided_slice %1 {offsets = [0, 0], sizes = [64, 1], strides = [1, 1]} : vector<64x3xf32> to vector<64x1xf32>
    %311 = arith.subf %309, %310 : vector<64x1xf32>
    %312 = vector.shape_cast %311 : vector<64x1xf32> to vector<64xf32>
    %c0_119 = arith.constant 0 : index
    %c5 = arith.constant 5 : index
    %c0_120 = arith.constant 0 : index
    %c0_121 = arith.constant 0 : index
    %313 = vector.load %arg4[%c0_119, %c5, %c0_120, %c0_121] : memref<1x8x3x64xf32, #tpu.memory_space<vmem>>, vector<1x1x1x64xf32>
    %314 = vector.shape_cast %313 : vector<1x1x1x64xf32> to vector<64xf32>
    %315 = vector.shape_cast %312 : vector<64xf32> to vector<1x1x1x64xf32>
    tpu.vector_store %arg4[%c0_119, %c5, %c0_120, %c0_121], %315 {strides = array<i32>} : memref<1x8x3x64xf32, #tpu.memory_space<vmem>>, vector<1x1x1x64xf32>,
    %316 = vector.extract_strided_slice %3 {offsets = [1, 0], sizes = [1, 64], strides = [1, 1]} : vector<3x64xf32> to vector<1x64xf32>
    %cst_122 = arith.constant 0.000000e+00 : f32
    %317 = vector.shape_cast %316 : vector<1x64xf32> to vector<1x64xf32>
    %318 = vector.broadcast %317 : vector<1x64xf32> to vector<64x64xf32>
    %319 = vector.broadcast %cst_122 : f32 to vector<64x64xf32>
    %320 = arith.select %302, %318, %319 : vector<64x64xi1>, vector<64x64xf32>
    %cst_123 = arith.constant dense<0.000000e+00> : vector<64xf32>
    %321 = vector.multi_reduction <add>, %320, %cst_123 [1] : vector<64x64xf32> to vector<64xf32>
    %322 = vector.shape_cast %321 : vector<64xf32> to vector<64x1xf32>
    %323 = vector.extract_strided_slice %1 {offsets = [0, 1], sizes = [64, 1], strides = [1, 1]} : vector<64x3xf32> to vector<64x1xf32>
    %324 = arith.subf %322, %323 : vector<64x1xf32>
    %325 = vector.shape_cast %324 : vector<64x1xf32> to vector<64xf32>
    %c0_124 = arith.constant 0 : index
    %c5_125 = arith.constant 5 : index
    %c1_126 = arith.constant 1 : index
    %c0_127 = arith.constant 0 : index
    %326 = vector.load %arg4[%c0_124, %c5_125, %c1_126, %c0_127] : memref<1x8x3x64xf32, #tpu.memory_space<vmem>>, vector<1x1x1x64xf32>
    %327 = vector.shape_cast %326 : vector<1x1x1x64xf32> to vector<64xf32>
    %328 = vector.shape_cast %325 : vector<64xf32> to vector<1x1x1x64xf32>
    tpu.vector_store %arg4[%c0_124, %c5_125, %c1_126, %c0_127], %328 {strides = array<i32>} : memref<1x8x3x64xf32, #tpu.memory_space<vmem>>, vector<1x1x1x64xf32>,
    %329 = vector.extract_strided_slice %3 {offsets = [2, 0], sizes = [1, 64], strides = [1, 1]} : vector<3x64xf32> to vector<1x64xf32>
    %cst_128 = arith.constant 0.000000e+00 : f32
    %330 = vector.shape_cast %329 : vector<1x64xf32> to vector<1x64xf32>
    %331 = vector.broadcast %330 : vector<1x64xf32> to vector<64x64xf32>
    %332 = vector.broadcast %cst_128 : f32 to vector<64x64xf32>
    %333 = arith.select %302, %331, %332 : vector<64x64xi1>, vector<64x64xf32>
    %cst_129 = arith.constant dense<0.000000e+00> : vector<64xf32>
    %334 = vector.multi_reduction <add>, %333, %cst_129 [1] : vector<64x64xf32> to vector<64xf32>
    %335 = vector.shape_cast %334 : vector<64xf32> to vector<64x1xf32>
    %336 = vector.extract_strided_slice %1 {offsets = [0, 2], sizes = [64, 1], strides = [1, 1]} : vector<64x3xf32> to vector<64x1xf32>
    %337 = arith.subf %335, %336 : vector<64x1xf32>
    %338 = vector.shape_cast %337 : vector<64x1xf32> to vector<64xf32>
    %c0_130 = arith.constant 0 : index
    %c5_131 = arith.constant 5 : index
    %c2_132 = arith.constant 2 : index
    %c0_133 = arith.constant 0 : index
    %339 = vector.load %arg4[%c0_130, %c5_131, %c2_132, %c0_133] : memref<1x8x3x64xf32, #tpu.memory_space<vmem>>, vector<1x1x1x64xf32>
    %340 = vector.shape_cast %339 : vector<1x1x1x64xf32> to vector<64xf32>
    %341 = vector.shape_cast %338 : vector<64xf32> to vector<1x1x1x64xf32>
    tpu.vector_store %arg4[%c0_130, %c5_131, %c2_132, %c0_133], %341 {strides = array<i32>} : memref<1x8x3x64xf32, #tpu.memory_space<vmem>>, vector<1x1x1x64xf32>,
    %cst_134 = arith.constant 0x7F800000 : f32
    %342 = vector.broadcast %cst_134 : f32 to vector<64x64xf32>
    %343 = arith.select %302, %342, %292 : vector<64x64xi1>, vector<64x64xf32>
    %cst_135 = arith.constant dense<0x7F800000> : vector<64xf32>
    %344 = vector.multi_reduction <minimumf>, %343, %cst_135 [1] : vector<64x64xf32> to vector<64xf32>
    %345 = vector.shape_cast %344 : vector<64xf32> to vector<64x1xf32>
    %346 = vector.broadcast %345 : vector<64x1xf32> to vector<64x64xf32>
    %347 = arith.cmpf oeq, %343, %346 : vector<64x64xf32>
    %cst_136 = arith.constant 6.400000e+01 : f32
    %348 = vector.broadcast %cst_136 : f32 to vector<64x64xf32>
    %349 = arith.select %347, %25, %348 : vector<64x64xi1>, vector<64x64xf32>
    %cst_137 = arith.constant dense<0x7F800000> : vector<64xf32>
    %350 = vector.multi_reduction <minimumf>, %349, %cst_137 [1] : vector<64x64xf32> to vector<64xf32>
    %351 = vector.shape_cast %350 : vector<64xf32> to vector<64x1xf32>
    %352 = vector.broadcast %351 : vector<64x1xf32> to vector<64x64xf32>
    %353 = arith.cmpf oeq, %25, %352 : vector<64x64xf32>
    %354 = vector.extract_strided_slice %3 {offsets = [0, 0], sizes = [1, 64], strides = [1, 1]} : vector<3x64xf32> to vector<1x64xf32>
    %cst_138 = arith.constant 0.000000e+00 : f32
    %355 = vector.shape_cast %354 : vector<1x64xf32> to vector<1x64xf32>
    %356 = vector.broadcast %355 : vector<1x64xf32> to vector<64x64xf32>
    %357 = vector.broadcast %cst_138 : f32 to vector<64x64xf32>
    %358 = arith.select %353, %356, %357 : vector<64x64xi1>, vector<64x64xf32>
    %cst_139 = arith.constant dense<0.000000e+00> : vector<64xf32>
    %359 = vector.multi_reduction <add>, %358, %cst_139 [1] : vector<64x64xf32> to vector<64xf32>
    %360 = vector.shape_cast %359 : vector<64xf32> to vector<64x1xf32>
    %361 = vector.extract_strided_slice %1 {offsets = [0, 0], sizes = [64, 1], strides = [1, 1]} : vector<64x3xf32> to vector<64x1xf32>
    %362 = arith.subf %360, %361 : vector<64x1xf32>
    %363 = vector.shape_cast %362 : vector<64x1xf32> to vector<64xf32>
    %c0_140 = arith.constant 0 : index
    %c6 = arith.constant 6 : index
    %c0_141 = arith.constant 0 : index
    %c0_142 = arith.constant 0 : index
    %364 = vector.load %arg4[%c0_140, %c6, %c0_141, %c0_142] : memref<1x8x3x64xf32, #tpu.memory_space<vmem>>, vector<1x1x1x64xf32>
    %365 = vector.shape_cast %364 : vector<1x1x1x64xf32> to vector<64xf32>
    %366 = vector.shape_cast %363 : vector<64xf32> to vector<1x1x1x64xf32>
    tpu.vector_store %arg4[%c0_140, %c6, %c0_141, %c0_142], %366 {strides = array<i32>} : memref<1x8x3x64xf32, #tpu.memory_space<vmem>>, vector<1x1x1x64xf32>,
    %367 = vector.extract_strided_slice %3 {offsets = [1, 0], sizes = [1, 64], strides = [1, 1]} : vector<3x64xf32> to vector<1x64xf32>
    %cst_143 = arith.constant 0.000000e+00 : f32
    %368 = vector.shape_cast %367 : vector<1x64xf32> to vector<1x64xf32>
    %369 = vector.broadcast %368 : vector<1x64xf32> to vector<64x64xf32>
    %370 = vector.broadcast %cst_143 : f32 to vector<64x64xf32>
    %371 = arith.select %353, %369, %370 : vector<64x64xi1>, vector<64x64xf32>
    %cst_144 = arith.constant dense<0.000000e+00> : vector<64xf32>
    %372 = vector.multi_reduction <add>, %371, %cst_144 [1] : vector<64x64xf32> to vector<64xf32>
    %373 = vector.shape_cast %372 : vector<64xf32> to vector<64x1xf32>
    %374 = vector.extract_strided_slice %1 {offsets = [0, 1], sizes = [64, 1], strides = [1, 1]} : vector<64x3xf32> to vector<64x1xf32>
    %375 = arith.subf %373, %374 : vector<64x1xf32>
    %376 = vector.shape_cast %375 : vector<64x1xf32> to vector<64xf32>
    %c0_145 = arith.constant 0 : index
    %c6_146 = arith.constant 6 : index
    %c1_147 = arith.constant 1 : index
    %c0_148 = arith.constant 0 : index
    %377 = vector.load %arg4[%c0_145, %c6_146, %c1_147, %c0_148] : memref<1x8x3x64xf32, #tpu.memory_space<vmem>>, vector<1x1x1x64xf32>
    %378 = vector.shape_cast %377 : vector<1x1x1x64xf32> to vector<64xf32>
    %379 = vector.shape_cast %376 : vector<64xf32> to vector<1x1x1x64xf32>
    tpu.vector_store %arg4[%c0_145, %c6_146, %c1_147, %c0_148], %379 {strides = array<i32>} : memref<1x8x3x64xf32, #tpu.memory_space<vmem>>, vector<1x1x1x64xf32>,
    %380 = vector.extract_strided_slice %3 {offsets = [2, 0], sizes = [1, 64], strides = [1, 1]} : vector<3x64xf32> to vector<1x64xf32>
    %cst_149 = arith.constant 0.000000e+00 : f32
    %381 = vector.shape_cast %380 : vector<1x64xf32> to vector<1x64xf32>
    %382 = vector.broadcast %381 : vector<1x64xf32> to vector<64x64xf32>
    %383 = vector.broadcast %cst_149 : f32 to vector<64x64xf32>
    %384 = arith.select %353, %382, %383 : vector<64x64xi1>, vector<64x64xf32>
    %cst_150 = arith.constant dense<0.000000e+00> : vector<64xf32>
    %385 = vector.multi_reduction <add>, %384, %cst_150 [1] : vector<64x64xf32> to vector<64xf32>
    %386 = vector.shape_cast %385 : vector<64xf32> to vector<64x1xf32>
    %387 = vector.extract_strided_slice %1 {offsets = [0, 2], sizes = [64, 1], strides = [1, 1]} : vector<64x3xf32> to vector<64x1xf32>
    %388 = arith.subf %386, %387 : vector<64x1xf32>
    %389 = vector.shape_cast %388 : vector<64x1xf32> to vector<64xf32>
    %c0_151 = arith.constant 0 : index
    %c6_152 = arith.constant 6 : index
    %c2_153 = arith.constant 2 : index
    %c0_154 = arith.constant 0 : index
    %390 = vector.load %arg4[%c0_151, %c6_152, %c2_153, %c0_154] : memref<1x8x3x64xf32, #tpu.memory_space<vmem>>, vector<1x1x1x64xf32>
    %391 = vector.shape_cast %390 : vector<1x1x1x64xf32> to vector<64xf32>
    %392 = vector.shape_cast %389 : vector<64xf32> to vector<1x1x1x64xf32>
    tpu.vector_store %arg4[%c0_151, %c6_152, %c2_153, %c0_154], %392 {strides = array<i32>} : memref<1x8x3x64xf32, #tpu.memory_space<vmem>>, vector<1x1x1x64xf32>,
    %cst_155 = arith.constant 0x7F800000 : f32
    %393 = vector.broadcast %cst_155 : f32 to vector<64x64xf32>
    %394 = arith.select %353, %393, %343 : vector<64x64xi1>, vector<64x64xf32>
    %cst_156 = arith.constant dense<0x7F800000> : vector<64xf32>
    %395 = vector.multi_reduction <minimumf>, %394, %cst_156 [1] : vector<64x64xf32> to vector<64xf32>
    %396 = vector.shape_cast %395 : vector<64xf32> to vector<64x1xf32>
    %397 = vector.broadcast %396 : vector<64x1xf32> to vector<64x64xf32>
    %398 = arith.cmpf oeq, %394, %397 : vector<64x64xf32>
    %cst_157 = arith.constant 6.400000e+01 : f32
    %399 = vector.broadcast %cst_157 : f32 to vector<64x64xf32>
    %400 = arith.select %398, %25, %399 : vector<64x64xi1>, vector<64x64xf32>
    %cst_158 = arith.constant dense<0x7F800000> : vector<64xf32>
    %401 = vector.multi_reduction <minimumf>, %400, %cst_158 [1] : vector<64x64xf32> to vector<64xf32>
    %402 = vector.shape_cast %401 : vector<64xf32> to vector<64x1xf32>
    %403 = vector.broadcast %402 : vector<64x1xf32> to vector<64x64xf32>
    %404 = arith.cmpf oeq, %25, %403 : vector<64x64xf32>
    %405 = vector.extract_strided_slice %3 {offsets = [0, 0], sizes = [1, 64], strides = [1, 1]} : vector<3x64xf32> to vector<1x64xf32>
    %cst_159 = arith.constant 0.000000e+00 : f32
    %406 = vector.shape_cast %405 : vector<1x64xf32> to vector<1x64xf32>
    %407 = vector.broadcast %406 : vector<1x64xf32> to vector<64x64xf32>
    %408 = vector.broadcast %cst_159 : f32 to vector<64x64xf32>
    %409 = arith.select %404, %407, %408 : vector<64x64xi1>, vector<64x64xf32>
    %cst_160 = arith.constant dense<0.000000e+00> : vector<64xf32>
    %410 = vector.multi_reduction <add>, %409, %cst_160 [1] : vector<64x64xf32> to vector<64xf32>
    %411 = vector.shape_cast %410 : vector<64xf32> to vector<64x1xf32>
    %412 = vector.extract_strided_slice %1 {offsets = [0, 0], sizes = [64, 1], strides = [1, 1]} : vector<64x3xf32> to vector<64x1xf32>
    %413 = arith.subf %411, %412 : vector<64x1xf32>
    %414 = vector.shape_cast %413 : vector<64x1xf32> to vector<64xf32>
    %c0_161 = arith.constant 0 : index
    %c7 = arith.constant 7 : index
    %c0_162 = arith.constant 0 : index
    %c0_163 = arith.constant 0 : index
    %415 = vector.load %arg4[%c0_161, %c7, %c0_162, %c0_163] : memref<1x8x3x64xf32, #tpu.memory_space<vmem>>, vector<1x1x1x64xf32>
    %416 = vector.shape_cast %415 : vector<1x1x1x64xf32> to vector<64xf32>
    %417 = vector.shape_cast %414 : vector<64xf32> to vector<1x1x1x64xf32>
    tpu.vector_store %arg4[%c0_161, %c7, %c0_162, %c0_163], %417 {strides = array<i32>} : memref<1x8x3x64xf32, #tpu.memory_space<vmem>>, vector<1x1x1x64xf32>,
    %418 = vector.extract_strided_slice %3 {offsets = [1, 0], sizes = [1, 64], strides = [1, 1]} : vector<3x64xf32> to vector<1x64xf32>
    %cst_164 = arith.constant 0.000000e+00 : f32
    %419 = vector.shape_cast %418 : vector<1x64xf32> to vector<1x64xf32>
    %420 = vector.broadcast %419 : vector<1x64xf32> to vector<64x64xf32>
    %421 = vector.broadcast %cst_164 : f32 to vector<64x64xf32>
    %422 = arith.select %404, %420, %421 : vector<64x64xi1>, vector<64x64xf32>
    %cst_165 = arith.constant dense<0.000000e+00> : vector<64xf32>
    %423 = vector.multi_reduction <add>, %422, %cst_165 [1] : vector<64x64xf32> to vector<64xf32>
    %424 = vector.shape_cast %423 : vector<64xf32> to vector<64x1xf32>
    %425 = vector.extract_strided_slice %1 {offsets = [0, 1], sizes = [64, 1], strides = [1, 1]} : vector<64x3xf32> to vector<64x1xf32>
    %426 = arith.subf %424, %425 : vector<64x1xf32>
    %427 = vector.shape_cast %426 : vector<64x1xf32> to vector<64xf32>
    %c0_166 = arith.constant 0 : index
    %c7_167 = arith.constant 7 : index
    %c1_168 = arith.constant 1 : index
    %c0_169 = arith.constant 0 : index
    %428 = vector.load %arg4[%c0_166, %c7_167, %c1_168, %c0_169] : memref<1x8x3x64xf32, #tpu.memory_space<vmem>>, vector<1x1x1x64xf32>
    %429 = vector.shape_cast %428 : vector<1x1x1x64xf32> to vector<64xf32>
    %430 = vector.shape_cast %427 : vector<64xf32> to vector<1x1x1x64xf32>
    tpu.vector_store %arg4[%c0_166, %c7_167, %c1_168, %c0_169], %430 {strides = array<i32>} : memref<1x8x3x64xf32, #tpu.memory_space<vmem>>, vector<1x1x1x64xf32>,
    %431 = vector.extract_strided_slice %3 {offsets = [2, 0], sizes = [1, 64], strides = [1, 1]} : vector<3x64xf32> to vector<1x64xf32>
    %cst_170 = arith.constant 0.000000e+00 : f32
    %432 = vector.shape_cast %431 : vector<1x64xf32> to vector<1x64xf32>
    %433 = vector.broadcast %432 : vector<1x64xf32> to vector<64x64xf32>
    %434 = vector.broadcast %cst_170 : f32 to vector<64x64xf32>
    %435 = arith.select %404, %433, %434 : vector<64x64xi1>, vector<64x64xf32>
    %cst_171 = arith.constant dense<0.000000e+00> : vector<64xf32>
    %436 = vector.multi_reduction <add>, %435, %cst_171 [1] : vector<64x64xf32> to vector<64xf32>
    %437 = vector.shape_cast %436 : vector<64xf32> to vector<64x1xf32>
    %438 = vector.extract_strided_slice %1 {offsets = [0, 2], sizes = [64, 1], strides = [1, 1]} : vector<64x3xf32> to vector<64x1xf32>
    %439 = arith.subf %437, %438 : vector<64x1xf32>
    %440 = vector.shape_cast %439 : vector<64x1xf32> to vector<64xf32>
    %c0_172 = arith.constant 0 : index
    %c7_173 = arith.constant 7 : index
    %c2_174 = arith.constant 2 : index
    %c0_175 = arith.constant 0 : index
    %441 = vector.load %arg4[%c0_172, %c7_173, %c2_174, %c0_175] : memref<1x8x3x64xf32, #tpu.memory_space<vmem>>, vector<1x1x1x64xf32>
    %442 = vector.shape_cast %441 : vector<1x1x1x64xf32> to vector<64xf32>
    %443 = vector.shape_cast %440 : vector<64xf32> to vector<1x1x1x64xf32>
    tpu.vector_store %arg4[%c0_172, %c7_173, %c2_174, %c0_175], %443 {strides = array<i32>} : memref<1x8x3x64xf32, #tpu.memory_space<vmem>>, vector<1x1x1x64xf32>,
    return
  }
  func.func @transform_0(%arg0: i32, %arg1: i32) -> (i32, i32, i32) {
    %c0_i32 = arith.constant 0 : i32
    %c0_i32_0 = arith.constant 0 : i32
    return %arg0, %arg1, %c0_i32 : i32, i32, i32
  }
  func.func @transform_1(%arg0: i32, %arg1: i32) -> (i32, i32, i32) {
    %c0_i32 = arith.constant 0 : i32
    %c0_i32_0 = arith.constant 0 : i32
    %c0_i32_1 = arith.constant 0 : i32
    return %arg0, %c0_i32, %c0_i32_0 : i32, i32, i32
  }
  func.func @transform_2(%arg0: i32, %arg1: i32) -> (i32, i32, i32, i32) {
    %c0_i32 = arith.constant 0 : i32
    %c0_i32_0 = arith.constant 0 : i32
    %c0_i32_1 = arith.constant 0 : i32
    return %arg0, %c0_i32, %c0_i32_0, %arg1 : i32, i32, i32, i32
  }
}

</mosaic_0001>

<bundles_post_ra>
// kernel: tpu_custom_call.1
= control target key start
LH: loop header
LB: loop body
LE: loop exit
PB: predicated region body
PF: predicated region fallthrough
CT: control target
= control target key end

     0   :  { %s4125_s9 = smov 0   ;;  %s4127_s10 = smov 0   ;;  %s6873_s0 = inlined_call_operand.vmem [shape: f32[2,64,3], index: 0, kind: input, shape index: {}]   ;;  %s6874_s1 = inlined_call_operand.vmem [shape: f32[2,3,64], index: 1, kind: input, shape index: {}]   ;;  %s6875_s2 = inlined_call_operand.vmem [shape: f32[2,8,3,64], index: 2, kind: output, shape index: {}]  }
   0x1   :  { %s4129_s11 = smov 0  }
   0x2 LB: > { %s24_s12 = sadd.s32 1, %s4101_s10  ;;  %p3935_p0 = scmp.ge.s32.totalorder %s4105_s11, 1  ;;  %s4105_s11 = sphi %s4129_s11, %s12_s11   ;;  %s4101_s10 = sphi %s4127_s10, %s6899_s10   ;;  %s4097_s9 = sphi %s4125_s9, %s6898_s9  }
   0x3   : > { %p26_p1 = scmp.ge.s32.totalorder %s24_s12, 2  ;;  %p142_p2 = scmp.lt.s32.totalorder %s4105_s11, 3 }
   0x5   : > { %s6901_s12 = smov (%p26_p1, %s24_s12), 0  ;;  %p143_p3 = pnand %p3935_p0, %p142_p2 }
   0x6   : > { %p176_p4 = scmp.lt.s32.totalorder (!%p143_p3), %s4097_s9, 1  ;;  %v4107_v0 = vmov (!%p143_p3), 0   ;;  %v4108_v9 = vmov (!%p143_p3), 1   ;;  %v4109_v10 = vmov (!%p143_p3), 2   ;;  %v246_v19 = vlaneseq (!%p143_p3) }
   0x7   : > { %146 = sbr.rel (%p143_p3) target bundleno = 3939 (0xf63), region = 28  ;;  %3994 = vset.pattern.permute.xlu1 (!%p143_p3), %v4107_v0  ;;  %3993 = vset.pattern.permute.xlu0 (!%p143_p3), %v4107_v0  ;;  %vm389_vm0 = vcmask (!%p143_p3), 523264  }
   0x8   : > { %v4213_v22 = vshrl.u32 (!%p143_p3), %v246_v19, 7 }
   0xa   : > { %v300_v23 = vsub.s32 (!%p143_p3), 1, %v4213_v22  ;;  %v248_v27 = vsub.s32 (!%p143_p3), 0, %v4213_v22  ;;  %v360_v31 = vsub.s32 (!%p143_p3), 2, %v4213_v22 }
   0xe   : > { %s6903_s9 = smov (!%p176_p4, %s4097_s9), 1 }
   0xf   : > { %s3964_s13 = sshll.u32 %s6903_s9, 6  ;;  %s3938_s17 = sshll.u32 %s6903_s9, 2 }
  0x10   : > { %s4151_s16 = scalar_lea.vmem %s6873_s0, %s3964_s13  ;;  %s188_s20 = scalar_lea.vmem %s6874_s1, %s3938_s17 }
  0x11   : > { %v4154_v1 = vld [vmem:[%s4151_s16 + $0x10] sm:$0xff]  ;;  %v4157_v2 = vld [vmem:[%s4151_s16] sm:$0xff]  ;;  %v4162_v3 = vld [vmem:[%s4151_s16 + $0x18] sm:$0xff]  ;;  %s3965_s21 = sshll.u32 %s6903_s9, 5 }
  0x12   : > { %218 = vperm.xlu1 %3994, %v4154_v1   ;;  %208 = vperm.xlu0 %3993, %v4157_v2   ;;  %v4165_v4 = vld [vmem:[%s4151_s16 + $0x8] sm:$0xff]  ;;  %v4173_v6 = vld [vmem:[%s4151_s16 + $0x20] sm:$0xff]  ;;  %v4178_v7 = vld [vmem:[%s4151_s16 + $0x38] sm:$0xff]  ;;  %s4705_s24 = scalar_lea.vmem %s6875_s2, %s3965_s21 }
  0x13   : > { %v4170_v5 = vld [vmem:[%s4151_s16 + $0x28] sm:$0xff]  ;;  %v4181_v8 = vld [vmem:[%s4151_s16 + $0x30] sm:$0xff]  ;;  %v205_v26 = vld [vmem:[%s188_s20] sm:$0x7] }
  0x14   : > { %v4220_v28 = vrot.slane %v205_v26, %v300_v23  ;;  %v4223_v32 = vrot.slane %v205_v26, %v248_v27  ;;  %v4227_v37 = vrot.slane %v205_v26, %v360_v31 }
  0x16   : > { %223 = vperm.xlu1 %3994, %v4162_v3   ;;  %213 = vperm.xlu0 %3993, %v4165_v4  }
  0x1a   : > { %233 = vperm.xlu1 %3994, %v4170_v5   ;;  %228 = vperm.xlu0 %3993, %v4173_v6  }
  0x1e   : > { %243 = vperm.xlu1 %3994, %v4178_v7   ;;  %238 = vperm.xlu0 %3993, %v4181_v8  }
  0x22   : > { %3996 = vset.pattern.permute.xlu1 %v4108_v9  ;;  %3995 = vset.pattern.permute.xlu0 %v4108_v9 }
  0x23   : > { %271 = vperm.xlu1 %3996, %v4165_v4   ;;  %267 = vperm.xlu0 %3995, %v4157_v2  }
  0x27   : > { %275 = vperm.xlu1 %3996, %v4154_v1   ;;  %279 = vperm.xlu0 %3995, %v4162_v3  }
  0x2b   : > { %283 = vperm.xlu1 %3996, %v4173_v6   ;;  %287 = vperm.xlu0 %3995, %v4170_v5  }
  0x2f   : > { %291 = vperm.xlu1 %3996, %v4181_v8   ;;  %295 = vperm.xlu0 %3995, %v4178_v7  }
  0x33   : > { %3997 = vset.pattern.permute.xlu1 %v4109_v10  ;;  %3998 = vset.pattern.permute.xlu0 %v4109_v10 }
  0x34   : > { %327 = vperm.xlu1 %3997, %v4157_v2   ;;  %331 = vperm.xlu0 %3998, %v4165_v4  }
  0x38   : > { %335 = vperm.xlu1 %3997, %v4154_v1   ;;  %343 = vperm.xlu0 %3998, %v4173_v6  }
  0x3c   : > { %339 = vperm.xlu1 %3997, %v4162_v3   ;;  %351 = vperm.xlu0 %3998, %v4181_v8  }
  0x40   : > { %347 = vperm.xlu1 %3997, %v4170_v5   ;;  %4000 = vset.pattern.permute.xlu0 %v4107_v0 }
  0x44   : > { %355 = vperm.xlu1 %3997, %v4178_v7  }
  0x48   : > { %3999 = vset.pattern.permute.xlu1 %v4107_v0 }
  0x91   : > { %v219_v11 = vpop.permute.xlu1 %218  ;;  %v209_v12 = vpop.permute.xlu0 %208 }
  0x92   : > { %v250_v38 = vsub.f32 %v209_v12, %v4223_v32  ;;  %v252_v40 = vsub.f32 %v219_v11, %v4223_v32 }
  0x94   : > { %v258_v49 = vmul.f32 %v250_v38, %v250_v38  ;;  %v260_v53 = vmul.f32 %v252_v40, %v252_v40 }
  0x95   : > { %v224_v13 = vpop.permute.xlu1 %223  ;;  %v214_v14 = vpop.permute.xlu0 %213 }
  0x96   : > { %v251_v39 = vsub.f32 %v214_v14, %v4223_v32  ;;  %v253_v61 = vsub.f32 %v224_v13, %v4223_v32 }
  0x98   : > { %v259_v50 = vmul.f32 %v251_v39, %v251_v39 }
  0x99   : > { %v4207_v15 = vpop.permute.xlu1 %233  ;;  %v229_v16 = vpop.permute.xlu0 %228 }
  0x9a   : > { %v254_v45 = vsub.f32 %v229_v16, %v4223_v32 }
  0x9c   : > { %v262_v62 = vmul.f32 %v254_v45, %v254_v45 }
  0x9d   : > { %v4209_v17 = vpop.permute.xlu1 %243  ;;  %v239_v18 = vpop.permute.xlu0 %238 }
  0x9e   : > { %v256_v63 = vsub.f32 %v239_v18, %v4223_v32 }
  0xa2   : > { %v272_v20 = vpop.permute.xlu1 %271  ;;  %v268_v21 = vpop.permute.xlu0 %267 }
  0xa3   : > { %v303_v33 = vsub.f32 %v272_v20, %v4220_v28  ;;  %v302_v34 = vsub.f32 %v268_v21, %v4220_v28 }
  0xa5   : > { %v311_v43 = vmul.f32 %v303_v33, %v303_v33  ;;  %v310_v44 = vmul.f32 %v302_v34, %v302_v34  ;;  %v261_v33 = vmul.f32 %v253_v61, %v253_v61  ;;  %v255_v34 = vsub.f32 %v4207_v15, %v4223_v32 }
  0xa6   : > { %v276_v24 = vpop.permute.xlu1 %275  ;;  %v280_v25 = vpop.permute.xlu0 %279 }
  0xa7   : > { %v304_v41 = vsub.f32 %v276_v24, %v4220_v28  ;;  %v305_v46 = vsub.f32 %v280_v25, %v4220_v28  ;;  %v319_v57 = vadd.f32 %v311_v43, %v259_v50  ;;  %v318_v58 = vadd.f32 %v310_v44, %v258_v49 }
  0xa8   : > { %v263_v50 = vmul.f32 %v255_v34, %v255_v34 }
  0xa9   : > { %v312_v54 = vmul.f32 %v304_v41, %v304_v41  ;;  %v313_v11 = vmul.f32 %v305_v46, %v305_v46 }
  0xaa   : > { %v284_v29 = vpop.permute.xlu1 %283  ;;  %v288_v30 = vpop.permute.xlu0 %287 }
  0xab   : > { %v306_v42 = vsub.f32 %v284_v29, %v4220_v28  ;;  %v320_v24 = vadd.f32 %v312_v54, %v260_v53  ;;  %v307_v26 = vsub.f32 %v288_v30, %v4220_v28  ;;  %v321_v43 = vadd.f32 %v313_v11, %v261_v33 }
  0xad   : > { %v314_v55 = vmul.f32 %v306_v42, %v306_v42  ;;  %v315_v44 = vmul.f32 %v307_v26, %v307_v26 }
  0xae   : > { %v292_v35 = vpop.permute.xlu1 %291  ;;  %v296_v36 = vpop.permute.xlu0 %295 }
  0xaf   : > { %v308_v56 = vsub.f32 %v292_v35, %v4220_v28  ;;  %v322_v25 = vadd.f32 %v314_v55, %v262_v62  ;;  %v264_v35 = vmul.f32 %v256_v63, %v256_v63  ;;  %v309_v46 = vsub.f32 %v296_v36, %v4220_v28 }
  0xb0   : > { %v323_v55 = vadd.f32 %v315_v44, %v263_v50 }
  0xb1   : > { %v316_v27 = vmul.f32 %v308_v56, %v308_v56  ;;  %v317_v56 = vmul.f32 %v309_v46, %v309_v46 }
  0xb3   : > { %v328_v47 = vpop.permute.xlu1 %327  ;;  %v332_v48 = vpop.permute.xlu0 %331  ;;  %v324_v45 = vadd.f32 %v316_v27, %v264_v35 }
  0xb4   : > { %v362_v51 = vsub.f32 %v328_v47, %v4227_v37  ;;  %v363_v52 = vsub.f32 %v332_v48, %v4227_v37 }
  0xb6   : > { %v370_v59 = vmul.f32 %v362_v51, %v362_v51  ;;  %v371_v60 = vmul.f32 %v363_v52, %v363_v52  ;;  %v257_v52 = vsub.f32 %v4209_v17, %v4223_v32 }
  0xb7   : > { %v336_v12 = vpop.permute.xlu1 %335  ;;  %v344_v14 = vpop.permute.xlu0 %343 }
  0xb8   : > { %v4241_v16 = vadd.f32 %v370_v59, %v318_v58  ;;  %v4243_v20 = vadd.f32 %v371_v60, %v319_v57  ;;  %v364_v21 = vsub.f32 %v336_v12, %v4227_v37  ;;  %v366_v23 = vsub.f32 %v344_v14, %v4227_v37 }
  0xb9   : > { %v265_v61 = vmul.f32 %v257_v52, %v257_v52 }
  0xba   : > { %v372_v13 = vmul.f32 %v364_v21, %v364_v21  ;;  %v374_v29 = vmul.f32 %v366_v23, %v366_v23  ;;  %v390_v18 = vsel %vm389_vm0, %v4241_v16, inf  ;;  %v393_v31 = vsel %vm389_vm0, %v4243_v20, inf }
  0xbb   : > { %v340_v38 = vpop.permute.xlu1 %339  ;;  %391 = vmin.xlane.f32.xlu0 %v390_v18  ;;  %394 = vmin.xlane.f32.xlu1 %v393_v31  ;;  %v352_v39 = vpop.permute.xlu0 %351  ;;  %v325_v63 = vadd.f32 %v317_v56, %v265_v61  ;;  %v4286_v23 = vand.u32 127, %v246_v19 }
  0xbc   : > { %v4254_v40 = vadd.f32 %v372_v13, %v320_v24  ;;  %v4256_v30 = vadd.f32 %v374_v29, %v322_v25  ;;  %v365_v41 = vsub.f32 %v340_v38, %v4227_v37  ;;  %v368_v42 = vsub.f32 %v352_v39, %v4227_v37 }
  0xbd   : > { %v4289_v24 = vcvt.s32.f32 %v4286_v23 }
  0xbe   : > { %v373_v47 = vmul.f32 %v365_v41, %v365_v41  ;;  %v376_v15 = vmul.f32 %v368_v42, %v368_v42  ;;  %v396_v48 = vsel %vm389_vm0, %v4254_v40, inf  ;;  %v402_v49 = vsel %vm389_vm0, %v4256_v30, inf }
  0xbf   : > { %v348_v51 = vpop.permute.xlu1 %347  ;;  %397 = vmin.xlane.f32.xlu0 %v396_v48  ;;  %403 = vmin.xlane.f32.xlu1 %v402_v49 }
  0xc0   : > { %v4267_v53 = vadd.f32 %v373_v47, %v321_v43  ;;  %v4269_v54 = vadd.f32 %v376_v15, %v324_v45  ;;  %v367_v36 = vsub.f32 %v348_v51, %v4227_v37 }
  0xc2   : > { %v375_v57 = vmul.f32 %v367_v36, %v367_v36  ;;  %v399_v58 = vsel %vm389_vm0, %v4267_v53, inf  ;;  %v408_v59 = vsel %vm389_vm0, %v4269_v54, inf }
  0xc3   : > { %v356_v60 = vpop.permute.xlu1 %355  ;;  %400 = vmin.xlane.f32.xlu0 %v399_v58  ;;  %409 = vmin.xlane.f32.xlu1 %v408_v59 }
  0xc4   : > { %v4276_v17 = vadd.f32 %v375_v57, %v323_v55  ;;  %v369_v62 = vsub.f32 %v356_v60, %v4227_v37 }
  0xc6   : > { %v377_v11 = vmul.f32 %v369_v62, %v369_v62  ;;  %v405_v12 = vsel %vm389_vm0, %v4276_v17, inf }
  0xc7   : > { %406 = vmin.xlane.f32.xlu0 %v405_v12 }
  0xc8   : > { %v4281_v14 = vadd.f32 %v377_v11, %v325_v63 }
  0xca   : > { %v411_v21 = vsel %vm389_vm0, %v4281_v14, inf }
  0xcb   : > { %412 = vmin.xlane.f32.xlu0 %v411_v21 }
 0x148   : > { %v395_v25 = vpop.xlane.xlu1 %394  ;;  %v392_v26 = vpop.xlane.xlu0 %391 }
 0x149   : > { %vm415_vm1 = vcmp.eq.f32.partialorder %v4243_v20, %v395_v25  ;;  %vm414_vm2 = vcmp.eq.f32.partialorder %v4241_v16, %v392_v26 }
 0x14a   : > { %v423_v27 = vsel %vm415_vm1, %v4289_v24, 64.0  ;;  %v422_v13 = vsel %vm414_vm2, %v4289_v24, 64.0 }
 0x14b   : > { %v433_v29 = vsel %vm389_vm0, %v423_v27, inf  ;;  %v430_v18 = vsel %vm389_vm0, %v422_v13, inf }
 0x14c   : > { %434 = vmin.xlane.f32.xlu0 %v433_v29  ;;  %v404_v19 = vpop.xlane.xlu1 %403  ;;  %431 = vmin.xlane.f32.xlu1 %v430_v18  ;;  %v398_v31 = vpop.xlane.xlu0 %397 }
 0x14d   : > { %vm418_vm3 = vcmp.eq.f32.partialorder %v4256_v30, %v404_v19  ;;  %vm416_vm4 = vcmp.eq.f32.partialorder %v4254_v40, %v398_v31 }
 0x14e   : > { %v424_v33 = vsel %vm416_vm4, %v4289_v24, 64.0  ;;  %v426_v39 = vsel %vm418_vm3, %v4289_v24, 64.0 }
 0x14f   : > { %v436_v34 = vsel %vm389_vm0, %v424_v33, inf  ;;  %v442_v42 = vsel %vm389_vm0, %v426_v39, inf }
 0x150   : > { %v410_v35 = vpop.xlane.xlu1 %409  ;;  %437 = vmin.xlane.f32.xlu1 %v436_v34  ;;  %v401_v38 = vpop.xlane.xlu0 %400 }
 0x151   : > { %vm420_vm5 = vcmp.eq.f32.partialorder %v4269_v54, %v410_v35  ;;  %vm417_vm6 = vcmp.eq.f32.partialorder %v4267_v53, %v401_v38 }
 0x152   : > { %v425_v41 = vsel %vm417_vm6, %v4289_v24, 64.0  ;;  %v428_v45 = vsel %vm420_vm5, %v4289_v24, 64.0 }
 0x153   : > { %v439_v43 = vsel %vm389_vm0, %v425_v41, inf  ;;  %v448_v47 = vsel %vm389_vm0, %v428_v45, inf }
 0x154   : > { %443 = vmin.xlane.f32.xlu1 %v442_v42  ;;  %440 = vmin.xlane.f32.xlu0 %v439_v43  ;;  %v407_v44 = vpop.xlane.xlu0 %406 }
 0x155   : > { %vm419_vm7 = vcmp.eq.f32.partialorder %v4276_v17, %v407_v44 }
 0x156   : > { %v427_v46 = vsel %vm419_vm7, %v4289_v24, 64.0 }
 0x157   : > { %v445_v15 = vsel %vm389_vm0, %v427_v46, inf }
 0x158   : > { %449 = vmin.xlane.f32.xlu1 %v448_v47  ;;  %446 = vmin.xlane.f32.xlu0 %v445_v15  ;;  %v413_v48 = vpop.xlane.xlu0 %412 }
 0x159   : > { %vm421_vm8 = vcmp.eq.f32.partialorder %v4281_v14, %v413_v48 }
 0x15a   : > { %v429_v49 = vsel %vm421_vm8, %v4289_v24, 64.0 }
 0x15b   : > { %v451_v50 = vsel %vm389_vm0, %v429_v49, inf }
 0x15c   : > { %452 = vmin.xlane.f32.xlu0 %v451_v50 }
 0x1d9   : > { %v432_v51 = vpop.xlane.xlu1 %431  ;;  %v435_v52 = vpop.xlane.xlu0 %434 }
 0x1da   : > { %vm454_vm9 = vcmp.eq.f32.partialorder %v4289_v24, %v432_v51  ;;  %vm455_vm10 = vcmp.eq.f32.partialorder %v4289_v24, %v435_v52 }
 0x1db   : > { %v4318_v36 = vsel %vm454_vm9, inf, %v4241_v16  ;;  %v4321_v55 = vsel %vm455_vm10, inf, %v4243_v20 }
 0x1dc   : > { %v470_v56 = vsel %vm389_vm0, %v4318_v36, inf  ;;  %v473_v57 = vsel %vm389_vm0, %v4321_v55, inf }
 0x1dd   : > { %471 = vmin.xlane.f32.xlu1 %v470_v56  ;;  %v438_v58 = vpop.xlane.xlu1 %437  ;;  %474 = vmin.xlane.f32.xlu0 %v473_v57 }
 0x1de   : > { %vm456_vm11 = vcmp.eq.f32.partialorder %v4289_v24, %v438_v58 }
 0x1df   : > { %v4329_v59 = vsel %vm456_vm11, inf, %v4254_v40 }
 0x1e0   : > { %v476_v16 = vsel %vm389_vm0, %v4329_v59, inf }
 0x1e1   : > { %477 = vmin.xlane.f32.xlu1 %v476_v16  ;;  %v444_v20 = vpop.xlane.xlu1 %443  ;;  %v441_v60 = vpop.xlane.xlu0 %440 }
 0x1e2   : > { %vm458_vm12 = vcmp.eq.f32.partialorder %v4289_v24, %v444_v20  ;;  %vm457_vm13 = vcmp.eq.f32.partialorder %v4289_v24, %v441_v60 }
 0x1e3   : > { %v4336_v61 = vsel %vm458_vm12, inf, %v4256_v30  ;;  %v4339_v62 = vsel %vm457_vm13, inf, %v4267_v53 }
 0x1e4   : > { %v482_v40 = vsel %vm389_vm0, %v4336_v61, inf  ;;  %v479_v63 = vsel %vm389_vm0, %v4339_v62, inf }
 0x1e5   : > { %483 = vmin.xlane.f32.xlu1 %v482_v40  ;;  %v450_v11 = vpop.xlane.xlu1 %449  ;;  %480 = vmin.xlane.f32.xlu0 %v479_v63  ;;  %v447_v12 = vpop.xlane.xlu0 %446 }
 0x1e6   : > { %vm460_vm14 = vcmp.eq.f32.partialorder %v4289_v24, %v450_v11  ;;  %vm459_vm15 = vcmp.eq.f32.partialorder %v4289_v24, %v447_v12 }
 0x1e7   : > { %v4348_v30 = vsel %vm460_vm14, inf, %v4269_v54  ;;  %v4351_v53 = vsel %vm459_vm15, inf, %v4276_v17 }
 0x1e8   : > { %v488_v21 = vsel %vm389_vm0, %v4348_v30, inf  ;;  %v485_v25 = vsel %vm389_vm0, %v4351_v53, inf }
 0x1e9   : > { %489 = vmin.xlane.f32.xlu1 %v488_v21  ;;  %486 = vmin.xlane.f32.xlu0 %v485_v25  ;;  %v453_v26 = vpop.xlane.xlu0 %452 }
 0x1ea   : > { %vm461_vm1 = vcmp.eq.f32.partialorder %v4289_v24, %v453_v26 }
 0x1eb   : > { %v4359_v27 = vsel %vm461_vm1, inf, %v4281_v14 }
 0x1ec   : > { %v491_v54 = vsel %vm389_vm0, %v4359_v27, inf }
 0x1ed   : > { %492 = vmin.xlane.f32.xlu0 %v491_v54 }
 0x26a   : > { %v472_v17 = vpop.xlane.xlu1 %471  ;;  %v475_v13 = vpop.xlane.xlu0 %474 }
 0x26b   : > { %vm494_vm2 = vcmp.eq.f32.partialorder %v4318_v36, %v472_v17  ;;  %vm495_vm3 = vcmp.eq.f32.partialorder %v4321_v55, %v475_v13 }
 0x26c   : > { %v502_v29 = vsel %vm494_vm2, %v4289_v24, 64.0  ;;  %v503_v18 = vsel %vm495_vm3, %v4289_v24, 64.0 }
 0x26d   : > { %v510_v19 = vsel %vm389_vm0, %v502_v29, inf  ;;  %v513_v31 = vsel %vm389_vm0, %v503_v18, inf }
 0x26e   : > { %511 = vmin.xlane.f32.xlu1 %v510_v19  ;;  %v478_v14 = vpop.xlane.xlu1 %477  ;;  %514 = vmin.xlane.f32.xlu0 %v513_v31 }
 0x26f   : > { %vm496_vm4 = vcmp.eq.f32.partialorder %v4329_v59, %v478_v14 }
 0x270   : > { %v504_v33 = vsel %vm496_vm4, %v4289_v24, 64.0 }
 0x271   : > { %v516_v34 = vsel %vm389_vm0, %v504_v33, inf }
 0x272   : > { %517 = vmin.xlane.f32.xlu1 %v516_v34  ;;  %v484_v35 = vpop.xlane.xlu1 %483  ;;  %v481_v38 = vpop.xlane.xlu0 %480 }
 0x273   : > { %vm498_vm5 = vcmp.eq.f32.partialorder %v4336_v61, %v484_v35  ;;  %vm497_vm6 = vcmp.eq.f32.partialorder %v4339_v62, %v481_v38 }
 0x274   : > { %v506_v39 = vsel %vm498_vm5, %v4289_v24, 64.0  ;;  %v505_v41 = vsel %vm497_vm6, %v4289_v24, 64.0 }
 0x275   : > { %v522_v42 = vsel %vm389_vm0, %v506_v39, inf  ;;  %v519_v43 = vsel %vm389_vm0, %v505_v41, inf }
 0x276   : > { %523 = vmin.xlane.f32.xlu1 %v522_v42  ;;  %v490_v44 = vpop.xlane.xlu1 %489  ;;  %520 = vmin.xlane.f32.xlu0 %v519_v43  ;;  %v487_v45 = vpop.xlane.xlu0 %486 }
 0x277   : > { %vm500_vm7 = vcmp.eq.f32.partialorder %v4348_v30, %v490_v44  ;;  %vm499_vm8 = vcmp.eq.f32.partialorder %v4351_v53, %v487_v45 }
 0x278   : > { %v508_v46 = vsel %vm500_vm7, %v4289_v24, 64.0  ;;  %v507_v47 = vsel %vm499_vm8, %v4289_v24, 64.0 }
 0x279   : > { %v528_v15 = vsel %vm389_vm0, %v508_v46, inf  ;;  %v525_v48 = vsel %vm389_vm0, %v507_v47, inf }
 0x27a   : > { %529 = vmin.xlane.f32.xlu1 %v528_v15  ;;  %526 = vmin.xlane.f32.xlu0 %v525_v48  ;;  %v493_v49 = vpop.xlane.xlu0 %492 }
 0x27b   : > { %vm501_vm9 = vcmp.eq.f32.partialorder %v4359_v27, %v493_v49 }
 0x27c   : > { %v509_v50 = vsel %vm501_vm9, %v4289_v24, 64.0 }
 0x27d   : > { %v531_v51 = vsel %vm389_vm0, %v509_v50, inf }
 0x27e   : > { %532 = vmin.xlane.f32.xlu0 %v531_v51 }
 0x2fb   : > { %v4387_v52 = vpop.xlane.xlu1 %511  ;;  %v4389_v56 = vpop.xlane.xlu0 %514 }
 0x2fc   : > { %vm534_vm10 = vcmp.eq.f32.partialorder %v4289_v24, %v4387_v52  ;;  %vm535_vm11 = vcmp.eq.f32.partialorder %v4289_v24, %v4389_v56 }
 0x2fd   : > { %v542_v57 = vsel %vm534_vm10, %v4223_v32, 0.0  ;;  %v543_v58 = vsel %vm535_vm11, %v4223_v32, 0.0  ;;  %v670_v33 = vsel %vm534_vm10, %v4220_v28, 0.0  ;;  %v671_v41 = vsel %vm535_vm11, %v4220_v28, 0.0 }
 0x2fe   : > { %v550_v16 = vsel %vm389_vm0, %v542_v57, 0.0  ;;  %v553_v20 = vsel %vm389_vm0, %v543_v58, 0.0  ;;  %v678_v35 = vsel %vm389_vm0, %v670_v33, 0.0  ;;  %v681_v43 = vsel %vm389_vm0, %v671_v41, 0.0 }
 0x2ff   : > { %551 = vadd.xlane.f32.xlu1 %v550_v16  ;;  %v4405_v60 = vpop.xlane.xlu1 %517  ;;  %554 = vadd.xlane.f32.xlu0 %v553_v20  ;;  %v783_v51 = vsel %vm534_vm10, %v4227_v37, 0.0 }
 0x300   : > { %vm536_vm12 = vcmp.eq.f32.partialorder %v4289_v24, %v4405_v60  ;;  %v791_v58 = vsel %vm389_vm0, %v783_v51, 0.0 }
 0x301   : > { %v544_v40 = vsel %vm536_vm12, %v4223_v32, 0.0  ;;  %v672_v39 = vsel %vm536_vm12, %v4220_v28, 0.0 }
 0x302   : > { %v556_v63 = vsel %vm389_vm0, %v544_v40, 0.0  ;;  %v684_v42 = vsel %vm389_vm0, %v672_v39, 0.0  ;;  %v784_v40 = vsel %vm535_vm11, %v4227_v37, 0.0 }
 0x303   : > { %557 = vadd.xlane.f32.xlu1 %v556_v63  ;;  %v4414_v11 = vpop.xlane.xlu1 %523  ;;  %v4416_v12 = vpop.xlane.xlu0 %520 }
 0x304   : > { %vm538_vm13 = vcmp.eq.f32.partialorder %v4289_v24, %v4414_v11  ;;  %vm537_vm14 = vcmp.eq.f32.partialorder %v4289_v24, %v4416_v12 }
 0x305   : > { %v546_v21 = vsel %vm538_vm13, %v4223_v32, 0.0  ;;  %v545_v25 = vsel %vm537_vm14, %v4223_v32, 0.0  ;;  %v674_v44 = vsel %vm538_vm13, %v4220_v28, 0.0  ;;  %v673_v45 = vsel %vm537_vm14, %v4220_v28, 0.0 }
 0x306   : > { %v562_v26 = vsel %vm389_vm0, %v546_v21, 0.0  ;;  %v559_v54 = vsel %vm389_vm0, %v545_v25, 0.0  ;;  %v690_v46 = vsel %vm389_vm0, %v674_v44, 0.0  ;;  %v687_v47 = vsel %vm389_vm0, %v673_v45, 0.0 }
 0x307   : > { %563 = vadd.xlane.f32.xlu1 %v562_v26  ;;  %v4432_v17 = vpop.xlane.xlu1 %529  ;;  %560 = vadd.xlane.f32.xlu0 %v559_v54  ;;  %v4434_v13 = vpop.xlane.xlu0 %526  ;;  %v786_v20 = vsel %vm537_vm14, %v4227_v37, 0.0  ;;  %v794_v21 = vsel %vm389_vm0, %v784_v40, 0.0  ;;  %v785_v26 = vsel %vm536_vm12, %v4227_v37, 0.0  ;;  %v4551_v41 = vsel %vm537_vm14, inf, %v4339_v62 }
 0x308   : > { %vm540_vm15 = vcmp.eq.f32.partialorder %v4289_v24, %v4432_v17  ;;  %vm539_vm1 = vcmp.eq.f32.partialorder %v4289_v24, %v4434_v13  ;;  %v800_v63 = vsel %vm389_vm0, %v786_v20, 0.0  ;;  %v913_v52 = vsel %vm389_vm0, %v4551_v41, inf }
 0x309   : > { %v548_v29 = vsel %vm540_vm15, %v4223_v32, 0.0  ;;  %v547_v18 = vsel %vm539_vm1, %v4223_v32, 0.0  ;;  %v676_v15 = vsel %vm540_vm15, %v4220_v28, 0.0  ;;  %v675_v48 = vsel %vm539_vm1, %v4220_v28, 0.0 }
 0x30a   : > { %v568_v19 = vsel %vm389_vm0, %v548_v29, 0.0  ;;  %v565_v31 = vsel %vm389_vm0, %v547_v18, 0.0  ;;  %v696_v49 = vsel %vm389_vm0, %v676_v15, 0.0  ;;  %v693_v50 = vsel %vm389_vm0, %v675_v48, 0.0 }
 0x30b   : > { %569 = vadd.xlane.f32.xlu1 %v568_v19  ;;  %566 = vadd.xlane.f32.xlu0 %v565_v31  ;;  %v4450_v14 = vpop.xlane.xlu0 %532  ;;  %v788_v25 = vsel %vm539_vm1, %v4227_v37, 0.0  ;;  %v797_v29 = vsel %vm389_vm0, %v785_v26, 0.0  ;;  %v787_v19 = vsel %vm538_vm13, %v4227_v37, 0.0  ;;  %v4567_v62 = vsel %vm539_vm1, inf, %v4351_v53 }
 0x30c   : > { %vm541_vm2 = vcmp.eq.f32.partialorder %v4289_v24, %v4450_v14  ;;  %v806_v54 = vsel %vm389_vm0, %v788_v25, 0.0  ;;  %v803_v33 = vsel %vm389_vm0, %v787_v19, 0.0  ;;  %v919_v56 = vsel %vm389_vm0, %v4567_v62, inf }
 0x30d   : > { %v549_v34 = vsel %vm541_vm2, %v4223_v32, 0.0  ;;  %v677_v57 = vsel %vm541_vm2, %v4220_v28, 0.0  ;;  %v790_v18 = vsel %vm541_vm2, %v4227_v37, 0.0  ;;  %v4583_v53 = vsel %vm541_vm2, inf, %v4359_v27 }
 0x30e   : > { %v571_v38 = vsel %vm389_vm0, %v549_v34, 0.0  ;;  %v699_v16 = vsel %vm389_vm0, %v677_v57, 0.0  ;;  %v812_v31 = vsel %vm389_vm0, %v790_v18, 0.0  ;;  %v4538_v34 = vsel %vm534_vm10, inf, %v4318_v36 }
 0x30f   : > { %679 = vadd.xlane.f32.xlu1 %v678_v35  ;;  %572 = vadd.xlane.f32.xlu0 %v571_v38  ;;  %v789_v35 = vsel %vm540_vm15, %v4227_v37, 0.0  ;;  %v904_v38 = vsel %vm389_vm0, %v4538_v34, inf  ;;  %v4557_v36 = vsel %vm535_vm11, inf, %v4321_v55  ;;  %v4573_v55 = vsel %vm536_vm12, inf, %v4329_v59 }
 0x310   : > { %v809_v39 = vsel %vm389_vm0, %v789_v35, 0.0  ;;  %v910_v12 = vsel %vm389_vm0, %v4573_v55, inf  ;;  %v4589_v59 = vsel %vm538_vm13, inf, %v4336_v61  ;;  %v925_v60 = vsel %vm389_vm0, %v4583_v53, inf }
 0x311   : > { %v916_v13 = vsel %vm389_vm0, %v4589_v59, inf  ;;  %v4599_v27 = vsel %vm540_vm15, inf, %v4348_v30  ;;  %vm623_vm11 = vcmask 130112   ;;  %vm630_vm12 = vcmask 195712  }
 0x312   : > { %v922_v14 = vsel %vm389_vm0, %v4599_v27, inf  ;;  %vm637_vm13 = vcmask 261312   ;;  %vm644_vm14 = vcmask 326912   ;;  %vm651_vm15 = vcmask 392512  }
 0x313   : > { %685 = vadd.xlane.f32.xlu1 %v684_v42  ;;  %682 = vadd.xlane.f32.xlu0 %v681_v43  ;;  %v907_v42 = vsel %vm389_vm0, %v4557_v36, inf  ;;  %vm658_vm1 = vcmask 458112   ;;  %vm665_vm2 = vcmask 523712  }
 0x317   : > { %691 = vadd.xlane.f32.xlu1 %v690_v46  ;;  %688 = vadd.xlane.f32.xlu0 %v687_v47 }
 0x31b   : > { %697 = vadd.xlane.f32.xlu1 %v696_v49  ;;  %694 = vadd.xlane.f32.xlu0 %v693_v50 }
 0x31f   : > { %792 = vadd.xlane.f32.xlu1 %v791_v58  ;;  %700 = vadd.xlane.f32.xlu0 %v699_v16 }
 0x323   : > { %801 = vadd.xlane.f32.xlu1 %v800_v63  ;;  %795 = vadd.xlane.f32.xlu0 %v794_v21 }
 0x327   : > { %807 = vadd.xlane.f32.xlu1 %v806_v54  ;;  %798 = vadd.xlane.f32.xlu0 %v797_v29 }
 0x32b   : > { %813 = vadd.xlane.f32.xlu1 %v812_v31  ;;  %804 = vadd.xlane.f32.xlu0 %v803_v33 }
 0x32f   : > { %905 = vmin.xlane.f32.xlu1 %v904_v38  ;;  %810 = vadd.xlane.f32.xlu0 %v809_v39 }
 0x333   : > { %914 = vmin.xlane.f32.xlu1 %v913_v52  ;;  %908 = vmin.xlane.f32.xlu0 %v907_v42 }
 0x337   : > { %920 = vmin.xlane.f32.xlu1 %v919_v56  ;;  %911 = vmin.xlane.f32.xlu0 %v910_v12 }
 0x33b   : > { %926 = vmin.xlane.f32.xlu1 %v925_v60  ;;  %917 = vmin.xlane.f32.xlu0 %v916_v13 }
 0x33f   : > { %923 = vmin.xlane.f32.xlu0 %v922_v14 }
 0x38c   : > { %v552_v61 = vpop.xlane.xlu1 %551  ;;  %v555_v11 = vpop.xlane.xlu0 %554 }
 0x38d   : > { %v574_v43 = vsub.f32 %v552_v61, %v4157_v2  ;;  %v575_v44 = vsub.f32 %v555_v11, %v4165_v4 }
 0x38f   : > { %591 = vperm.xlu1 %3999, %v574_v43   ;;  %594 = vperm.xlu0 %4000, %v575_v44  }
 0x390   : > { %v558_v45 = vpop.xlane.xlu1 %557 }
 0x391   : > { %v576_v46 = vsub.f32 %v558_v45, %v4154_v1 }
 0x393   : > { %597 = vperm.xlu1 %3999, %v576_v46   ;;  %4002 = vset.pattern.permute.xlu0 %v4108_v9 }
 0x394   : > { %v564_v30 = vpop.xlane.xlu1 %563  ;;  %v561_v17 = vpop.xlane.xlu0 %560 }
 0x395   : > { %v577_v47 = vsub.f32 %v561_v17, %v4162_v3  ;;  %v578_v49 = vsub.f32 %v564_v30, %v4173_v6 }
 0x397   : > { %600 = vperm.xlu1 %3999, %v577_v47  }
 0x398   : > { %v570_v15 = vpop.xlane.xlu1 %569  ;;  %v567_v48 = vpop.xlane.xlu0 %566 }
 0x399   : > { %v579_v57 = vsub.f32 %v567_v48, %v4170_v5  ;;  %v580_v20 = vsub.f32 %v570_v15, %v4181_v8 }
 0x39b   : > { %603 = vperm.xlu1 %3999, %v578_v49  }
 0x39c   : > { %v680_v50 = vpop.xlane.xlu1 %679  ;;  %v573_v51 = vpop.xlane.xlu0 %572 }
 0x39d   : > { %v581_v25 = vsub.f32 %v573_v51, %v4178_v7  ;;  %v702_v29 = vsub.f32 %v680_v50, %v4157_v2 }
 0x39f   : > { %606 = vperm.xlu1 %3999, %v579_v57  }
 0x3a0   : > { %v686_v58 = vpop.xlane.xlu1 %685  ;;  %v683_v16 = vpop.xlane.xlu0 %682 }
 0x3a1   : > { %v703_v40 = vsub.f32 %v683_v16, %v4165_v4  ;;  %v704_v33 = vsub.f32 %v686_v58, %v4154_v1 }
 0x3a3   : > { %609 = vperm.xlu1 %3999, %v580_v20   ;;  %722 = vperm.xlu0 %4002, %v703_v40  }
 0x3a4   : > { %v692_v63 = vpop.xlane.xlu1 %691  ;;  %v689_v21 = vpop.xlane.xlu0 %688 }
 0x3a5   : > { %v705_v38 = vsub.f32 %v689_v21, %v4162_v3  ;;  %v706_v42 = vsub.f32 %v692_v63, %v4173_v6 }
 0x3a7   : > { %612 = vperm.xlu1 %3999, %v581_v25   ;;  %4003 = vset.pattern.permute.xlu0 %v4109_v10 }
 0x3a8   : > { %v698_v26 = vpop.xlane.xlu1 %697  ;;  %v695_v54 = vpop.xlane.xlu0 %694 }
 0x3a9   : > { %v707_v60 = vsub.f32 %v695_v54, %v4170_v5  ;;  %v708_v13 = vsub.f32 %v698_v26, %v4181_v8 }
 0x3ab   : > { %4001 = vset.pattern.permute.xlu1 %v4108_v9 }
 0x3ac   : > { %v793_v18 = vpop.xlane.xlu1 %792  ;;  %719 = vperm.xlu1 %4001, %v702_v29   ;;  %v701_v19 = vpop.xlane.xlu0 %700 }
 0x3ad   : > { %v815_v31 = vsub.f32 %v793_v18, %v4157_v2  ;;  %v709_v11 = vsub.f32 %v701_v19, %v4178_v7 }
 0x3af   : > { %832 = vperm.xlu0 %4003, %v815_v31  }
 0x3b0   : > { %725 = vperm.xlu1 %4001, %v704_v33   ;;  %v796_v35 = vpop.xlane.xlu0 %795  ;;  %v802_v39 = vpop.xlane.xlu1 %801  ;;  %v618_v33 = vadd.s32 4294967288, %v4286_v23 }
 0x3b1   : > { %v816_v45 = vsub.f32 %v796_v35, %v4165_v4  ;;  %v818_v4 = vsub.f32 %v802_v39, %v4162_v3  ;;  %v625_v35 = vadd.s32 4294967280, %v4286_v23  ;;  %v639_v39 = vadd.s32 4294967264, %v4286_v23 }
 0x3b3   : > { %4005 = vset.pattern.permute.xlu0 %v4107_v0 }
 0x3b4   : > { %728 = vperm.xlu1 %4001, %v705_v38   ;;  %v799_v52 = vpop.xlane.xlu0 %798  ;;  %v808_v56 = vpop.xlane.xlu1 %807  ;;  %v632_v38 = vadd.s32 4294967272, %v4286_v23 }
 0x3b5   : > { %v817_v17 = vsub.f32 %v799_v52, %v4154_v1  ;;  %v820_v3 = vsub.f32 %v808_v56, %v4170_v5  ;;  %v4666_v56 = vsub.s32 %v618_v33, %v4213_v22 }
 0x3b8   : > { %731 = vperm.xlu1 %4001, %v706_v42   ;;  %v805_v12 = vpop.xlane.xlu0 %804  ;;  %v814_v14 = vpop.xlane.xlu1 %813  ;;  %v4663_v42 = vsub.s32 %v4286_v23, %v4213_v22 }
 0x3b9   : > { %v819_v1 = vsub.f32 %v805_v12, %v4173_v6  ;;  %v822_v20 = vsub.f32 %v814_v14, %v4178_v7  ;;  %v646_v12 = vadd.s32 4294967256, %v4286_v23  ;;  %v4674_v14 = vsub.s32 %v632_v38, %v4213_v22 }
 0x3bc   : > { %734 = vperm.xlu1 %4001, %v707_v60   ;;  %v811_v2 = vpop.xlane.xlu0 %810  ;;  %v906_v43 = vpop.xlane.xlu1 %905 }
 0x3bd   : > { %vm928_vm3 = vcmp.eq.f32.partialorder %v4538_v34, %v906_v43  ;;  %v821_v16 = vsub.f32 %v811_v2, %v4181_v8  ;;  %v4670_v2 = vsub.s32 %v625_v35, %v4213_v22 }
 0x3be   : > { %v936_v30 = vsel %vm928_vm3, %v4289_v24, 64.0  ;;  %vm6876_vm3 = vcmask 516096  }
 0x3bf   : > { %v944_v47 = vsel %vm389_vm0, %v936_v30, inf }
 0x3c0   : > { %737 = vperm.xlu1 %4001, %v708_v13   ;;  %v909_v61 = vpop.xlane.xlu0 %908  ;;  %v915_v6 = vpop.xlane.xlu1 %914  ;;  %v653_v13 = vadd.s32 4294967248, %v4286_v23 }
 0x3c1   : > { %vm929_vm7 = vcmp.eq.f32.partialorder %v4557_v36, %v909_v61  ;;  %vm931_vm8 = vcmp.eq.f32.partialorder %v4551_v41, %v915_v6  ;;  %v4677_v61 = vsub.s32 %v639_v39, %v4213_v22 }
 0x3c2   : > { %v937_v63 = vsel %vm929_vm7, %v4289_v24, 64.0  ;;  %v939_v21 = vsel %vm931_vm8, %v4289_v24, 64.0 }
 0x3c3   : > { %v947_v5 = vsel %vm389_vm0, %v937_v63, inf  ;;  %v953_v7 = vsel %vm389_vm0, %v939_v21, inf }
 0x3c4   : > { %740 = vperm.xlu1 %4001, %v709_v11   ;;  %v912_v44 = vpop.xlane.xlu0 %911  ;;  %v921_v40 = vpop.xlane.xlu1 %920 }
 0x3c5   : > { %vm930_vm4 = vcmp.eq.f32.partialorder %v4573_v55, %v912_v44  ;;  %vm933_vm9 = vcmp.eq.f32.partialorder %v4567_v62, %v921_v40 }
 0x3c6   : > { %v938_v15 = vsel %vm930_vm4, %v4289_v24, 64.0  ;;  %v941_v25 = vsel %vm933_vm9, %v4289_v24, 64.0 }
 0x3c7   : > { %v950_v49 = vsel %vm389_vm0, %v938_v15, inf  ;;  %v959_v26 = vsel %vm389_vm0, %v941_v25, inf }
 0x3c8   : > { %4004 = vset.pattern.permute.xlu1 %v4109_v10  ;;  %v918_v46 = vpop.xlane.xlu0 %917  ;;  %v927_v8 = vpop.xlane.xlu1 %926 }
 0x3c9   : > { %835 = vperm.xlu1 %4004, %v816_v45   ;;  %vm932_vm5 = vcmp.eq.f32.partialorder %v4589_v59, %v918_v46  ;;  %vm935_vm10 = vcmp.eq.f32.partialorder %v4583_v53, %v927_v8  ;;  %v4682_v45 = vsub.s32 %v646_v12, %v4213_v22  ;;  %v660_v46 = vadd.s32 4294967240, %v4286_v23 }
 0x3ca   : > { %v940_v50 = vsel %vm932_vm5, %v4289_v24, 64.0  ;;  %v943_v54 = vsel %vm935_vm10, %v4289_v24, 64.0 }
 0x3cb   : > { %v956_v51 = vsel %vm389_vm0, %v940_v50, inf  ;;  %v965_v18 = vsel %vm389_vm0, %v943_v54, inf  ;;  %v4694_v23 = vsub.s32 %v660_v46, %v4213_v22 }
 0x3cc   : > { %v924_v48 = vpop.xlane.xlu0 %923 }
 0x3cd   : > { %838 = vperm.xlu1 %4004, %v817_v17   ;;  %vm934_vm6 = vcmp.eq.f32.partialorder %v4599_v27, %v924_v48  ;;  %v4687_v17 = vsub.s32 %v653_v13, %v4213_v22 }
 0x3ce   : > { %945 = vmin.xlane.f32.xlu0 %v944_v47  ;;  %v942_v57 = vsel %vm934_vm6, %v4289_v24, 64.0 }
 0x3cf   : > { %v962_v58 = vsel %vm389_vm0, %v942_v57, inf }
 0x3d1   : > { %841 = vperm.xlu1 %4004, %v818_v4  }
 0x3d2   : > { %951 = vmin.xlane.f32.xlu0 %v950_v49 }
 0x3d5   : > { %844 = vperm.xlu1 %4004, %v819_v1  }
 0x3d6   : > { %957 = vmin.xlane.f32.xlu0 %v956_v51 }
 0x3d9   : > { %847 = vperm.xlu1 %4004, %v820_v3  }
 0x3da   : > { %963 = vmin.xlane.f32.xlu0 %v962_v58 }
 0x3dd   : > { %850 = vperm.xlu1 %4004, %v821_v16  }
 0x3e1   : > { %853 = vperm.xlu1 %4004, %v822_v20  }
 0x3e5   : > { %4006 = vset.pattern.permute.xlu1 %v4107_v0 }
 0x405   : > { %948 = vmin.xlane.f32.xlu1 %v947_v5 }
 0x409   : > { %954 = vmin.xlane.f32.xlu1 %v953_v7 }
 0x40d   : > { %960 = vmin.xlane.f32.xlu1 %v959_v26 }
 0x40e   : > { %v592_v29 = vpop.permute.xlu1 %591  ;;  %v595_v60 = vpop.permute.xlu0 %594 }
 0x40f   : > { %v617_v43 = vrot.slane %v592_v29, %v4663_v42  ;;  %v622_v44 = vrot.slane %v595_v60, %v4666_v56 }
 0x411   : > { %966 = vmin.xlane.f32.xlu1 %v965_v18  ;;  %v624_v48 = vsel %vm623_vm11, %v622_v44, %v617_v43 }
 0x412   : > { %v598_v19 = vpop.permute.xlu1 %597 }
 0x413   : > { %v629_v30 = vrot.slane %v598_v19, %v4670_v2 }
 0x415   : > { %v631_v50 = vsel %vm630_vm12, %v629_v30, %v624_v48 }
 0x416   : > { %v601_v31 = vpop.permute.xlu1 %600 }
 0x417   : > { %v636_v47 = vrot.slane %v601_v31, %v4674_v14 }
 0x419   : > { %v638_v51 = vsel %vm637_vm13, %v636_v47, %v631_v50 }
 0x41a   : > { %v604_v52 = vpop.permute.xlu1 %603 }
 0x41b   : > { %v643_v15 = vrot.slane %v604_v52, %v4677_v61 }
 0x41d   : > { %v645_v57 = vsel %vm644_vm14, %v643_v15, %v638_v51 }
 0x41e   : > { %v607_v11 = vpop.permute.xlu1 %606 }
 0x41f   : > { %v650_v49 = vrot.slane %v607_v11, %v4682_v45 }
 0x421   : > { %v652_v58 = vsel %vm651_vm15, %v650_v49, %v645_v57 }
 0x422   : > { %v610_v4 = vpop.permute.xlu1 %609  ;;  %v723_v21 = vpop.permute.xlu0 %722 }
 0x423   : > { %v657_v1 = vrot.slane %v610_v4, %v4687_v17  ;;  %v749_v26 = vrot.slane %v723_v21, %v4666_v56 }
 0x425   : > { %v659_v16 = vsel %vm658_vm1, %v657_v1, %v652_v58 }
 0x426   : > { %v613_v3 = vpop.permute.xlu1 %612 }
 0x427   : > { %v664_v22 = vrot.slane %v613_v3, %v4694_v23 }
 0x429   : > { %v666_v20 = vsel %vm665_vm2, %v664_v22, %v659_v16 }
 0x42a   : > { %669 = vst.msk [vmem:[%s4705_s24] sm:$0x1] %vm6876_vm3, %v666_v20 }
 0x42b   : > { %v720_v6 = vpop.permute.xlu1 %719 }
 0x42c   : > { %v745_v7 = vrot.slane %v720_v6, %v4663_v42 }
 0x42e   : > { %v750_v19 = vsel %vm623_vm11, %v749_v26, %v745_v7  ;;  %v833_v47 = vpop.permute.xlu0 %832 }
 0x42f   : > { %v726_v40 = vpop.permute.xlu1 %725  ;;  %v858_v49 = vrot.slane %v833_v47, %v4663_v42 }
 0x430   : > { %v754_v25 = vrot.slane %v726_v40, %v4670_v2 }
 0x432   : > { %v755_v33 = vsel %vm630_vm12, %v754_v25, %v750_v19 }
 0x433   : > { %v729_v63 = vpop.permute.xlu1 %728 }
 0x434   : > { %v759_v54 = vrot.slane %v729_v63, %v4674_v14 }
 0x436   : > { %v760_v38 = vsel %vm637_vm13, %v759_v54, %v755_v33 }
 0x437   : > { %v732_v5 = vpop.permute.xlu1 %731 }
 0x438   : > { %v764_v29 = vrot.slane %v732_v5, %v4677_v61 }
 0x43a   : > { %v765_v39 = vsel %vm644_vm14, %v764_v29, %v760_v38 }
 0x43b   : > { %v735_v8 = vpop.permute.xlu1 %734 }
 0x43c   : > { %v769_v31 = vrot.slane %v735_v8, %v4682_v45 }
 0x43e   : > { %v770_v12 = vsel %vm651_vm15, %v769_v31, %v765_v39 }
 0x43f   : > { %v738_v18 = vpop.permute.xlu1 %737 }
 0x440   : > { %v774_v35 = vrot.slane %v738_v18, %v4687_v17 }
 0x442   : > { %v775_v13 = vsel %vm658_vm1, %v774_v35, %v770_v12 }
 0x443   : > { %v741_v52 = vpop.permute.xlu1 %740 }
 0x444   : > { %v779_v60 = vrot.slane %v741_v52, %v4694_v23 }
 0x446   : > { %v780_v11 = vsel %vm665_vm2, %v779_v60, %v775_v13 }
 0x447   : > { %782 = vst.msk [vmem:[%s4705_s24 + $0x1] sm:$0x1] %vm6876_vm3, %v780_v11 }
 0x448   : > { %v836_v43 = vpop.permute.xlu1 %835 }
 0x449   : > { %v862_v4 = vrot.slane %v836_v43, %v4666_v56 }
 0x44b   : > { %v863_v3 = vsel %vm623_vm11, %v862_v4, %v858_v49 }
 0x44c   : > { %v839_v44 = vpop.permute.xlu1 %838 }
 0x44d   : > { %v867_v48 = vrot.slane %v839_v44, %v4670_v2 }
 0x44f   : > { %v868_v16 = vsel %vm630_vm12, %v867_v48, %v863_v3 }
 0x450   : > { %v842_v46 = vpop.permute.xlu1 %841 }
 0x451   : > { %v872_v50 = vrot.slane %v842_v46, %v4674_v14 }
 0x453   : > { %v873_v40 = vsel %vm637_vm13, %v872_v50, %v868_v16 }
 0x454   : > { %v845_v30 = vpop.permute.xlu1 %844 }
 0x455   : > { %v877_v51 = vrot.slane %v845_v30, %v4677_v61 }
 0x457   : > { %v878_v5 = vsel %vm644_vm14, %v877_v51, %v873_v40 }
 0x458   : > { %v848_v15 = vpop.permute.xlu1 %847 }
 0x459   : > { %v882_v58 = vrot.slane %v848_v15, %v4682_v45 }
 0x45b   : > { %v4733_v1 = vpop.xlane.xlu0 %945  ;;  %v883_v8 = vsel %vm651_vm15, %v882_v58, %v878_v5 }
 0x45c   : > { %vm968_vm4 = vcmp.eq.f32.partialorder %v4289_v24, %v4733_v1  ;;  %v851_v57 = vpop.permute.xlu1 %850 }
 0x45d   : > { %v976_v22 = vsel %vm968_vm4, %v4223_v32, 0.0  ;;  %v887_v20 = vrot.slane %v851_v57, %v4687_v17  ;;  %v1090_v39 = vsel %vm968_vm4, %v4220_v28, 0.0 }
 0x45e   : > { %v984_v6 = vsel %vm389_vm0, %v976_v22, 0.0  ;;  %v1098_v52 = vsel %vm389_vm0, %v1090_v39, 0.0 }
 0x45f   : > { %985 = vadd.xlane.f32.xlu0 %v984_v6  ;;  %v4748_v63 = vpop.xlane.xlu0 %951  ;;  %v888_v26 = vsel %vm658_vm1, %v887_v20, %v883_v8 }
 0x460   : > { %vm970_vm5 = vcmp.eq.f32.partialorder %v4289_v24, %v4748_v63  ;;  %v854_v21 = vpop.permute.xlu1 %853 }
 0x461   : > { %v892_v7 = vrot.slane %v854_v21, %v4694_v23  ;;  %v978_v25 = vsel %vm970_vm5, %v4223_v32, 0.0  ;;  %v1092_v12 = vsel %vm970_vm5, %v4220_v28, 0.0 }
 0x462   : > { %v990_v54 = vsel %vm389_vm0, %v978_v25, 0.0  ;;  %v1104_v60 = vsel %vm389_vm0, %v1092_v12, 0.0 }
 0x463   : > { %v893_v29 = vsel %vm665_vm2, %v892_v7, %v888_v26  ;;  %991 = vadd.xlane.f32.xlu0 %v990_v54  ;;  %v4762_v18 = vpop.xlane.xlu0 %957 }
 0x464   : > { %895 = vst.msk [vmem:[%s4705_s24 + $0x2] sm:$0x1] %vm6876_vm3, %v893_v29  ;;  %vm972_vm6 = vcmp.eq.f32.partialorder %v4289_v24, %v4762_v18 }
 0x465   : > { %v980_v19 = vsel %vm972_vm6, %v4223_v32, 0.0  ;;  %v1094_v21 = vsel %vm972_vm6, %v4220_v28, 0.0 }
 0x466   : > { %v996_v31 = vsel %vm389_vm0, %v980_v19, 0.0  ;;  %v1110_v7 = vsel %vm389_vm0, %v1094_v21, 0.0 }
 0x467   : > { %997 = vadd.xlane.f32.xlu0 %v996_v31  ;;  %v4773_v33 = vpop.xlane.xlu0 %963  ;;  %v1203_v31 = vsel %vm968_vm4, %v4227_v37, 0.0 }
 0x468   : > { %vm974_vm7 = vcmp.eq.f32.partialorder %v4289_v24, %v4773_v33 }
 0x469   : > { %v982_v35 = vsel %vm974_vm7, %v4223_v32, 0.0  ;;  %v1096_v26 = vsel %vm974_vm7, %v4220_v28, 0.0 }
 0x46a   : > { %v1002_v38 = vsel %vm389_vm0, %v982_v35, 0.0  ;;  %v1116_v29 = vsel %vm389_vm0, %v1096_v26, 0.0 }
 0x46b   : > { %1003 = vadd.xlane.f32.xlu0 %v1002_v38  ;;  %v1211_v38 = vsel %vm389_vm0, %v1203_v31, 0.0 }
 0x46f   : > { %1099 = vadd.xlane.f32.xlu0 %v1098_v52  ;;  %v1205_v52 = vsel %vm970_vm5, %v4227_v37, 0.0 }
 0x473   : > { %1105 = vadd.xlane.f32.xlu0 %v1104_v60  ;;  %v1217_v60 = vsel %vm389_vm0, %v1205_v52, 0.0 }
 0x492   : > { %v949_v13 = vpop.xlane.xlu1 %948 }
 0x493   : > { %vm969_vm8 = vcmp.eq.f32.partialorder %v4289_v24, %v949_v13 }
 0x494   : > { %v977_v11 = vsel %vm969_vm8, %v4223_v32, 0.0  ;;  %v1091_v20 = vsel %vm969_vm8, %v4220_v28, 0.0  ;;  %v1204_v6 = vsel %vm969_vm8, %v4227_v37, 0.0  ;;  %v4884_v12 = vsel %vm969_vm8, inf, %v4557_v36 }
 0x495   : > { %v987_v43 = vsel %vm389_vm0, %v977_v11, 0.0  ;;  %v1101_v40 = vsel %vm389_vm0, %v1091_v20, 0.0  ;;  %v1214_v5 = vsel %vm389_vm0, %v1204_v6, 0.0  ;;  %v1327_v11 = vsel %vm389_vm0, %v4884_v12, inf }
 0x496   : > { %988 = vadd.xlane.f32.xlu1 %v987_v43  ;;  %v4797_v44 = vpop.xlane.xlu1 %954  ;;  %v1207_v43 = vsel %vm972_vm6, %v4227_v37, 0.0 }
 0x497   : > { %vm971_vm9 = vcmp.eq.f32.partialorder %v4289_v24, %v4797_v44  ;;  %v1223_v36 = vsel %vm389_vm0, %v1207_v43, 0.0 }
 0x498   : > { %v979_v46 = vsel %vm971_vm9, %v4223_v32, 0.0  ;;  %v1093_v30 = vsel %vm971_vm9, %v4220_v28, 0.0  ;;  %v1206_v8 = vsel %vm971_vm9, %v4227_v37, 0.0 }
 0x499   : > { %v993_v47 = vsel %vm389_vm0, %v979_v46, 0.0  ;;  %v1107_v15 = vsel %vm389_vm0, %v1093_v30, 0.0  ;;  %v1220_v25 = vsel %vm389_vm0, %v1206_v8, 0.0  ;;  %v4897_v46 = vsel %vm970_vm5, inf, %v4573_v55 }
 0x49a   : > { %994 = vadd.xlane.f32.xlu1 %v993_v47  ;;  %v4811_v4 = vpop.xlane.xlu1 %960  ;;  %1108 = vadd.xlane.f32.xlu0 %v1107_v15  ;;  %v1330_v13 = vsel %vm389_vm0, %v4897_v46, inf  ;;  %v1209_v30 = vsel %vm974_vm7, %v4227_v37, 0.0  ;;  %v4910_v47 = vsel %vm972_vm6, inf, %v4589_v59  ;;  %v4919_v15 = vsel %vm968_vm4, inf, %v4538_v34 }
 0x49b   : > { %vm973_vm10 = vcmp.eq.f32.partialorder %v4289_v24, %v4811_v4  ;;  %v1229_v55 = vsel %vm389_vm0, %v1209_v30, 0.0  ;;  %v1336_v63 = vsel %vm389_vm0, %v4910_v47, inf  ;;  %v4925_v59 = vsel %vm974_vm7, inf, %v4599_v27  ;;  %v4956_v4 = vld [vmem:[%s4151_s16] sm:$0xff] }
 0x49c   : > { %v981_v48 = vsel %vm973_vm10, %v4223_v32, 0.0  ;;  %v1095_v49 = vsel %vm973_vm10, %v4220_v28, 0.0  ;;  %v1208_v54 = vsel %vm973_vm10, %v4227_v37, 0.0  ;;  %v1324_v18 = vsel %vm389_vm0, %v4919_v15, inf }
 0x49d   : > { %v999_v50 = vsel %vm389_vm0, %v981_v48, 0.0  ;;  %v1113_v51 = vsel %vm389_vm0, %v1095_v49, 0.0  ;;  %v1226_v19 = vsel %vm389_vm0, %v1208_v54, 0.0  ;;  %v1342_v48 = vsel %vm389_vm0, %v4925_v59, inf }
 0x49e   : > { %1000 = vadd.xlane.f32.xlu1 %v999_v50  ;;  %v4825_v57 = vpop.xlane.xlu1 %966  ;;  %1114 = vadd.xlane.f32.xlu0 %v1113_v51  ;;  %v4935_v34 = vsel %vm971_vm9, inf, %v4551_v41  ;;  %v4943_v27 = vsel %vm973_vm10, inf, %v4567_v62 }
 0x49f   : > { %vm975_vm3 = vcmp.eq.f32.partialorder %v4289_v24, %v4825_v57  ;;  %v1333_v1 = vsel %vm389_vm0, %v4935_v34, inf  ;;  %v1339_v33 = vsel %vm389_vm0, %v4943_v27, inf }
 0x4a0   : > { %v983_v3 = vsel %vm975_vm3, %v4223_v32, 0.0  ;;  %v1097_v58 = vsel %vm975_vm3, %v4220_v28, 0.0  ;;  %v1210_v35 = vsel %vm975_vm3, %v4227_v37, 0.0  ;;  %v4951_v41 = vsel %vm975_vm3, inf, %v4583_v53 }
 0x4a1   : > { %v1005_v22 = vsel %vm389_vm0, %v983_v3, 0.0  ;;  %v1119_v16 = vsel %vm389_vm0, %v1097_v58, 0.0  ;;  %v1232_v39 = vsel %vm389_vm0, %v1210_v35, 0.0  ;;  %v1345_v44 = vsel %vm389_vm0, %v4951_v41, inf }
 0x4a2   : > { %1006 = vadd.xlane.f32.xlu1 %v1005_v22  ;;  %1120 = vadd.xlane.f32.xlu0 %v1119_v16  ;;  %v4961_v22 = vld [vmem:[%s4151_s16 + $0x8] sm:$0xff] }
 0x4a6   : > { %1102 = vadd.xlane.f32.xlu1 %v1101_v40  ;;  %1215 = vadd.xlane.f32.xlu0 %v1214_v5  ;;  %v4965_v40 = vld [vmem:[%s4151_s16 + $0x10] sm:$0xff] }
 0x4aa   : > { %1111 = vadd.xlane.f32.xlu1 %v1110_v7  ;;  %1221 = vadd.xlane.f32.xlu0 %v1220_v25  ;;  %v4969_v7 = vld [vmem:[%s4151_s16 + $0x18] sm:$0xff] }
 0x4ae   : > { %1117 = vadd.xlane.f32.xlu1 %v1116_v29  ;;  %1227 = vadd.xlane.f32.xlu0 %v1226_v19  ;;  %v4973_v29 = vld [vmem:[%s4151_s16 + $0x20] sm:$0xff] }
 0x4b2   : > { %1212 = vadd.xlane.f32.xlu1 %v1211_v38  ;;  %1233 = vadd.xlane.f32.xlu0 %v1232_v39  ;;  %v4977_v38 = vld [vmem:[%s4151_s16 + $0x28] sm:$0xff] }
 0x4b6   : > { %1218 = vadd.xlane.f32.xlu1 %v1217_v60  ;;  %1328 = vmin.xlane.f32.xlu0 %v1327_v11  ;;  %v4982_v11 = vld [vmem:[%s4151_s16 + $0x30] sm:$0xff] }
 0x4ba   : > { %1224 = vadd.xlane.f32.xlu1 %v1223_v36  ;;  %1331 = vmin.xlane.f32.xlu0 %v1330_v13 }
 0x4be   : > { %1230 = vadd.xlane.f32.xlu1 %v1229_v55  ;;  %1337 = vmin.xlane.f32.xlu0 %v1336_v63  ;;  %v4988_v55 = vld [vmem:[%s4151_s16 + $0x38] sm:$0xff] }
 0x4c2   : > { %1325 = vmin.xlane.f32.xlu1 %v1324_v18  ;;  %1343 = vmin.xlane.f32.xlu0 %v1342_v48 }
 0x4c6   : > { %1334 = vmin.xlane.f32.xlu1 %v1333_v1 }
 0x4ca   : > { %1340 = vmin.xlane.f32.xlu1 %v1339_v33 }
 0x4ce   : > { %1346 = vmin.xlane.f32.xlu1 %v1345_v44 }
 0x4ec   : > { %v986_v49 = vpop.xlane.xlu0 %985 }
 0x4ed   : > { %v1008_v62 = vsub.f32 %v986_v49, %v4956_v4 }
 0x4ef   : > { %1025 = vperm.xlu0 %4005, %v1008_v62  }
 0x4f0   : > { %v992_v50 = vpop.xlane.xlu0 %991 }
 0x4f1   : > { %v1010_v5 = vsub.f32 %v992_v50, %v4965_v40 }
 0x4f3   : > { %4008 = vset.pattern.permute.xlu0 %v4108_v9 }
 0x4f4   : > { %v998_v51 = vpop.xlane.xlu0 %997 }
 0x4f5   : > { %v1012_v19 = vsub.f32 %v998_v51, %v4973_v29 }
 0x4f8   : > { %v1004_v3 = vpop.xlane.xlu0 %1003 }
 0x4f9   : > { %v1014_v43 = vsub.f32 %v1004_v3, %v4982_v11 }
 0x4fc   : > { %v1100_v57 = vpop.xlane.xlu0 %1099 }
 0x4fd   : > { %v1122_v1 = vsub.f32 %v1100_v57, %v4956_v4 }
 0x500   : > { %v1106_v53 = vpop.xlane.xlu0 %1105 }
 0x501   : > { %v1124_v49 = vsub.f32 %v1106_v53, %v4965_v40 }
 0x523   : > { %v989_v58 = vpop.xlane.xlu1 %988 }
 0x524   : > { %v1009_v16 = vsub.f32 %v989_v58, %v4961_v22 }
 0x526   : > { %1028 = vperm.xlu1 %4006, %v1009_v16  }
 0x527   : > { %v995_v20 = vpop.xlane.xlu1 %994  ;;  %v1109_v6 = vpop.xlane.xlu0 %1108 }
 0x528   : > { %v1011_v25 = vsub.f32 %v995_v20, %v4969_v7  ;;  %v1125_v50 = vsub.f32 %v1109_v6, %v4969_v7 }
 0x52a   : > { %1031 = vperm.xlu1 %4006, %v1010_v5  }
 0x52b   : > { %v1001_v21 = vpop.xlane.xlu1 %1000  ;;  %v1115_v8 = vpop.xlane.xlu0 %1114 }
 0x52c   : > { %v1013_v39 = vsub.f32 %v1001_v21, %v4977_v38  ;;  %v1127_v57 = vsub.f32 %v1115_v8, %v4977_v38 }
 0x52e   : > { %1034 = vperm.xlu1 %4006, %v1011_v25  }
 0x52f   : > { %v1007_v26 = vpop.xlane.xlu1 %1006  ;;  %v1121_v54 = vpop.xlane.xlu0 %1120 }
 0x530   : > { %v1015_v63 = vsub.f32 %v1007_v26, %v4988_v55  ;;  %v1129_v6 = vsub.f32 %v1121_v54, %v4988_v55 }
 0x532   : > { %1037 = vperm.xlu1 %4006, %v1012_v19  }
 0x533   : > { %v1103_v31 = vpop.xlane.xlu1 %1102  ;;  %v1216_v35 = vpop.xlane.xlu0 %1215 }
 0x534   : > { %v1123_v52 = vsub.f32 %v1103_v31, %v4961_v22  ;;  %v1236_v13 = vsub.f32 %v1216_v35, %v4961_v22 }
 0x536   : > { %1142 = vperm.xlu0 %4008, %v1123_v52   ;;  %1040 = vperm.xlu1 %4006, %v1013_v39  }
 0x537   : > { %v1112_v60 = vpop.xlane.xlu1 %1111  ;;  %v1222_v36 = vpop.xlane.xlu0 %1221 }
 0x538   : > { %v1126_v58 = vsub.f32 %v1112_v60, %v4973_v29 }
 0x53a   : > { %4010 = vset.pattern.permute.xlu0 %v4109_v10  ;;  %1043 = vperm.xlu1 %4006, %v1014_v43   ;;  %v1238_v43 = vsub.f32 %v1222_v36, %v4969_v7 }
 0x53b   : > { %v1118_v30 = vpop.xlane.xlu1 %1117  ;;  %1255 = vperm.xlu0 %4010, %v1236_v13   ;;  %v1228_v18 = vpop.xlane.xlu0 %1227 }
 0x53c   : > { %v1128_v5 = vsub.f32 %v1118_v30, %v4982_v11  ;;  %v1240_v30 = vsub.f32 %v1228_v18, %v4977_v38 }
 0x53e   : > { %1046 = vperm.xlu1 %4006, %v1015_v63  }
 0x53f   : > { %v1213_v48 = vpop.xlane.xlu1 %1212  ;;  %4011 = vset.pattern.permute.xlu0 %v4107_v0  ;;  %v1234_v44 = vpop.xlane.xlu0 %1233 }
 0x540   : > { %v1235_v31 = vsub.f32 %v1213_v48, %v4956_v4  ;;  %v1242_v48 = vsub.f32 %v1234_v44, %v4988_v55 }
 0x542   : > { %4007 = vset.pattern.permute.xlu1 %v4108_v9 }
 0x543   : > { %v1219_v33 = vpop.xlane.xlu1 %1218  ;;  %1139 = vperm.xlu1 %4007, %v1122_v1   ;;  %v1329_v51 = vpop.xlane.xlu0 %1328 }
 0x544   : > { %v1237_v39 = vsub.f32 %v1219_v33, %v4965_v40  ;;  %vm1349_vm7 = vcmp.eq.f32.partialorder %v4884_v12, %v1329_v51 }
 0x545   : > { %v1357_v33 = vsel %vm1349_vm7, %v4289_v24, 64.0 }
 0x547   : > { %v1225_v62 = vpop.xlane.xlu1 %1224  ;;  %1145 = vperm.xlu1 %4007, %v1124_v49   ;;  %v1332_v16 = vpop.xlane.xlu0 %1331  ;;  %v1367_v49 = vsel %vm389_vm0, %v1357_v33, inf }
 0x548   : > { %vm1350_vm4 = vcmp.eq.f32.partialorder %v4897_v46, %v1332_v16  ;;  %v1239_v13 = vsub.f32 %v1225_v62, %v4973_v29 }
 0x549   : > { %v1358_v26 = vsel %vm1350_vm4, %v4289_v24, 64.0 }
 0x54a   : > { %v1370_v19 = vsel %vm389_vm0, %v1358_v26, inf }
 0x54b   : > { %v1231_v3 = vpop.xlane.xlu1 %1230  ;;  %1148 = vperm.xlu1 %4007, %v1125_v50   ;;  %v1338_v53 = vpop.xlane.xlu0 %1337 }
 0x54c   : > { %vm1352_vm5 = vcmp.eq.f32.partialorder %v4910_v47, %v1338_v53  ;;  %v1241_v63 = vsub.f32 %v1231_v3, %v4982_v11 }
 0x54d   : > { %v1360_v35 = vsel %vm1352_vm5, %v4289_v24, 64.0 }
 0x54e   : > { %v1376_v54 = vsel %vm389_vm0, %v1360_v35, inf }
 0x54f   : > { %1151 = vperm.xlu1 %4007, %v1126_v58   ;;  %v1326_v20 = vpop.xlane.xlu1 %1325  ;;  %v1344_v8 = vpop.xlane.xlu0 %1343 }
 0x550   : > { %vm1348_vm3 = vcmp.eq.f32.partialorder %v4919_v15, %v1326_v20  ;;  %vm1354_vm6 = vcmp.eq.f32.partialorder %v4925_v59, %v1344_v8 }
 0x551   : > { %v1356_v21 = vsel %vm1348_vm3, %v4289_v24, 64.0  ;;  %v1362_v52 = vsel %vm1354_vm6, %v4289_v24, 64.0  ;;  %vm6877_vm3 = vcmask 516096  }
 0x552   : > { %v1364_v25 = vsel %vm389_vm0, %v1356_v21, inf  ;;  %v1382_v60 = vsel %vm389_vm0, %v1362_v52, inf  ;;  %vm6878_vm4 = vmmov %vm6877_vm3 }
 0x553   : > { %1154 = vperm.xlu1 %4007, %v1127_v57   ;;  %v1335_v1 = vpop.xlane.xlu1 %1334 }
 0x554   : > { %vm1351_vm8 = vcmp.eq.f32.partialorder %v4935_v34, %v1335_v1 }
 0x555   : > { %v1359_v18 = vsel %vm1351_vm8, %v4289_v24, 64.0 }
 0x556   : > { %v1373_v44 = vsel %vm389_vm0, %v1359_v18, inf }
 0x557   : > { %1157 = vperm.xlu1 %4007, %v1128_v5   ;;  %v1341_v36 = vpop.xlane.xlu1 %1340 }
 0x558   : > { %vm1353_vm9 = vcmp.eq.f32.partialorder %v4943_v27, %v1341_v36 }
 0x559   : > { %v1361_v50 = vsel %vm1353_vm9, %v4289_v24, 64.0  ;;  %vm6879_vm9 = vmmov %vm6877_vm3 }
 0x55a   : > { %1365 = vmin.xlane.f32.xlu0 %v1364_v25  ;;  %v1379_v51 = vsel %vm389_vm0, %v1361_v50, inf }
 0x55b   : > { %1160 = vperm.xlu1 %4007, %v1129_v6   ;;  %v1347_v62 = vpop.xlane.xlu1 %1346 }
 0x55c   : > { %vm1355_vm10 = vcmp.eq.f32.partialorder %v4951_v41, %v1347_v62 }
 0x55d   : > { %v1363_v3 = vsel %vm1355_vm10, %v4289_v24, 64.0 }
 0x55e   : > { %1371 = vmin.xlane.f32.xlu0 %v1370_v19  ;;  %v1385_v16 = vsel %vm389_vm0, %v1363_v3, inf }
 0x55f   : > { %4009 = vset.pattern.permute.xlu1 %v4109_v10 }
 0x560   : > { %1252 = vperm.xlu1 %4009, %v1235_v31  }
 0x562   : > { %1377 = vmin.xlane.f32.xlu0 %v1376_v54 }
 0x564   : > { %1258 = vperm.xlu1 %4009, %v1237_v39  }
 0x566   : > { %1383 = vmin.xlane.f32.xlu0 %v1382_v60 }
 0x568   : > { %1261 = vperm.xlu1 %4009, %v1238_v43  }
 0x56c   : > { %1264 = vperm.xlu1 %4009, %v1239_v13  }
 0x56e   : > { %v1026_v53 = vpop.permute.xlu0 %1025 }
 0x56f   : > { %v1051_v26 = vrot.slane %v1026_v53, %v4663_v42 }
 0x570   : > { %1267 = vperm.xlu1 %4009, %v1240_v30  }
 0x574   : > { %1270 = vperm.xlu1 %4009, %v1241_v63  }
 0x578   : > { %1273 = vperm.xlu1 %4009, %v1242_v48  }
 0x57c   : > { %4012 = vset.pattern.permute.xlu1 %v4107_v0 }
 0x59c   : > { %1368 = vmin.xlane.f32.xlu1 %v1367_v49 }
 0x5a0   : > { %1374 = vmin.xlane.f32.xlu1 %v1373_v44 }
 0x5a4   : > { %1380 = vmin.xlane.f32.xlu1 %v1379_v51 }
 0x5a5   : > { %v1029_v58 = vpop.permute.xlu1 %1028 }
 0x5a6   : > { %v1055_v6 = vrot.slane %v1029_v58, %v4666_v56 }
 0x5a8   : > { %1386 = vmin.xlane.f32.xlu1 %v1385_v16  ;;  %v1056_v35 = vsel %vm623_vm11, %v1055_v6, %v1051_v26 }
 0x5a9   : > { %v1032_v20 = vpop.permute.xlu1 %1031 }
 0x5aa   : > { %v1060_v25 = vrot.slane %v1032_v20, %v4670_v2 }
 0x5ac   : > { %v1061_v39 = vsel %vm630_vm12, %v1060_v25, %v1056_v35 }
 0x5ad   : > { %v1035_v57 = vpop.permute.xlu1 %1034 }
 0x5ae   : > { %v1065_v8 = vrot.slane %v1035_v57, %v4674_v14 }
 0x5b0   : > { %v1066_v60 = vsel %vm637_vm13, %v1065_v8, %v1061_v39 }
 0x5b1   : > { %v1038_v5 = vpop.permute.xlu1 %1037 }
 0x5b2   : > { %v1070_v19 = vrot.slane %v1038_v5, %v4677_v61 }
 0x5b4   : > { %v1071_v43 = vsel %vm644_vm14, %v1070_v19, %v1066_v60 }
 0x5b5   : > { %v1041_v21 = vpop.permute.xlu1 %1040  ;;  %v1143_v62 = vpop.permute.xlu0 %1142 }
 0x5b6   : > { %v1075_v54 = vrot.slane %v1041_v21, %v4682_v45  ;;  %v1169_v3 = vrot.slane %v1143_v62, %v4666_v56 }
 0x5b8   : > { %v1076_v30 = vsel %vm651_vm15, %v1075_v54, %v1071_v43 }
 0x5b9   : > { %v1044_v31 = vpop.permute.xlu1 %1043 }
 0x5ba   : > { %v1080_v52 = vrot.slane %v1044_v31, %v4687_v17  ;;  %v1256_v39 = vpop.permute.xlu0 %1255 }
 0x5bc   : > { %v1081_v48 = vsel %vm658_vm1, %v1080_v52, %v1076_v30 }
 0x5bd   : > { %v1047_v13 = vpop.permute.xlu1 %1046 }
 0x5be   : > { %v1085_v63 = vrot.slane %v1047_v13, %v4694_v23 }
 0x5c0   : > { %v1086_v1 = vsel %vm665_vm2, %v1085_v63, %v1081_v48 }
 0x5c1   : > { %3941 = vst.msk [vmem:[%s4705_s24 + $0x4] sm:$0x1] %vm6877_vm3, %v1086_v1 }
 0x5c2   : > { %v1140_v36 = vpop.permute.xlu1 %1139 }
 0x5c3   : > { %v1165_v50 = vrot.slane %v1140_v36, %v4663_v42 }
 0x5c5   : > { %v1170_v57 = vsel %vm623_vm11, %v1169_v3, %v1165_v50  ;;  %v1282_v50 = vrot.slane %v1256_v39, %v4666_v56 }
 0x5c6   : > { %v1146_v33 = vpop.permute.xlu1 %1145 }
 0x5c7   : > { %v1174_v51 = vrot.slane %v1146_v33, %v4670_v2 }
 0x5c9   : > { %v1175_v53 = vsel %vm630_vm12, %v1174_v51, %v1170_v57 }
 0x5ca   : > { %v1149_v49 = vpop.permute.xlu1 %1148 }
 0x5cb   : > { %v1179_v58 = vrot.slane %v1149_v49, %v4674_v14 }
 0x5cd   : > { %v1180_v6 = vsel %vm637_vm13, %v1179_v58, %v1175_v53 }
 0x5ce   : > { %v1152_v18 = vpop.permute.xlu1 %1151 }
 0x5cf   : > { %v1184_v16 = vrot.slane %v1152_v18, %v4677_v61 }
 0x5d1   : > { %v1185_v25 = vsel %vm644_vm14, %v1184_v16, %v1180_v6 }
 0x5d2   : > { %v1155_v44 = vpop.permute.xlu1 %1154 }
 0x5d3   : > { %v1189_v5 = vrot.slane %v1155_v44, %v4682_v45 }
 0x5d5   : > { %v1190_v8 = vsel %vm651_vm15, %v1189_v5, %v1185_v25 }
 0x5d6   : > { %v1158_v20 = vpop.permute.xlu1 %1157 }
 0x5d7   : > { %v1194_v21 = vrot.slane %v1158_v20, %v4687_v17 }
 0x5d9   : > { %v1195_v31 = vsel %vm658_vm1, %v1194_v21, %v1190_v8 }
 0x5da   : > { %v1161_v26 = vpop.permute.xlu1 %1160 }
 0x5db   : > { %v1199_v19 = vrot.slane %v1161_v26, %v4694_v23 }
 0x5dd   : > { %v1200_v35 = vsel %vm665_vm2, %v1199_v19, %v1195_v31 }
 0x5de   : > { %3942 = vst.msk [vmem:[%s4705_s24 + $0x5] sm:$0x1] %vm6878_vm4, %v1200_v35 }
 0x5df   : > { %v1253_v54 = vpop.permute.xlu1 %1252 }
 0x5e0   : > { %v1278_v18 = vrot.slane %v1253_v54, %v4663_v42 }
 0x5e2   : > { %v1283_v57 = vsel %vm623_vm11, %v1282_v50, %v1278_v18 }
 0x5e3   : > { %v1259_v52 = vpop.permute.xlu1 %1258 }
 0x5e4   : > { %v1287_v62 = vrot.slane %v1259_v52, %v4670_v2 }
 0x5e6   : > { %v1288_v53 = vsel %vm630_vm12, %v1287_v62, %v1283_v57 }
 0x5e7   : > { %v1262_v60 = vpop.permute.xlu1 %1261  ;;  %v5067_v43 = vpop.xlane.xlu0 %1365 }
 0x5e8   : > { %vm1388_vm5 = vcmp.eq.f32.partialorder %v4289_v24, %v5067_v43  ;;  %v1292_v51 = vrot.slane %v1262_v60, %v4674_v14 }
 0x5e9   : > { %v1396_v13 = vsel %vm1388_vm5, %v4223_v32, 0.0 }
 0x5ea   : > { %v1404_v30 = vsel %vm389_vm0, %v1396_v13, 0.0  ;;  %v1293_v25 = vsel %vm637_vm13, %v1292_v51, %v1288_v53 }
 0x5eb   : > { %v1265_v63 = vpop.permute.xlu1 %1264  ;;  %1405 = vadd.xlane.f32.xlu0 %v1404_v30  ;;  %v5076_v48 = vpop.xlane.xlu0 %1371 }
 0x5ec   : > { %vm1390_vm6 = vcmp.eq.f32.partialorder %v4289_v24, %v5076_v48  ;;  %v1297_v58 = vrot.slane %v1265_v63, %v4677_v61 }
 0x5ed   : > { %v1398_v1 = vsel %vm1390_vm6, %v4223_v32, 0.0  ;;  %v5259_v43 = vsel %vm1390_vm6, inf, %v4897_v46 }
 0x5ee   : > { %v1410_v36 = vsel %vm389_vm0, %v1398_v1, 0.0  ;;  %v1298_v8 = vsel %vm644_vm14, %v1297_v58, %v1293_v25  ;;  %v1623_v25 = vsel %vm1388_vm5, %v4227_v37, 0.0 }
 0x5ef   : > { %v1268_v33 = vpop.permute.xlu1 %1267  ;;  %1411 = vadd.xlane.f32.xlu0 %v1410_v36  ;;  %v5085_v49 = vpop.xlane.xlu0 %1377  ;;  %v1512_v36 = vsel %vm1390_vm6, %v4220_v28, 0.0 }
 0x5f0   : > { %vm1392_vm7 = vcmp.eq.f32.partialorder %v4289_v24, %v5085_v49  ;;  %v1302_v5 = vrot.slane %v1268_v33, %v4682_v45  ;;  %v1524_v62 = vsel %vm389_vm0, %v1512_v36, 0.0 }
 0x5f1   : > { %v1400_v44 = vsel %vm1392_vm7, %v4223_v32, 0.0  ;;  %v1514_v50 = vsel %vm1392_vm7, %v4220_v28, 0.0  ;;  %v5274_v48 = vsel %vm1392_vm7, inf, %v4910_v47 }
 0x5f2   : > { %v1416_v3 = vsel %vm389_vm0, %v1400_v44, 0.0  ;;  %v1303_v31 = vsel %vm651_vm15, %v1302_v5, %v1298_v8  ;;  %v1530_v58 = vsel %vm389_vm0, %v1514_v50, 0.0  ;;  %v1631_v8 = vsel %vm389_vm0, %v1623_v25, 0.0 }
 0x5f3   : > { %v1271_v16 = vpop.permute.xlu1 %1270  ;;  %1417 = vadd.xlane.f32.xlu0 %v1416_v3  ;;  %v5099_v20 = vpop.xlane.xlu0 %1383  ;;  %v5244_v25 = vsel %vm1388_vm5, inf, %v4919_v15  ;;  %v1756_v46 = vsel %vm389_vm0, %v5274_v48, inf }
 0x5f4   : > { %vm1394_vm8 = vcmp.eq.f32.partialorder %v4289_v24, %v5099_v20  ;;  %v1307_v21 = vrot.slane %v1271_v16, %v4687_v17 }
 0x5f5   : > { %v1402_v6 = vsel %vm1394_vm8, %v4223_v32, 0.0  ;;  %v1516_v57 = vsel %vm1394_vm8, %v4220_v28, 0.0 }
 0x5f6   : > { %v1422_v26 = vsel %vm389_vm0, %v1402_v6, 0.0  ;;  %v1308_v54 = vsel %vm658_vm1, %v1307_v21, %v1303_v31  ;;  %v1536_v21 = vsel %vm389_vm0, %v1516_v57, 0.0  ;;  %v1510_v6 = vsel %vm1388_vm5, %v4220_v28, 0.0 }
 0x5f7   : > { %v1274_v19 = vpop.permute.xlu1 %1273  ;;  %1423 = vadd.xlane.f32.xlu0 %v1422_v26  ;;  %v1518_v26 = vsel %vm389_vm0, %v1510_v6, 0.0  ;;  %v1625_v31 = vsel %vm1390_vm6, %v4227_v37, 0.0 }
 0x5f8   : > { %v1312_v35 = vrot.slane %v1274_v19, %v4694_v23 }
 0x5fa   : > { %v1313_v39 = vsel %vm665_vm2, %v1312_v35, %v1308_v54  ;;  %v1637_v54 = vsel %vm389_vm0, %v1625_v31, 0.0 }
 0x5fb   : > { %3943 = vst.msk [vmem:[%s4705_s24 + $0x6] sm:$0x1] %vm6879_vm9, %v1313_v39 }
 0x629   : > { %v5120_v52 = vpop.xlane.xlu1 %1368 }
 0x62a   : > { %vm1389_vm10 = vcmp.eq.f32.partialorder %v4289_v24, %v5120_v52 }
 0x62b   : > { %v1397_v60 = vsel %vm1389_vm10, %v4223_v32, 0.0  ;;  %v1511_v13 = vsel %vm1389_vm10, %v4220_v28, 0.0  ;;  %v5222_v57 = vsel %vm1389_vm10, inf, %v4884_v12 }
 0x62c   : > { %v1407_v30 = vsel %vm389_vm0, %v1397_v60, 0.0  ;;  %v1521_v63 = vsel %vm389_vm0, %v1511_v13, 0.0 }
 0x62d   : > { %1408 = vadd.xlane.f32.xlu1 %v1407_v30  ;;  %v5134_v1 = vpop.xlane.xlu1 %1374  ;;  %1522 = vadd.xlane.f32.xlu0 %v1521_v63 }
 0x62e   : > { %vm1391_vm3 = vcmp.eq.f32.partialorder %v4289_v24, %v5134_v1 }
 0x62f   : > { %v1399_v33 = vsel %vm1391_vm3, %v4223_v32, 0.0  ;;  %v1513_v19 = vsel %vm1391_vm3, %v4220_v28, 0.0  ;;  %v1626_v60 = vsel %vm1391_vm3, %v4227_v37, 0.0  ;;  %v5235_v6 = vsel %vm1391_vm3, inf, %v4935_v34 }
 0x630   : > { %v1413_v18 = vsel %vm389_vm0, %v1399_v33, 0.0  ;;  %v1527_v35 = vsel %vm389_vm0, %v1513_v19, 0.0  ;;  %v1640_v30 = vsel %vm389_vm0, %v1626_v60, 0.0  ;;  %v1753_v52 = vsel %vm389_vm0, %v5235_v6, inf }
 0x631   : > { %1414 = vadd.xlane.f32.xlu1 %v1413_v18  ;;  %v1381_v44 = vpop.xlane.xlu1 %1380  ;;  %1525 = vadd.xlane.f32.xlu0 %v1524_v62  ;;  %v1624_v62 = vsel %vm1389_vm10, %v4227_v37, 0.0  ;;  %v1744_v34 = vsel %vm389_vm0, %v5244_v25, inf }
 0x632   : > { %vm1393_vm4 = vcmp.eq.f32.partialorder %v4289_v24, %v1381_v44 }
 0x633   : > { %v1401_v51 = vsel %vm1393_vm4, %v4223_v32, 0.0  ;;  %v1515_v39 = vsel %vm1393_vm4, %v4220_v28, 0.0  ;;  %v1628_v36 = vsel %vm1393_vm4, %v4227_v37, 0.0 }
 0x634   : > { %v1419_v3 = vsel %vm389_vm0, %v1401_v51, 0.0  ;;  %v1533_v13 = vsel %vm389_vm0, %v1515_v39, 0.0  ;;  %v1646_v18 = vsel %vm389_vm0, %v1628_v36, 0.0  ;;  %v1634_v51 = vsel %vm389_vm0, %v1624_v62, 0.0 }
 0x635   : > { %1420 = vadd.xlane.f32.xlu1 %v1419_v3  ;;  %v1387_v16 = vpop.xlane.xlu1 %1386  ;;  %1531 = vadd.xlane.f32.xlu0 %v1530_v58  ;;  %v1627_v58 = vsel %vm1392_vm7, %v4227_v37, 0.0 }
 0x636   : > { %vm1395_vm9 = vcmp.eq.f32.partialorder %v4289_v24, %v1387_v16 }
 0x637   : > { %v1403_v5 = vsel %vm1395_vm9, %v4223_v32, 0.0  ;;  %v1517_v63 = vsel %vm1395_vm9, %v4220_v28, 0.0  ;;  %v1630_v50 = vsel %vm1395_vm9, %v4227_v37, 0.0  ;;  %v5264_v15 = vsel %vm1395_vm9, inf, %v4951_v41 }
 0x638   : > { %v1425_v53 = vsel %vm389_vm0, %v1403_v5, 0.0  ;;  %v1539_v33 = vsel %vm389_vm0, %v1517_v63, 0.0  ;;  %v1652_v3 = vsel %vm389_vm0, %v1630_v50, 0.0  ;;  %v1643_v5 = vsel %vm389_vm0, %v1627_v58, 0.0 }
 0x639   : > { %1426 = vadd.xlane.f32.xlu1 %v1425_v53  ;;  %1537 = vadd.xlane.f32.xlu0 %v1536_v21  ;;  %v1747_v53 = vsel %vm389_vm0, %v5222_v57, inf  ;;  %v1629_v21 = vsel %vm1394_vm8, %v4227_v37, 0.0  ;;  %v1765_v44 = vsel %vm389_vm0, %v5264_v15, inf  ;;  %v5282_v41 = vsel %vm1394_vm8, inf, %v4925_v59 }
 0x63a   : > { %v1649_v12 = vsel %vm389_vm0, %v1629_v21, 0.0  ;;  %v1762_v16 = vsel %vm389_vm0, %v5282_v41, inf }
 0x63d   : > { %1519 = vadd.xlane.f32.xlu1 %v1518_v26  ;;  %1632 = vadd.xlane.f32.xlu0 %v1631_v8  ;;  %v5249_v26 = vsel %vm1393_vm4, inf, %v4943_v27  ;;  %v1750_v27 = vsel %vm389_vm0, %v5259_v43, inf }
 0x63e   : > { %v1759_v1 = vsel %vm389_vm0, %v5249_v26, inf }
 0x641   : > { %1528 = vadd.xlane.f32.xlu1 %v1527_v35  ;;  %1638 = vadd.xlane.f32.xlu0 %v1637_v54 }
 0x645   : > { %1534 = vadd.xlane.f32.xlu1 %v1533_v13  ;;  %1641 = vadd.xlane.f32.xlu0 %v1640_v30 }
 0x649   : > { %1540 = vadd.xlane.f32.xlu1 %v1539_v33  ;;  %1647 = vadd.xlane.f32.xlu0 %v1646_v18 }
 0x64d   : > { %1635 = vadd.xlane.f32.xlu1 %v1634_v51  ;;  %1653 = vadd.xlane.f32.xlu0 %v1652_v3 }
 0x651   : > { %1644 = vadd.xlane.f32.xlu1 %v1643_v5  ;;  %1748 = vmin.xlane.f32.xlu0 %v1747_v53 }
 0x655   : > { %1650 = vadd.xlane.f32.xlu1 %v1649_v12  ;;  %1754 = vmin.xlane.f32.xlu0 %v1753_v52 }
 0x659   : > { %1745 = vmin.xlane.f32.xlu1 %v1744_v34  ;;  %1760 = vmin.xlane.f32.xlu0 %v1759_v1 }
 0x65d   : > { %1751 = vmin.xlane.f32.xlu1 %v1750_v27  ;;  %1766 = vmin.xlane.f32.xlu0 %v1765_v44 }
 0x661   : > { %1757 = vmin.xlane.f32.xlu1 %v1756_v46 }
 0x665   : > { %1763 = vmin.xlane.f32.xlu1 %v1762_v16 }
 0x678   : > { %v1406_v8 = vpop.xlane.xlu0 %1405 }
 0x679   : > { %v1428_v19 = vsub.f32 %v1406_v8, %v4956_v4 }
 0x67b   : > { %1445 = vperm.xlu0 %4011, %v1428_v19  }
 0x67c   : > { %v1412_v47 = vpop.xlane.xlu0 %1411 }
 0x67d   : > { %v1430_v60 = vsub.f32 %v1412_v47, %v4965_v40 }
 0x67f   : > { %4013 = vset.pattern.permute.xlu0 %v4108_v9 }
 0x680   : > { %v1418_v49 = vpop.xlane.xlu0 %1417 }
 0x681   : > { %v1432_v33 = vsub.f32 %v1418_v49, %v4973_v29 }
 0x684   : > { %v1424_v31 = vpop.xlane.xlu0 %1423 }
 0x685   : > { %v1434_v5 = vsub.f32 %v1424_v31, %v4982_v11 }
 0x6ba   : > { %v1409_v35 = vpop.xlane.xlu1 %1408  ;;  %v1523_v54 = vpop.xlane.xlu0 %1522 }
 0x6bb   : > { %v1429_v39 = vsub.f32 %v1409_v35, %v4961_v22  ;;  %v1543_v34 = vsub.f32 %v1523_v54, %v4961_v22 }
 0x6bd   : > { %1448 = vperm.xlu1 %4012, %v1429_v39  }
 0x6be   : > { %v1415_v59 = vpop.xlane.xlu1 %1414  ;;  %v1526_v20 = vpop.xlane.xlu0 %1525 }
 0x6bf   : > { %v1431_v63 = vsub.f32 %v1415_v59, %v4969_v7  ;;  %v1544_v46 = vsub.f32 %v1526_v20, %v4965_v40 }
 0x6c1   : > { %1451 = vperm.xlu1 %4012, %v1430_v60  }
 0x6c2   : > { %v1421_v13 = vpop.xlane.xlu1 %1420  ;;  %v1532_v30 = vpop.xlane.xlu0 %1531 }
 0x6c3   : > { %v1433_v50 = vsub.f32 %v1421_v13, %v4977_v38  ;;  %v1546_v19 = vsub.f32 %v1532_v30, %v4973_v29 }
 0x6c5   : > { %1454 = vperm.xlu1 %4012, %v1431_v63  }
 0x6c6   : > { %v1427_v36 = vpop.xlane.xlu1 %1426  ;;  %v1538_v18 = vpop.xlane.xlu0 %1537 }
 0x6c7   : > { %v1435_v21 = vsub.f32 %v1427_v36, %v4988_v55  ;;  %v1548_v31 = vsub.f32 %v1538_v18, %v4982_v11 }
 0x6c9   : > { %1457 = vperm.xlu1 %4012, %v1432_v33  }
 0x6ca   : > { %v1520_v62 = vpop.xlane.xlu1 %1519  ;;  %v1633_v3 = vpop.xlane.xlu0 %1632 }
 0x6cb   : > { %v1542_v51 = vsub.f32 %v1520_v62, %v4956_v4  ;;  %v1655_v39 = vsub.f32 %v1633_v3, %v4956_v4 }
 0x6cd   : > { %1559 = vperm.xlu0 %4013, %v1542_v51   ;;  %1460 = vperm.xlu1 %4012, %v1433_v50  }
 0x6ce   : > { %v1529_v58 = vpop.xlane.xlu1 %1528  ;;  %v1639_v12 = vpop.xlane.xlu0 %1638 }
 0x6cf   : > { %v1545_v16 = vsub.f32 %v1529_v58, %v4969_v7  ;;  %v1657_v60 = vsub.f32 %v1639_v12, %v4965_v40 }
 0x6d1   : > { %1463 = vperm.xlu1 %4012, %v1434_v5   ;;  %4016 = vset.pattern.permute.xlu0 %v4109_v10 }
 0x6d2   : > { %v1535_v53 = vpop.xlane.xlu1 %1534  ;;  %v1642_v1 = vpop.xlane.xlu0 %1641 }
 0x6d3   : > { %v1547_v49 = vsub.f32 %v1535_v53, %v4977_v38  ;;  %v1658_v4 = vsub.f32 %v1642_v1, %v4969_v7 }
 0x6d5   : > { %1466 = vperm.xlu1 %4012, %v1435_v21  }
 0x6d6   : > { %v1541_v52 = vpop.xlane.xlu1 %1540  ;;  %v1648_v8 = vpop.xlane.xlu0 %1647 }
 0x6d7   : > { %v1549_v35 = vsub.f32 %v1541_v52, %v4988_v55  ;;  %v1660_v50 = vsub.f32 %v1648_v8, %v4977_v38 }
 0x6d9   : > { %4014 = vset.pattern.permute.xlu1 %v4108_v9 }
 0x6da   : > { %v1636_v27 = vpop.xlane.xlu1 %1635  ;;  %1562 = vperm.xlu1 %4014, %v1543_v34   ;;  %v1654_v47 = vpop.xlane.xlu0 %1653 }
 0x6db   : > { %v1656_v44 = vsub.f32 %v1636_v27, %v4961_v22 }
 0x6dd   : > { %1675 = vperm.xlu0 %4016, %v1656_v44  }
 0x6de   : > { %1565 = vperm.xlu1 %4014, %v1544_v46   ;;  %v1749_v22 = vpop.xlane.xlu0 %1748  ;;  %v1645_v63 = vpop.xlane.xlu1 %1644 }
 0x6df   : > { %vm1769_vm5 = vcmp.eq.f32.partialorder %v5222_v57, %v1749_v22  ;;  %v1659_v18 = vsub.f32 %v1645_v63, %v4973_v29  ;;  %v1662_v29 = vsub.f32 %v1654_v47, %v4988_v55 }
 0x6e0   : > { %v1777_v20 = vsel %vm1769_vm5, %v4289_v24, 64.0  ;;  %vm6880_vm5 = vcmask 516096  }
 0x6e1   : > { %4018 = vset.pattern.permute.xlu0 %v4107_v0  ;;  %v1787_v13 = vsel %vm389_vm0, %v1777_v20, inf }
 0x6e2   : > { %1568 = vperm.xlu1 %4014, %v1545_v16   ;;  %v1755_v54 = vpop.xlane.xlu0 %1754  ;;  %v1651_v51 = vpop.xlane.xlu1 %1650 }
 0x6e3   : > { %vm1771_vm6 = vcmp.eq.f32.partialorder %v5235_v6, %v1755_v54  ;;  %v1661_v58 = vsub.f32 %v1651_v51, %v4982_v11 }
 0x6e4   : > { %v1779_v30 = vsel %vm1771_vm6, %v4289_v24, 64.0  ;;  %vm6881_vm6 = vmmov %vm6880_vm5 }
 0x6e5   : > { %v1793_v33 = vsel %vm389_vm0, %v1779_v30, inf }
 0x6e6   : > { %1571 = vperm.xlu1 %4014, %v1546_v19   ;;  %v1761_v59 = vpop.xlane.xlu0 %1760  ;;  %v1746_v5 = vpop.xlane.xlu1 %1745 }
 0x6e7   : > { %vm1773_vm7 = vcmp.eq.f32.partialorder %v5249_v26, %v1761_v59  ;;  %vm1768_vm10 = vcmp.eq.f32.partialorder %v5244_v25, %v1746_v5 }
 0x6e8   : > { %v1781_v40 = vsel %vm1773_vm7, %v4289_v24, 64.0  ;;  %v1776_v38 = vsel %vm1768_vm10, %v4289_v24, 64.0  ;;  %vm6882_vm10 = vmmov %vm6880_vm5 }
 0x6e9   : > { %v1799_v62 = vsel %vm389_vm0, %v1781_v40, inf  ;;  %v1784_v12 = vsel %vm389_vm0, %v1776_v38, inf }
 0x6ea   : > { %1574 = vperm.xlu1 %4014, %v1547_v49   ;;  %v1767_v36 = vpop.xlane.xlu0 %1766  ;;  %v1752_v53 = vpop.xlane.xlu1 %1751 }
 0x6eb   : > { %vm1775_vm8 = vcmp.eq.f32.partialorder %v5264_v15, %v1767_v36  ;;  %vm1770_vm3 = vcmp.eq.f32.partialorder %v5259_v43, %v1752_v53 }
 0x6ec   : > { %v1783_v7 = vsel %vm1775_vm8, %v4289_v24, 64.0  ;;  %v1778_v11 = vsel %vm1770_vm3, %v4289_v24, 64.0 }
 0x6ed   : > { %v1805_v3 = vsel %vm389_vm0, %v1783_v7, inf  ;;  %v1790_v52 = vsel %vm389_vm0, %v1778_v11, inf }
 0x6ee   : > { %1577 = vperm.xlu1 %4014, %v1548_v31   ;;  %v1758_v21 = vpop.xlane.xlu1 %1757 }
 0x6ef   : > { %vm1772_vm4 = vcmp.eq.f32.partialorder %v5274_v48, %v1758_v21 }
 0x6f0   : > { %v1780_v34 = vsel %vm1772_vm4, %v4289_v24, 64.0 }
 0x6f1   : > { %v1796_v1 = vsel %vm389_vm0, %v1780_v34, inf }
 0x6f2   : > { %1580 = vperm.xlu1 %4014, %v1549_v35   ;;  %v1764_v55 = vpop.xlane.xlu1 %1763 }
 0x6f3   : > { %vm1774_vm9 = vcmp.eq.f32.partialorder %v5282_v41, %v1764_v55 }
 0x6f4   : > { %v1782_v27 = vsel %vm1774_vm9, %v4289_v24, 64.0 }
 0x6f5   : > { %v1802_v46 = vsel %vm389_vm0, %v1782_v27, inf }
 0x6f6   : > { %4015 = vset.pattern.permute.xlu1 %v4109_v10 }
 0x6f7   : > { %1672 = vperm.xlu1 %4015, %v1655_v39  }
 0x6fa   : > { %v1446_v47 = vpop.permute.xlu0 %1445 }
 0x6fb   : > { %1678 = vperm.xlu1 %4015, %v1657_v60   ;;  %v1471_v35 = vrot.slane %v1446_v47, %v4663_v42 }
 0x6fc   : > { %1788 = vmin.xlane.f32.xlu0 %v1787_v13 }
 0x6ff   : > { %1681 = vperm.xlu1 %4015, %v1658_v4  }
 0x700   : > { %1794 = vmin.xlane.f32.xlu0 %v1793_v33 }
 0x703   : > { %1684 = vperm.xlu1 %4015, %v1659_v18  }
 0x704   : > { %1800 = vmin.xlane.f32.xlu0 %v1799_v62 }
 0x707   : > { %1687 = vperm.xlu1 %4015, %v1660_v50  }
 0x708   : > { %1806 = vmin.xlane.f32.xlu0 %v1805_v3 }
 0x70b   : > { %1690 = vperm.xlu1 %4015, %v1661_v58  }
 0x70f   : > { %1693 = vperm.xlu1 %4015, %v1662_v29  }
 0x713   : > { %4017 = vset.pattern.permute.xlu1 %v4107_v0 }
 0x733   : > { %1785 = vmin.xlane.f32.xlu1 %v1784_v12 }
 0x737   : > { %1791 = vmin.xlane.f32.xlu1 %v1790_v52 }
 0x73b   : > { %1797 = vmin.xlane.f32.xlu1 %v1796_v1 }
 0x73c   : > { %v1449_v44 = vpop.permute.xlu1 %1448 }
 0x73d   : > { %v1475_v31 = vrot.slane %v1449_v44, %v4666_v56 }
 0x73f   : > { %1803 = vmin.xlane.f32.xlu1 %v1802_v46  ;;  %v1476_v20 = vsel %vm623_vm11, %v1475_v31, %v1471_v35 }
 0x740   : > { %v1452_v16 = vpop.permute.xlu1 %1451 }
 0x741   : > { %v1480_v22 = vrot.slane %v1452_v16, %v4670_v2 }
 0x743   : > { %v1481_v13 = vsel %vm630_vm12, %v1480_v22, %v1476_v20 }
 0x744   : > { %v1455_v8 = vpop.permute.xlu1 %1454 }
 0x745   : > { %v1485_v54 = vrot.slane %v1455_v8, %v4674_v14 }
 0x747   : > { %v1486_v4 = vsel %vm637_vm13, %v1485_v54, %v1481_v13 }
 0x748   : > { %v1458_v19 = vpop.permute.xlu1 %1457 }
 0x749   : > { %v1490_v39 = vrot.slane %v1458_v19, %v4677_v61 }
 0x74b   : > { %v1491_v63 = vsel %vm644_vm14, %v1490_v39, %v1486_v4 }
 0x74c   : > { %v1461_v49 = vpop.permute.xlu1 %1460  ;;  %v1560_v58 = vpop.permute.xlu0 %1559 }
 0x74d   : > { %v1495_v60 = vrot.slane %v1461_v49, %v4682_v45  ;;  %v1585_v21 = vrot.slane %v1560_v58, %v4663_v42 }
 0x74f   : > { %v1496_v33 = vsel %vm651_vm15, %v1495_v60, %v1491_v63 }
 0x750   : > { %v1464_v59 = vpop.permute.xlu1 %1463 }
 0x751   : > { %v1500_v30 = vrot.slane %v1464_v59, %v4687_v17 }
 0x753   : > { %v1501_v18 = vsel %vm658_vm1, %v1500_v30, %v1496_v33 }
 0x754   : > { %v1467_v36 = vpop.permute.xlu1 %1466 }
 0x755   : > { %v1505_v40 = vrot.slane %v1467_v36, %v4694_v23 }
 0x757   : > { %v1506_v62 = vsel %vm665_vm2, %v1505_v40, %v1501_v18 }
 0x758   : > { %3944 = vst.msk [vmem:[%s4705_s24 + $0x8] sm:$0x1] %vm6880_vm5, %v1506_v62 }
 0x759   : > { %v1563_v7 = vpop.permute.xlu1 %1562 }
 0x75a   : > { %v1589_v5 = vrot.slane %v1563_v7, %v4666_v56 }
 0x75c   : > { %v1590_v55 = vsel %vm623_vm11, %v1589_v5, %v1585_v21  ;;  %v1676_v54 = vpop.permute.xlu0 %1675 }
 0x75d   : > { %v1566_v50 = vpop.permute.xlu1 %1565  ;;  %v1702_v60 = vrot.slane %v1676_v54, %v4666_v56 }
 0x75e   : > { %v1594_v53 = vrot.slane %v1566_v50, %v4670_v2 }
 0x760   : > { %v1595_v34 = vsel %vm630_vm12, %v1594_v53, %v1590_v55 }
 0x761   : > { %v1569_v51 = vpop.permute.xlu1 %1568 }
 0x762   : > { %v1599_v38 = vrot.slane %v1569_v51, %v4674_v14 }
 0x764   : > { %v1600_v27 = vsel %vm637_vm13, %v1599_v38, %v1595_v34 }
 0x765   : > { %v1572_v3 = vpop.permute.xlu1 %1571 }
 0x766   : > { %v1604_v12 = vrot.slane %v1572_v3, %v4677_v61 }
 0x768   : > { %v1605_v44 = vsel %vm644_vm14, %v1604_v12, %v1600_v27 }
 0x769   : > { %v1575_v29 = vpop.permute.xlu1 %1574 }
 0x76a   : > { %v1609_v52 = vrot.slane %v1575_v29, %v4682_v45 }
 0x76c   : > { %v1610_v16 = vsel %vm651_vm15, %v1609_v52, %v1605_v44 }
 0x76d   : > { %v1578_v11 = vpop.permute.xlu1 %1577 }
 0x76e   : > { %v1614_v1 = vrot.slane %v1578_v11, %v4687_v17 }
 0x770   : > { %v1615_v19 = vsel %vm658_vm1, %v1614_v1, %v1610_v16 }
 0x771   : > { %v1581_v46 = vpop.permute.xlu1 %1580 }
 0x772   : > { %v1619_v8 = vrot.slane %v1581_v46, %v4694_v23 }
 0x774   : > { %v1620_v47 = vsel %vm665_vm2, %v1619_v8, %v1615_v19 }
 0x775   : > { %3945 = vst.msk [vmem:[%s4705_s24 + $0x9] sm:$0x1] %vm6881_vm6, %v1620_v47 }
 0x776   : > { %v1673_v49 = vpop.permute.xlu1 %1672 }
 0x777   : > { %v1698_v59 = vrot.slane %v1673_v49, %v4663_v42 }
 0x779   : > { %v1703_v36 = vsel %vm623_vm11, %v1702_v60, %v1698_v59 }
 0x77a   : > { %v1679_v31 = vpop.permute.xlu1 %1678 }
 0x77b   : > { %v1707_v20 = vrot.slane %v1679_v31, %v4670_v2 }
 0x77d   : > { %v1708_v18 = vsel %vm630_vm12, %v1707_v20, %v1703_v36 }
 0x77e   : > { %v1682_v22 = vpop.permute.xlu1 %1681 }
 0x77f   : > { %v1712_v13 = vrot.slane %v1682_v22, %v4674_v14 }
 0x781   : > { %v1713_v50 = vsel %vm637_vm13, %v1712_v13, %v1708_v18 }
 0x782   : > { %v1685_v35 = vpop.permute.xlu1 %1684 }
 0x783   : > { %v1717_v4 = vrot.slane %v1685_v35, %v4677_v61 }
 0x785   : > { %v1718_v3 = vsel %vm644_vm14, %v1717_v4, %v1713_v50 }
 0x786   : > { %v1688_v39 = vpop.permute.xlu1 %1687 }
 0x787   : > { %v1722_v33 = vrot.slane %v1688_v39, %v4682_v45 }
 0x789   : > { %v5378_v30 = vpop.xlane.xlu0 %1788  ;;  %v1723_v29 = vsel %vm651_vm15, %v1722_v33, %v1718_v3 }
 0x78a   : > { %vm1809_vm7 = vcmp.eq.f32.partialorder %v4289_v24, %v5378_v30  ;;  %v1691_v63 = vpop.permute.xlu1 %1690 }
 0x78b   : > { %v1817_v40 = vsel %vm1809_vm7, %v4223_v32, 0.0  ;;  %v1727_v62 = vrot.slane %v1691_v63, %v4687_v17  ;;  %v1931_v44 = vsel %vm1809_vm7, %v4220_v28, 0.0  ;;  %v2044_v18 = vsel %vm1809_vm7, %v4227_v37, 0.0 }
 0x78c   : > { %v1827_v7 = vsel %vm389_vm0, %v1817_v40, 0.0  ;;  %v1941_v46 = vsel %vm389_vm0, %v1931_v44, 0.0 }
 0x78d   : > { %1828 = vadd.xlane.f32.xlu0 %v1827_v7  ;;  %v5393_v51 = vpop.xlane.xlu0 %1794  ;;  %v1728_v21 = vsel %vm658_vm1, %v1727_v62, %v1723_v29  ;;  %v2054_v7 = vsel %vm389_vm0, %v2044_v18, 0.0 }
 0x78e   : > { %vm1811_vm8 = vcmp.eq.f32.partialorder %v4289_v24, %v5393_v51  ;;  %v1694_v58 = vpop.permute.xlu1 %1693 }
 0x78f   : > { %v1732_v5 = vrot.slane %v1694_v58, %v4694_v23  ;;  %v1819_v53 = vsel %vm1811_vm8, %v4223_v32, 0.0  ;;  %v1933_v50 = vsel %vm1811_vm8, %v4220_v28, 0.0 }
 0x790   : > { %v1833_v38 = vsel %vm389_vm0, %v1819_v53, 0.0  ;;  %v1947_v58 = vsel %vm389_vm0, %v1933_v50, 0.0 }
 0x791   : > { %v1733_v12 = vsel %vm665_vm2, %v1732_v5, %v1728_v21  ;;  %1834 = vadd.xlane.f32.xlu0 %v1833_v38  ;;  %v5407_v11 = vpop.xlane.xlu0 %1800 }
 0x792   : > { %3946 = vst.msk [vmem:[%s4705_s24 + $0xa] sm:$0x1] %vm6882_vm10, %v1733_v12  ;;  %vm1813_vm3 = vcmp.eq.f32.partialorder %v4289_v24, %v5407_v11 }
 0x793   : > { %v1821_v55 = vsel %vm1813_vm3, %v4223_v32, 0.0  ;;  %v1935_v5 = vsel %vm1813_vm3, %v4220_v28, 0.0 }
 0x794   : > { %v1839_v52 = vsel %vm389_vm0, %v1821_v55, 0.0  ;;  %v1953_v21 = vsel %vm389_vm0, %v1935_v5, 0.0 }
 0x795   : > { %1840 = vadd.xlane.f32.xlu0 %v1839_v52  ;;  %v5418_v34 = vpop.xlane.xlu0 %1806 }
 0x796   : > { %vm1815_vm4 = vcmp.eq.f32.partialorder %v4289_v24, %v5418_v34 }
 0x797   : > { %v1823_v1 = vsel %vm1815_vm4, %v4223_v32, 0.0  ;;  %v1937_v12 = vsel %vm1815_vm4, %v4220_v28, 0.0 }
 0x798   : > { %v1845_v27 = vsel %vm389_vm0, %v1823_v1, 0.0  ;;  %v1959_v52 = vsel %vm389_vm0, %v1937_v12, 0.0 }
 0x799   : > { %1846 = vadd.xlane.f32.xlu0 %v1845_v27 }
 0x79d   : > { %1942 = vadd.xlane.f32.xlu0 %v1941_v46 }
 0x7c0   : > { %v1786_v16 = vpop.xlane.xlu1 %1785 }
 0x7c1   : > { %vm1808_vm9 = vcmp.eq.f32.partialorder %v4289_v24, %v1786_v16 }
 0x7c2   : > { %v1816_v8 = vsel %vm1808_vm9, %v4223_v32, 0.0  ;;  %v1930_v40 = vsel %vm1808_vm9, %v4220_v28, 0.0  ;;  %v2043_v27 = vsel %vm1808_vm9, %v4227_v37, 0.0  ;;  %v5518_v44 = vsel %vm1808_vm9, inf, %v5244_v25 }
 0x7c3   : > { %v1824_v19 = vsel %vm389_vm0, %v1816_v8, 0.0  ;;  %v1938_v62 = vsel %vm389_vm0, %v1930_v40, 0.0  ;;  %v2051_v46 = vsel %vm389_vm0, %v2043_v27, 0.0  ;;  %v2164_v8 = vsel %vm389_vm0, %v5518_v44, inf }
 0x7c4   : > { %1825 = vadd.xlane.f32.xlu1 %v1824_v19  ;;  %v1792_v47 = vpop.xlane.xlu1 %1791  ;;  %v2046_v19 = vsel %vm1811_vm8, %v4227_v37, 0.0 }
 0x7c5   : > { %vm1810_vm5 = vcmp.eq.f32.partialorder %v4289_v24, %v1792_v47  ;;  %v2060_v25 = vsel %vm389_vm0, %v2046_v19, 0.0  ;;  %v5620_v19 = vld [vmem:[%s4151_s16 + $0x30] sm:$0xff] }
 0x7c6   : > { %v1818_v49 = vsel %vm1810_vm5, %v4223_v32, 0.0  ;;  %v1932_v31 = vsel %vm1810_vm5, %v4220_v28, 0.0  ;;  %v2045_v3 = vsel %vm1810_vm5, %v4227_v37, 0.0 }
 0x7c7   : > { %v1830_v22 = vsel %vm389_vm0, %v1818_v49, 0.0  ;;  %v1944_v35 = vsel %vm389_vm0, %v1932_v31, 0.0  ;;  %v2057_v29 = vsel %vm389_vm0, %v2045_v3, 0.0  ;;  %v5530_v49 = vsel %vm1810_vm5, inf, %v5259_v43 }
 0x7c8   : > { %1831 = vadd.xlane.f32.xlu1 %v1830_v22  ;;  %v5446_v54 = vpop.xlane.xlu1 %1797  ;;  %1945 = vadd.xlane.f32.xlu0 %v1944_v35  ;;  %v2170_v16 = vsel %vm389_vm0, %v5530_v49, inf  ;;  %v2048_v31 = vsel %vm1813_vm3, %v4227_v37, 0.0  ;;  %v5543_v22 = vsel %vm1811_vm8, inf, %v5235_v6  ;;  %v2050_v35 = vsel %vm1815_vm4, %v4227_v37, 0.0 }
 0x7c9   : > { %vm1812_vm6 = vcmp.eq.f32.partialorder %v4289_v24, %v5446_v54  ;;  %v2066_v43 = vsel %vm389_vm0, %v2048_v31, 0.0  ;;  %v2173_v47 = vsel %vm389_vm0, %v5543_v22, inf  ;;  %v2072_v6 = vsel %vm389_vm0, %v2050_v35, 0.0  ;;  %v5594_v54 = vld [vmem:[%s4151_s16 + $0x8] sm:$0xff]  ;;  %v5625_v31 = vld [vmem:[%s4151_s16 + $0x38] sm:$0xff] }
 0x7ca   : > { %v1820_v39 = vsel %vm1812_vm6, %v4223_v32, 0.0  ;;  %v1934_v59 = vsel %vm1812_vm6, %v4220_v28, 0.0  ;;  %v2047_v53 = vsel %vm1812_vm6, %v4227_v37, 0.0 }
 0x7cb   : > { %v1836_v20 = vsel %vm389_vm0, %v1820_v39, 0.0  ;;  %v1950_v60 = vsel %vm389_vm0, %v1934_v59, 0.0  ;;  %v2063_v38 = vsel %vm389_vm0, %v2047_v53, 0.0  ;;  %v5556_v39 = vsel %vm1813_vm3, inf, %v5249_v26 }
 0x7cc   : > { %1837 = vadd.xlane.f32.xlu1 %v1836_v20  ;;  %v5460_v13 = vpop.xlane.xlu1 %1803  ;;  %1951 = vadd.xlane.f32.xlu0 %v1950_v60  ;;  %v2179_v51 = vsel %vm389_vm0, %v5556_v39, inf  ;;  %v5565_v59 = vsel %vm1809_vm7, inf, %v5222_v57  ;;  %v5571_v26 = vsel %vm1815_vm4, inf, %v5264_v15  ;;  %v5581_v57 = vsel %vm1812_vm6, inf, %v5274_v48 }
 0x7cd   : > { %vm1814_vm10 = vcmp.eq.f32.partialorder %v4289_v24, %v5460_v13  ;;  %v2167_v11 = vsel %vm389_vm0, %v5565_v59, inf  ;;  %v2185_v20 = vsel %vm389_vm0, %v5571_v26, inf  ;;  %v2176_v30 = vsel %vm389_vm0, %v5581_v57, inf }
 0x7ce   : > { %v1822_v4 = vsel %vm1814_vm10, %v4223_v32, 0.0  ;;  %v1936_v63 = vsel %vm1814_vm10, %v4220_v28, 0.0  ;;  %v2049_v55 = vsel %vm1814_vm10, %v4227_v37, 0.0  ;;  %v5589_v15 = vsel %vm1814_vm10, inf, %v5282_v41 }
 0x7cf   : > { %v1842_v36 = vsel %vm389_vm0, %v1822_v4, 0.0  ;;  %v1956_v33 = vsel %vm389_vm0, %v1936_v63, 0.0  ;;  %v2069_v1 = vsel %vm389_vm0, %v2049_v55, 0.0  ;;  %v2182_v34 = vsel %vm389_vm0, %v5589_v15, inf }
 0x7d0   : > { %1843 = vadd.xlane.f32.xlu1 %v1842_v36  ;;  %1957 = vadd.xlane.f32.xlu0 %v1956_v33  ;;  %v5599_v33 = vld [vmem:[%s4151_s16] sm:$0xff] }
 0x7d4   : > { %1939 = vadd.xlane.f32.xlu1 %v1938_v62  ;;  %2055 = vadd.xlane.f32.xlu0 %v2054_v7  ;;  %v5603_v7 = vld [vmem:[%s4151_s16 + $0x10] sm:$0xff] }
 0x7d8   : > { %1948 = vadd.xlane.f32.xlu1 %v1947_v58  ;;  %2058 = vadd.xlane.f32.xlu0 %v2057_v29  ;;  %v5607_v29 = vld [vmem:[%s4151_s16 + $0x18] sm:$0xff] }
 0x7dc   : > { %1954 = vadd.xlane.f32.xlu1 %v1953_v21  ;;  %2064 = vadd.xlane.f32.xlu0 %v2063_v38  ;;  %v5611_v21 = vld [vmem:[%s4151_s16 + $0x20] sm:$0xff] }
 0x7e0   : > { %1960 = vadd.xlane.f32.xlu1 %v1959_v52  ;;  %2070 = vadd.xlane.f32.xlu0 %v2069_v1  ;;  %v5615_v52 = vld [vmem:[%s4151_s16 + $0x28] sm:$0xff] }
 0x7e4   : > { %2052 = vadd.xlane.f32.xlu1 %v2051_v46  ;;  %2165 = vmin.xlane.f32.xlu0 %v2164_v8 }
 0x7e8   : > { %2061 = vadd.xlane.f32.xlu1 %v2060_v25  ;;  %2171 = vmin.xlane.f32.xlu0 %v2170_v16 }
 0x7ec   : > { %2067 = vadd.xlane.f32.xlu1 %v2066_v43  ;;  %2174 = vmin.xlane.f32.xlu0 %v2173_v47 }
 0x7f0   : > { %2073 = vadd.xlane.f32.xlu1 %v2072_v6  ;;  %2180 = vmin.xlane.f32.xlu0 %v2179_v51 }
 0x7f4   : > { %2168 = vmin.xlane.f32.xlu1 %v2167_v11  ;;  %2186 = vmin.xlane.f32.xlu0 %v2185_v20 }
 0x7f8   : > { %2177 = vmin.xlane.f32.xlu1 %v2176_v30 }
 0x7fc   : > { %2183 = vmin.xlane.f32.xlu1 %v2182_v34 }
 0x81a   : > { %v1829_v60 = vpop.xlane.xlu0 %1828 }
 0x81b   : > { %v1849_v48 = vsub.f32 %v1829_v60, %v5594_v54 }
 0x81d   : > { %1868 = vperm.xlu0 %4018, %v1849_v48  }
 0x81e   : > { %v1835_v4 = vpop.xlane.xlu0 %1834 }
 0x81f   : > { %v1851_v5 = vsub.f32 %v1835_v4, %v5607_v29 }
 0x821   : > { %4019 = vset.pattern.permute.xlu0 %v4108_v9 }
 0x822   : > { %v1841_v63 = vpop.xlane.xlu0 %1840 }
 0x823   : > { %v1853_v1 = vsub.f32 %v1841_v63, %v5615_v52 }
 0x826   : > { %v1847_v36 = vpop.xlane.xlu0 %1846 }
 0x827   : > { %v1855_v43 = vsub.f32 %v1847_v36, %v5625_v31 }
 0x82a   : > { %v1943_v13 = vpop.xlane.xlu0 %1942 }
 0x82b   : > { %v1963_v6 = vsub.f32 %v1943_v13, %v5594_v54 }
 0x851   : > { %v1826_v41 = vpop.xlane.xlu1 %1825 }
 0x852   : > { %v1848_v40 = vsub.f32 %v1826_v41, %v5599_v33 }
 0x854   : > { %1865 = vperm.xlu1 %4017, %v1848_v40  }
 0x855   : > { %v1832_v18 = vpop.xlane.xlu1 %1831  ;;  %v1946_v62 = vpop.xlane.xlu0 %1945 }
 0x856   : > { %v1850_v50 = vsub.f32 %v1832_v18, %v5603_v7  ;;  %v1964_v30 = vsub.f32 %v1946_v62, %v5603_v7 }
 0x858   : > { %1871 = vperm.xlu1 %4017, %v1850_v50  }
 0x859   : > { %v1838_v3 = vpop.xlane.xlu1 %1837  ;;  %v1952_v58 = vpop.xlane.xlu0 %1951 }
 0x85a   : > { %v1852_v38 = vsub.f32 %v1838_v3, %v5611_v21  ;;  %v1966_v4 = vsub.f32 %v1952_v58, %v5611_v21 }
 0x85c   : > { %1874 = vperm.xlu1 %4017, %v1851_v5  }
 0x85d   : > { %v1844_v53 = vpop.xlane.xlu1 %1843  ;;  %v1958_v12 = vpop.xlane.xlu0 %1957 }
 0x85e   : > { %v1854_v25 = vsub.f32 %v1844_v53, %v5620_v19  ;;  %v1968_v41 = vsub.f32 %v1958_v12, %v5620_v19 }
 0x860   : > { %1877 = vperm.xlu1 %4017, %v1852_v38  }
 0x861   : > { %v1940_v55 = vpop.xlane.xlu1 %1939  ;;  %v2056_v46 = vpop.xlane.xlu0 %2055 }
 0x862   : > { %v1962_v27 = vsub.f32 %v1940_v55, %v5599_v33  ;;  %v2076_v5 = vsub.f32 %v2056_v46, %v5594_v54 }
 0x864   : > { %1979 = vperm.xlu0 %4019, %v1962_v27   ;;  %1880 = vperm.xlu1 %4017, %v1853_v1  }
 0x865   : > { %v1949_v8 = vpop.xlane.xlu1 %1948  ;;  %v2059_v47 = vpop.xlane.xlu0 %2058 }
 0x866   : > { %v1965_v34 = vsub.f32 %v1949_v8, %v5607_v29  ;;  %v2077_v38 = vsub.f32 %v2059_v47, %v5603_v7 }
 0x868   : > { %1883 = vperm.xlu1 %4017, %v1854_v25   ;;  %4021 = vset.pattern.permute.xlu0 %v4109_v10 }
 0x869   : > { %v1955_v16 = vpop.xlane.xlu1 %1954  ;;  %v2065_v51 = vpop.xlane.xlu0 %2064 }
 0x86a   : > { %v1967_v13 = vsub.f32 %v1955_v16, %v5615_v52  ;;  %v2079_v25 = vsub.f32 %v2065_v51, %v5611_v21 }
 0x86c   : > { %1886 = vperm.xlu1 %4017, %v1855_v43  }
 0x86d   : > { %v1961_v35 = vpop.xlane.xlu1 %1960  ;;  %v2071_v60 = vpop.xlane.xlu0 %2070 }
 0x86e   : > { %v1969_v62 = vsub.f32 %v1961_v35, %v5625_v31 }
 0x870   : > { %4020 = vset.pattern.permute.xlu1 %v4108_v9 }
 0x871   : > { %v2053_v11 = vpop.xlane.xlu1 %2052  ;;  %1982 = vperm.xlu1 %4020, %v1963_v6   ;;  %v2166_v63 = vpop.xlane.xlu0 %2165  ;;  %v2081_v6 = vsub.f32 %v2071_v60, %v5620_v19 }
 0x872   : > { %v2075_v20 = vsub.f32 %v2053_v11, %v5599_v33  ;;  %vm2188_vm9 = vcmp.eq.f32.partialorder %v5518_v44, %v2166_v63 }
 0x874   : > { %2092 = vperm.xlu0 %4021, %v2075_v20   ;;  %v2196_v20 = vsel %vm2188_vm9, %v4289_v24, 64.0 }
 0x875   : > { %1985 = vperm.xlu1 %4020, %v1964_v30   ;;  %v2062_v48 = vpop.xlane.xlu1 %2061  ;;  %v2172_v40 = vpop.xlane.xlu0 %2171  ;;  %v2204_v30 = vsel %vm389_vm0, %v2196_v20, inf }
 0x876   : > { %v2078_v1 = vsub.f32 %v2062_v48, %v5607_v29  ;;  %vm2190_vm5 = vcmp.eq.f32.partialorder %v5530_v49, %v2172_v40 }
 0x878   : > { %4024 = vset.pattern.permute.xlu0 %v4107_v0 }
 0x879   : > { %1988 = vperm.xlu1 %4020, %v1965_v34   ;;  %v2068_v36 = vpop.xlane.xlu1 %2067  ;;  %v2175_v50 = vpop.xlane.xlu0 %2174  ;;  %v2198_v34 = vsel %vm2190_vm5, %v4289_v24, 64.0 }
 0x87a   : > { %vm2191_vm8 = vcmp.eq.f32.partialorder %v5543_v22, %v2175_v50  ;;  %v2080_v47 = vsub.f32 %v2068_v36, %v5615_v52  ;;  %v2210_v48 = vsel %vm389_vm0, %v2198_v34, inf }
 0x87b   : > { %v2199_v55 = vsel %vm2191_vm8, %v4289_v24, 64.0 }
 0x87c   : > { %v2213_v46 = vsel %vm389_vm0, %v2199_v55, inf }
 0x87d   : > { %1991 = vperm.xlu1 %4020, %v1966_v4   ;;  %v2074_v18 = vpop.xlane.xlu1 %2073  ;;  %v2181_v58 = vpop.xlane.xlu0 %2180 }
 0x87e   : > { %vm2193_vm3 = vcmp.eq.f32.partialorder %v5556_v39, %v2181_v58  ;;  %v2082_v11 = vsub.f32 %v2074_v18, %v5625_v31 }
 0x87f   : > { %v2201_v8 = vsel %vm2193_vm3, %v4289_v24, 64.0 }
 0x880   : > { %v2219_v16 = vsel %vm389_vm0, %v2201_v8, inf }
 0x881   : > { %1994 = vperm.xlu1 %4020, %v1967_v13   ;;  %v2169_v3 = vpop.xlane.xlu1 %2168  ;;  %v2187_v27 = vpop.xlane.xlu0 %2186 }
 0x882   : > { %vm2189_vm7 = vcmp.eq.f32.partialorder %v5565_v59, %v2169_v3  ;;  %vm2195_vm4 = vcmp.eq.f32.partialorder %v5571_v26, %v2187_v27 }
 0x883   : > { %v2197_v53 = vsel %vm2189_vm7, %v4289_v24, 64.0  ;;  %v2203_v43 = vsel %vm2195_vm4, %v4289_v24, 64.0  ;;  %vm6883_vm7 = vcmask 516096  }
 0x884   : > { %v2207_v12 = vsel %vm389_vm0, %v2197_v53, inf  ;;  %v2225_v35 = vsel %vm389_vm0, %v2203_v43, inf  ;;  %vm6884_vm8 = vmmov %vm6883_vm7 }
 0x885   : > { %1997 = vperm.xlu1 %4020, %v1968_v41   ;;  %v2178_v51 = vpop.xlane.xlu1 %2177  ;;  %vm6885_vm9 = vmmov %vm6883_vm7 }
 0x886   : > { %vm2192_vm6 = vcmp.eq.f32.partialorder %v5581_v57, %v2178_v51 }
 0x887   : > { %v2200_v4 = vsel %vm2192_vm6, %v4289_v24, 64.0 }
 0x888   : > { %v2216_v63 = vsel %vm389_vm0, %v2200_v4, inf }
 0x889   : > { %2000 = vperm.xlu1 %4020, %v1969_v62   ;;  %v2184_v60 = vpop.xlane.xlu1 %2183 }
 0x88a   : > { %vm2194_vm10 = vcmp.eq.f32.partialorder %v5589_v15, %v2184_v60 }
 0x88b   : > { %v2202_v36 = vsel %vm2194_vm10, %v4289_v24, 64.0 }
 0x88c   : > { %v2222_v41 = vsel %vm389_vm0, %v2202_v36, inf }
 0x88d   : > { %4022 = vset.pattern.permute.xlu1 %v4109_v10 }
 0x88e   : > { %2095 = vperm.xlu1 %4022, %v2076_v5  }
 0x892   : > { %2098 = vperm.xlu1 %4022, %v2077_v38  }
 0x893   : > { %2208 = vmin.xlane.f32.xlu0 %v2207_v12 }
 0x896   : > { %2101 = vperm.xlu1 %4022, %v2078_v1  }
 0x897   : > { %2214 = vmin.xlane.f32.xlu0 %v2213_v46 }
 0x89a   : > { %2104 = vperm.xlu1 %4022, %v2079_v25  }
 0x89b   : > { %2220 = vmin.xlane.f32.xlu0 %v2219_v16 }
 0x89c   : > { %v1869_v50 = vpop.permute.xlu0 %1868 }
 0x89d   : > { %v1895_v53 = vrot.slane %v1869_v50, %v4666_v56 }
 0x89e   : > { %2107 = vperm.xlu1 %4022, %v2080_v47  }
 0x89f   : > { %2226 = vmin.xlane.f32.xlu0 %v2225_v35 }
 0x8a2   : > { %2110 = vperm.xlu1 %4022, %v2081_v6  }
 0x8a6   : > { %2113 = vperm.xlu1 %4022, %v2082_v11  }
 0x8aa   : > { %4023 = vset.pattern.permute.xlu1 %v4107_v0 }
 0x8ca   : > { %2205 = vmin.xlane.f32.xlu1 %v2204_v30 }
 0x8ce   : > { %2211 = vmin.xlane.f32.xlu1 %v2210_v48 }
 0x8d2   : > { %2217 = vmin.xlane.f32.xlu1 %v2216_v63 }
 0x8d3   : > { %v1866_v13 = vpop.permute.xlu1 %1865 }
 0x8d4   : > { %v1891_v5 = vrot.slane %v1866_v13, %v4663_v42 }
 0x8d6   : > { %2223 = vmin.xlane.f32.xlu1 %v2222_v41  ;;  %v1896_v1 = vsel %vm623_vm11, %v1895_v53, %v1891_v5 }
 0x8d7   : > { %v1872_v40 = vpop.permute.xlu1 %1871 }
 0x8d8   : > { %v1900_v58 = vrot.slane %v1872_v40, %v4670_v2 }
 0x8da   : > { %v1901_v46 = vsel %vm630_vm12, %v1900_v58, %v1896_v1 }
 0x8db   : > { %v1875_v18 = vpop.permute.xlu1 %1874 }
 0x8dc   : > { %v1905_v38 = vrot.slane %v1875_v18, %v4674_v14 }
 0x8de   : > { %v1906_v25 = vsel %vm637_vm13, %v1905_v38, %v1901_v46 }
 0x8df   : > { %v1878_v62 = vpop.permute.xlu1 %1877 }
 0x8e0   : > { %v1910_v12 = vrot.slane %v1878_v62, %v4677_v61 }
 0x8e2   : > { %v1911_v16 = vsel %vm644_vm14, %v1910_v12, %v1906_v25 }
 0x8e3   : > { %v1881_v3 = vpop.permute.xlu1 %1880  ;;  %v1980_v60 = vpop.permute.xlu0 %1979 }
 0x8e4   : > { %v1915_v27 = vrot.slane %v1881_v3, %v4682_v45  ;;  %v2005_v36 = vrot.slane %v1980_v60, %v4663_v42 }
 0x8e6   : > { %v1916_v47 = vsel %vm651_vm15, %v1915_v27, %v1911_v16 }
 0x8e7   : > { %v1884_v55 = vpop.permute.xlu1 %1883 }
 0x8e8   : > { %v1920_v8 = vrot.slane %v1884_v55, %v4687_v17 }
 0x8ea   : > { %v1921_v6 = vsel %vm658_vm1, %v1920_v8, %v1916_v47 }
 0x8eb   : > { %v1887_v43 = vpop.permute.xlu1 %1886 }
 0x8ec   : > { %v1925_v35 = vrot.slane %v1887_v43, %v4694_v23 }
 0x8ee   : > { %v1926_v11 = vsel %vm665_vm2, %v1925_v35, %v1921_v6 }
 0x8ef   : > { %3947 = vst.msk [vmem:[%s4705_s24 + $0xc] sm:$0x1] %vm6883_vm7, %v1926_v11 }
 0x8f0   : > { %v1983_v51 = vpop.permute.xlu1 %1982 }
 0x8f1   : > { %v2009_v4 = vrot.slane %v1983_v51, %v4666_v56 }
 0x8f3   : > { %v2010_v18 = vsel %vm623_vm11, %v2009_v4, %v2005_v36  ;;  %v2093_v16 = vpop.permute.xlu0 %2092 }
 0x8f4   : > { %v1986_v20 = vpop.permute.xlu1 %1985  ;;  %v2118_v6 = vrot.slane %v2093_v16, %v4663_v42 }
 0x8f5   : > { %v2014_v63 = vrot.slane %v1986_v20, %v4670_v2 }
 0x8f7   : > { %v2015_v50 = vsel %vm630_vm12, %v2014_v63, %v2010_v18 }
 0x8f8   : > { %v1989_v30 = vpop.permute.xlu1 %1988 }
 0x8f9   : > { %v2019_v13 = vrot.slane %v1989_v30, %v4674_v14 }
 0x8fb   : > { %v2020_v5 = vsel %vm637_vm13, %v2019_v13, %v2015_v50 }
 0x8fc   : > { %v1992_v34 = vpop.permute.xlu1 %1991 }
 0x8fd   : > { %v2024_v41 = vrot.slane %v1992_v34, %v4677_v61 }
 0x8ff   : > { %v2025_v58 = vsel %vm644_vm14, %v2024_v41, %v2020_v5 }
 0x900   : > { %v1995_v48 = vpop.permute.xlu1 %1994 }
 0x901   : > { %v2029_v62 = vrot.slane %v1995_v48, %v4682_v45 }
 0x903   : > { %v2030_v38 = vsel %vm651_vm15, %v2029_v62, %v2025_v58 }
 0x904   : > { %v1998_v40 = vpop.permute.xlu1 %1997 }
 0x905   : > { %v2034_v3 = vrot.slane %v1998_v40, %v4687_v17 }
 0x907   : > { %v2035_v55 = vsel %vm658_vm1, %v2034_v3, %v2030_v38 }
 0x908   : > { %v2001_v53 = vpop.permute.xlu1 %2000 }
 0x909   : > { %v2039_v12 = vrot.slane %v2001_v53, %v4694_v23 }
 0x90b   : > { %v2040_v1 = vsel %vm665_vm2, %v2039_v12, %v2035_v55 }
 0x90c   : > { %3948 = vst.msk [vmem:[%s4705_s24 + $0xd] sm:$0x1] %vm6884_vm8, %v2040_v1 }
 0x90d   : > { %v2096_v27 = vpop.permute.xlu1 %2095 }
 0x90e   : > { %v2122_v47 = vrot.slane %v2096_v27, %v4666_v56 }
 0x910   : > { %v2123_v34 = vsel %vm623_vm11, %v2122_v47, %v2118_v6 }
 0x911   : > { %v2099_v46 = vpop.permute.xlu1 %2098 }
 0x912   : > { %v2127_v35 = vrot.slane %v2099_v46, %v4670_v2 }
 0x914   : > { %v2128_v4 = vsel %vm630_vm12, %v2127_v35, %v2123_v34 }
 0x915   : > { %v2102_v8 = vpop.permute.xlu1 %2101 }
 0x916   : > { %v2132_v11 = vrot.slane %v2102_v8, %v4674_v14 }
 0x918   : > { %v2133_v13 = vsel %vm637_vm13, %v2132_v11, %v2128_v4 }
 0x919   : > { %v2105_v25 = vpop.permute.xlu1 %2104 }
 0x91a   : > { %v2137_v20 = vrot.slane %v2105_v25, %v4677_v61 }
 0x91c   : > { %v2138_v40 = vsel %vm644_vm14, %v2137_v20, %v2133_v13 }
 0x91d   : > { %v2108_v43 = vpop.permute.xlu1 %2107 }
 0x91e   : > { %v2142_v60 = vrot.slane %v2108_v43, %v4682_v45 }
 0x920   : > { %v5709_v51 = vpop.xlane.xlu0 %2208  ;;  %v2143_v62 = vsel %vm651_vm15, %v2142_v60, %v2138_v40 }
 0x921   : > { %vm2229_vm3 = vcmp.eq.f32.partialorder %v4289_v24, %v5709_v51  ;;  %v2111_v30 = vpop.permute.xlu1 %2110 }
 0x922   : > { %v2237_v48 = vsel %vm2229_vm3, %v4223_v32, 0.0  ;;  %v2147_v63 = vrot.slane %v2111_v30, %v4687_v17  ;;  %v2351_v8 = vsel %vm2229_vm3, %v4220_v28, 0.0  ;;  %v2464_v20 = vsel %vm2229_vm3, %v4227_v37, 0.0 }
 0x923   : > { %v2247_v36 = vsel %vm389_vm0, %v2237_v48, 0.0  ;;  %v2361_v25 = vsel %vm389_vm0, %v2351_v8, 0.0  ;;  %v2474_v30 = vsel %vm389_vm0, %v2464_v20, 0.0  ;;  %v5827_v8 = vsel %vm2229_vm3, inf, %v5565_v59 }
 0x924   : > { %2248 = vadd.xlane.f32.xlu0 %v2247_v36  ;;  %v5724_v41 = vpop.xlane.xlu0 %2214  ;;  %v2148_v5 = vsel %vm658_vm1, %v2147_v63, %v2143_v62 }
 0x925   : > { %vm2231_vm4 = vcmp.eq.f32.partialorder %v4289_v24, %v5724_v41  ;;  %v2114_v18 = vpop.permute.xlu1 %2113 }
 0x926   : > { %v2152_v50 = vrot.slane %v2114_v18, %v4694_v23  ;;  %v2239_v3 = vsel %vm2231_vm4, %v4223_v32, 0.0  ;;  %v2353_v16 = vsel %vm2231_vm4, %v4220_v28, 0.0 }
 0x927   : > { %v2253_v58 = vsel %vm389_vm0, %v2239_v3, 0.0  ;;  %v2367_v43 = vsel %vm389_vm0, %v2353_v16, 0.0  ;;  %v2587_v16 = vsel %vm389_vm0, %v5827_v8, inf }
 0x928   : > { %v2153_v53 = vsel %vm665_vm2, %v2152_v50, %v2148_v5  ;;  %2254 = vadd.xlane.f32.xlu0 %v2253_v58  ;;  %v5738_v38 = vpop.xlane.xlu0 %2220 }
 0x929   : > { %3949 = vst.msk [vmem:[%s4705_s24 + $0xe] sm:$0x1] %vm6885_vm9, %v2153_v53  ;;  %vm2233_vm5 = vcmp.eq.f32.partialorder %v4289_v24, %v5738_v38 }
 0x92a   : > { %v2241_v12 = vsel %vm2233_vm5, %v4223_v32, 0.0  ;;  %v2355_v47 = vsel %vm2233_vm5, %v4220_v28, 0.0 }
 0x92b   : > { %v2259_v55 = vsel %vm389_vm0, %v2241_v12, 0.0  ;;  %v2373_v35 = vsel %vm389_vm0, %v2355_v47, 0.0 }
 0x92c   : > { %2260 = vadd.xlane.f32.xlu0 %v2259_v55  ;;  %v5749_v1 = vpop.xlane.xlu0 %2226 }
 0x92d   : > { %vm2235_vm6 = vcmp.eq.f32.partialorder %v4289_v24, %v5749_v1 }
 0x92e   : > { %v2243_v27 = vsel %vm2235_vm6, %v4223_v32, 0.0  ;;  %v2357_v6 = vsel %vm2235_vm6, %v4220_v28, 0.0 }
 0x92f   : > { %v2265_v46 = vsel %vm389_vm0, %v2243_v27, 0.0  ;;  %v2379_v11 = vsel %vm389_vm0, %v2357_v6, 0.0 }
 0x930   : > { %2266 = vadd.xlane.f32.xlu0 %v2265_v46 }
 0x934   : > { %2362 = vadd.xlane.f32.xlu0 %v2361_v25 }
 0x938   : > { %2368 = vadd.xlane.f32.xlu0 %v2367_v43 }
 0x93c   : > { %2374 = vadd.xlane.f32.xlu0 %v2373_v35 }
 0x940   : > { %2380 = vadd.xlane.f32.xlu0 %v2379_v11 }
 0x944   : > { %2475 = vadd.xlane.f32.xlu0 %v2474_v30 }
 0x957   : > { %v5783_v34 = vpop.xlane.xlu1 %2205 }
 0x958   : > { %vm2228_vm10 = vcmp.eq.f32.partialorder %v4289_v24, %v5783_v34 }
 0x959   : > { %v2236_v60 = vsel %vm2228_vm10, %v4223_v32, 0.0  ;;  %v2350_v46 = vsel %vm2228_vm10, %v4220_v28, 0.0 }
 0x95a   : > { %v2244_v48 = vsel %vm389_vm0, %v2236_v60, 0.0  ;;  %v2358_v25 = vsel %vm389_vm0, %v2350_v46, 0.0 }
 0x95b   : > { %2245 = vadd.xlane.f32.xlu1 %v2244_v48  ;;  %v2212_v4 = vpop.xlane.xlu1 %2211  ;;  %v2463_v48 = vsel %vm2228_vm10, %v4227_v37, 0.0 }
 0x95c   : > { %vm2230_vm7 = vcmp.eq.f32.partialorder %v4289_v24, %v2212_v4  ;;  %v2471_v4 = vsel %vm389_vm0, %v2463_v48, 0.0 }
 0x95d   : > { %v2238_v63 = vsel %vm2230_vm7, %v4223_v32, 0.0  ;;  %v2465_v36 = vsel %vm2230_vm7, %v4227_v37, 0.0  ;;  %v2352_v43 = vsel %vm2230_vm7, %v4220_v28, 0.0  ;;  %v5838_v47 = vsel %vm2230_vm7, inf, %v5530_v49 }
 0x95e   : > { %v2250_v13 = vsel %vm389_vm0, %v2238_v63, 0.0  ;;  %v2477_v40 = vsel %vm389_vm0, %v2465_v36, 0.0  ;;  %v2364_v51 = vsel %vm389_vm0, %v2352_v43, 0.0  ;;  %v2590_v59 = vsel %vm389_vm0, %v5838_v47, inf }
 0x95f   : > { %2251 = vadd.xlane.f32.xlu1 %v2250_v13  ;;  %v2218_v18 = vpop.xlane.xlu1 %2217  ;;  %2478 = vadd.xlane.f32.xlu0 %v2477_v40  ;;  %v2468_v36 = vsel %vm2233_vm5, %v4227_v37, 0.0  ;;  %v2470_v40 = vsel %vm2235_vm6, %v4227_v37, 0.0 }
 0x960   : > { %vm2232_vm8 = vcmp.eq.f32.partialorder %v4289_v24, %v2218_v18  ;;  %v2486_v13 = vsel %vm389_vm0, %v2468_v36, 0.0  ;;  %v2492_v18 = vsel %vm389_vm0, %v2470_v40, 0.0 }
 0x961   : > { %v2240_v62 = vsel %vm2232_vm8, %v4223_v32, 0.0  ;;  %v2467_v50 = vsel %vm2232_vm8, %v4227_v37, 0.0  ;;  %v2354_v35 = vsel %vm2232_vm8, %v4220_v28, 0.0  ;;  %v5849_v6 = vsel %vm2232_vm8, inf, %v5581_v57 }
 0x962   : > { %v2256_v3 = vsel %vm389_vm0, %v2240_v62, 0.0  ;;  %v2483_v5 = vsel %vm389_vm0, %v2467_v50, 0.0  ;;  %v2370_v11 = vsel %vm389_vm0, %v2354_v35, 0.0  ;;  %v2596_v49 = vsel %vm389_vm0, %v5849_v6, inf }
 0x963   : > { %2257 = vadd.xlane.f32.xlu1 %v2256_v3  ;;  %v2224_v58 = vpop.xlane.xlu1 %2223  ;;  %2484 = vadd.xlane.f32.xlu0 %v2483_v5  ;;  %v5889_v62 = vsel %vm2228_vm10, inf, %v5518_v44  ;;  %v5897_v3 = vsel %vm2231_vm4, inf, %v5543_v22  ;;  %v5905_v44 = vsel %vm2233_vm5, inf, %v5556_v39  ;;  %v5913_v22 = vsel %vm2235_vm6, inf, %v5571_v26 }
 0x964   : > { %vm2234_vm9 = vcmp.eq.f32.partialorder %v4289_v24, %v2224_v58  ;;  %v2584_v50 = vsel %vm389_vm0, %v5889_v62, inf  ;;  %v2593_v5 = vsel %vm389_vm0, %v5897_v3, inf  ;;  %v2599_v34 = vsel %vm389_vm0, %v5905_v44, inf }
 0x965   : > { %v2242_v53 = vsel %vm2234_vm9, %v4223_v32, 0.0  ;;  %v2469_v12 = vsel %vm2234_vm9, %v4227_v37, 0.0  ;;  %v2356_v20 = vsel %vm2234_vm9, %v4220_v28, 0.0  ;;  %v5860_v30 = vsel %vm2234_vm9, inf, %v5589_v15 }
 0x966   : > { %v2262_v55 = vsel %vm389_vm0, %v2242_v53, 0.0  ;;  %v2489_v27 = vsel %vm389_vm0, %v2469_v12, 0.0  ;;  %v2376_v60 = vsel %vm389_vm0, %v2356_v20, 0.0  ;;  %v2602_v57 = vsel %vm389_vm0, %v5860_v30, inf }
 0x967   : > { %2263 = vadd.xlane.f32.xlu1 %v2262_v55  ;;  %2490 = vadd.xlane.f32.xlu0 %v2489_v27  ;;  %v2466_v15 = vsel %vm2231_vm4, %v4227_v37, 0.0  ;;  %v2605_v41 = vsel %vm389_vm0, %v5913_v22, inf }
 0x968   : > { %v2480_v63 = vsel %vm389_vm0, %v2466_v15, 0.0 }
 0x96b   : > { %2359 = vadd.xlane.f32.xlu1 %v2358_v25  ;;  %2588 = vmin.xlane.f32.xlu0 %v2587_v16 }
 0x96f   : > { %2365 = vadd.xlane.f32.xlu1 %v2364_v51  ;;  %2591 = vmin.xlane.f32.xlu0 %v2590_v59 }
 0x973   : > { %2371 = vadd.xlane.f32.xlu1 %v2370_v11  ;;  %2597 = vmin.xlane.f32.xlu0 %v2596_v49 }
 0x977   : > { %2377 = vadd.xlane.f32.xlu1 %v2376_v60  ;;  %2603 = vmin.xlane.f32.xlu0 %v2602_v57 }
 0x97b   : > { %2472 = vadd.xlane.f32.xlu1 %v2471_v4 }
 0x97f   : > { %2481 = vadd.xlane.f32.xlu1 %v2480_v63 }
 0x983   : > { %2487 = vadd.xlane.f32.xlu1 %v2486_v13 }
 0x987   : > { %2493 = vadd.xlane.f32.xlu1 %v2492_v18 }
 0x98b   : > { %2585 = vmin.xlane.f32.xlu1 %v2584_v50 }
 0x98f   : > { %2594 = vmin.xlane.f32.xlu1 %v2593_v5 }
 0x993   : > { %2600 = vmin.xlane.f32.xlu1 %v2599_v34 }
 0x997   : > { %2606 = vmin.xlane.f32.xlu1 %v2605_v41 }
 0x9b1   : > { %v2249_v58 = vpop.xlane.xlu0 %2248 }
 0x9b2   : > { %v2269_v53 = vsub.f32 %v2249_v58, %v5594_v54 }
 0x9b4   : > { %2288 = vperm.xlu0 %4024, %v2269_v53  }
 0x9b5   : > { %v2255_v39 = vpop.xlane.xlu0 %2254 }
 0x9b6   : > { %v2271_v43 = vsub.f32 %v2255_v39, %v5607_v29 }
 0x9b8   : > { %4026 = vset.pattern.permute.xlu0 %v4108_v9 }
 0x9b9   : > { %v2261_v38 = vpop.xlane.xlu0 %2260 }
 0x9ba   : > { %v2273_v20 = vsub.f32 %v2261_v38, %v5615_v52 }
 0x9bd   : > { %v2267_v12 = vpop.xlane.xlu0 %2266 }
 0x9be   : > { %v2275_v15 = vsub.f32 %v2267_v12, %v5625_v31 }
 0x9c1   : > { %v2363_v55 = vpop.xlane.xlu0 %2362 }
 0x9c2   : > { %v2383_v27 = vsub.f32 %v2363_v55, %v5594_v54 }
 0x9c4   : > { %2402 = vperm.xlu0 %4026, %v2383_v27  }
 0x9c5   : > { %v2369_v51 = vpop.xlane.xlu0 %2368 }
 0x9c6   : > { %v2385_v34 = vsub.f32 %v2369_v51, %v5607_v29 }
 0x9c8   : > { %4027 = vset.pattern.permute.xlu0 %v4109_v10 }
 0x9c9   : > { %v2375_v11 = vpop.xlane.xlu0 %2374 }
 0x9ca   : > { %v2387_v12 = vsub.f32 %v2375_v11, %v5615_v52 }
 0x9cd   : > { %v2381_v48 = vpop.xlane.xlu0 %2380 }
 0x9d1   : > { %v2476_v63 = vpop.xlane.xlu0 %2475 }
 0x9e8   : > { %v2246_v26 = vpop.xlane.xlu1 %2245 }
 0x9e9   : > { %v2268_v1 = vsub.f32 %v2246_v26, %v5599_v33  ;;  %v2389_v26 = vsub.f32 %v2381_v48, %v5625_v31 }
 0x9eb   : > { %2285 = vperm.xlu1 %4023, %v2268_v1  }
 0x9ec   : > { %v2252_v46 = vpop.xlane.xlu1 %2251  ;;  %v2479_v40 = vpop.xlane.xlu0 %2478 }
 0x9ed   : > { %v2270_v25 = vsub.f32 %v2252_v46, %v5603_v7  ;;  %v2497_v51 = vsub.f32 %v2479_v40, %v5603_v7 }
 0x9ef   : > { %2291 = vperm.xlu1 %4023, %v2270_v25   ;;  %v2496_v25 = vsub.f32 %v2476_v63, %v5594_v54 }
 0x9f0   : > { %v2258_v16 = vpop.xlane.xlu1 %2257  ;;  %v2485_v41 = vpop.xlane.xlu0 %2484 }
 0x9f1   : > { %v2272_v35 = vsub.f32 %v2258_v16, %v5611_v21 }
 0x9f3   : > { %2294 = vperm.xlu1 %4023, %v2271_v43  }
 0x9f4   : > { %v2264_v59 = vpop.xlane.xlu1 %2263  ;;  %v2491_v39 = vpop.xlane.xlu0 %2490 }
 0x9f5   : > { %v2274_v57 = vsub.f32 %v2264_v59, %v5620_v19 }
 0x9f7   : > { %2297 = vperm.xlu1 %4023, %v2272_v35  }
 0x9f8   : > { %v2360_v49 = vpop.xlane.xlu1 %2359 }
 0x9f9   : > { %v2382_v13 = vsub.f32 %v2360_v49, %v5599_v33 }
 0x9fb   : > { %2300 = vperm.xlu1 %4023, %v2273_v20  }
 0x9fc   : > { %v2366_v60 = vpop.xlane.xlu1 %2365 }
 0x9fd   : > { %v2384_v5 = vsub.f32 %v2366_v60, %v5603_v7  ;;  %v2499_v7 = vsub.f32 %v2485_v41, %v5611_v21 }
 0x9ff   : > { %2303 = vperm.xlu1 %4023, %v2274_v57  }
 0xa00   : > { %v2372_v4 = vpop.xlane.xlu1 %2371 }
 0xa01   : > { %v2386_v53 = vsub.f32 %v2372_v4, %v5611_v21  ;;  %v2501_v4 = vsub.f32 %v2491_v39, %v5620_v19 }
 0xa03   : > { %2306 = vperm.xlu1 %4023, %v2275_v15  }
 0xa04   : > { %v2378_v36 = vpop.xlane.xlu1 %2377 }
 0xa05   : > { %v2388_v55 = vsub.f32 %v2378_v36, %v5620_v19 }
 0xa07   : > { %4025 = vset.pattern.permute.xlu1 %v4108_v9 }
 0xa08   : > { %v2473_v18 = vpop.xlane.xlu1 %2472  ;;  %2399 = vperm.xlu1 %4025, %v2382_v13  }
 0xa09   : > { %v2495_v50 = vsub.f32 %v2473_v18, %v5599_v33  ;;  %v2589_v33 = vpop.xlane.xlu0 %2588 }
 0xa0a   : > { %vm2609_vm10 = vcmp.eq.f32.partialorder %v5827_v8, %v2589_v33 }
 0xa0b   : > { %2512 = vperm.xlu0 %4027, %v2495_v50   ;;  %v2617_v36 = vsel %vm2609_vm10, %v4289_v24, 64.0 }
 0xa0c   : > { %2405 = vperm.xlu1 %4025, %v2384_v5   ;;  %v2482_v58 = vpop.xlane.xlu1 %2481 }
 0xa0d   : > { %v2592_v1 = vpop.xlane.xlu0 %2591  ;;  %v2498_v54 = vsub.f32 %v2482_v58, %v5607_v29 }
 0xa0e   : > { %vm2610_vm4 = vcmp.eq.f32.partialorder %v5838_v47, %v2592_v1 }
 0xa0f   : > { %4029 = vset.pattern.permute.xlu0 %v4107_v0  ;;  %v2618_v35 = vsel %vm2610_vm4, %v4289_v24, 64.0 }
 0xa10   : > { %2408 = vperm.xlu1 %4025, %v2385_v34   ;;  %v2488_v38 = vpop.xlane.xlu1 %2487  ;;  %v2630_v49 = vsel %vm389_vm0, %v2618_v35, inf }
 0xa11   : > { %v2598_v16 = vpop.xlane.xlu0 %2597  ;;  %v2500_v48 = vsub.f32 %v2488_v38, %v5615_v52  ;;  %v2627_v52 = vsel %vm389_vm0, %v2617_v36, inf }
 0xa12   : > { %vm2612_vm5 = vcmp.eq.f32.partialorder %v5849_v6, %v2598_v16 }
 0xa13   : > { %v2620_v20 = vsel %vm2612_vm5, %v4289_v24, 64.0 }
 0xa14   : > { %2411 = vperm.xlu1 %4025, %v2386_v53   ;;  %v2494_v27 = vpop.xlane.xlu1 %2493  ;;  %v2636_v60 = vsel %vm389_vm0, %v2620_v20, inf }
 0xa15   : > { %v2604_v11 = vpop.xlane.xlu0 %2603  ;;  %v2502_v15 = vsub.f32 %v2494_v27, %v5625_v31 }
 0xa16   : > { %vm2614_vm6 = vcmp.eq.f32.partialorder %v5860_v30, %v2604_v11 }
 0xa17   : > { %v2622_v57 = vsel %vm2614_vm6, %v4289_v24, 64.0 }
 0xa18   : > { %2414 = vperm.xlu1 %4025, %v2387_v12   ;;  %v2586_v46 = vpop.xlane.xlu1 %2585  ;;  %v2642_v29 = vsel %vm389_vm0, %v2622_v57, inf }
 0xa19   : > { %vm2608_vm3 = vcmp.eq.f32.partialorder %v5889_v62, %v2586_v46 }
 0xa1a   : > { %v2616_v43 = vsel %vm2608_vm3, %v4289_v24, 64.0  ;;  %vm6886_vm3 = vcmask 516096  }
 0xa1b   : > { %v2624_v59 = vsel %vm389_vm0, %v2616_v43, inf  ;;  %vm6887_vm4 = vmmov %vm6886_vm3 }
 0xa1c   : > { %2417 = vperm.xlu1 %4025, %v2388_v55   ;;  %v2595_v21 = vpop.xlane.xlu1 %2594  ;;  %vm6888_vm10 = vmmov %vm6886_vm3 }
 0xa1d   : > { %vm2611_vm7 = vcmp.eq.f32.partialorder %v5897_v3, %v2595_v21 }
 0xa1e   : > { %v2619_v13 = vsel %vm2611_vm7, %v4289_v24, 64.0 }
 0xa1f   : > { %v2633_v31 = vsel %vm389_vm0, %v2619_v13, inf }
 0xa20   : > { %2420 = vperm.xlu1 %4025, %v2389_v26   ;;  %v2601_v63 = vpop.xlane.xlu1 %2600 }
 0xa21   : > { %vm2613_vm8 = vcmp.eq.f32.partialorder %v5905_v44, %v2601_v63 }
 0xa22   : > { %v2621_v40 = vsel %vm2613_vm8, %v4289_v24, 64.0 }
 0xa23   : > { %v2639_v18 = vsel %vm389_vm0, %v2621_v40, inf }
 0xa24   : > { %4028 = vset.pattern.permute.xlu1 %v4109_v10  ;;  %v2607_v19 = vpop.xlane.xlu1 %2606 }
 0xa25   : > { %2515 = vperm.xlu1 %4028, %v2496_v25   ;;  %vm2615_vm9 = vcmp.eq.f32.partialorder %v5913_v22, %v2607_v19 }
 0xa26   : > { %v2623_v50 = vsel %vm2615_vm9, %v4289_v24, 64.0 }
 0xa27   : > { %v2645_v34 = vsel %vm389_vm0, %v2623_v50, inf }
 0xa29   : > { %2518 = vperm.xlu1 %4028, %v2497_v51  }
 0xa2a   : > { %2625 = vmin.xlane.f32.xlu0 %v2624_v59 }
 0xa2d   : > { %2521 = vperm.xlu1 %4028, %v2498_v54  }
 0xa2e   : > { %2631 = vmin.xlane.f32.xlu0 %v2630_v49 }
 0xa31   : > { %2524 = vperm.xlu1 %4028, %v2499_v7  }
 0xa32   : > { %2637 = vmin.xlane.f32.xlu0 %v2636_v60 }
 0xa33   : > { %v2289_v39 = vpop.permute.xlu0 %2288 }
 0xa34   : > { %v2315_v55 = vrot.slane %v2289_v39, %v4666_v56 }
 0xa35   : > { %2527 = vperm.xlu1 %4028, %v2500_v48  }
 0xa36   : > { %2643 = vmin.xlane.f32.xlu0 %v2642_v29 }
 0xa39   : > { %2530 = vperm.xlu1 %4028, %v2501_v4  }
 0xa3d   : > { %2533 = vperm.xlu1 %4028, %v2502_v15  }
 0xa41   : > { %4030 = vset.pattern.permute.xlu1 %v4107_v0 }
 0xa43   : > { %v2403_v29 = vpop.permute.xlu0 %2402 }
 0xa44   : > { %v2429_v63 = vrot.slane %v2403_v29, %v4666_v56 }
 0xa61   : > { %2628 = vmin.xlane.f32.xlu1 %v2627_v52 }
 0xa65   : > { %2634 = vmin.xlane.f32.xlu1 %v2633_v31 }
 0xa69   : > { %2640 = vmin.xlane.f32.xlu1 %v2639_v18 }
 0xa6a   : > { %v2286_v5 = vpop.permute.xlu1 %2285 }
 0xa6b   : > { %v2311_v12 = vrot.slane %v2286_v5, %v4663_v42 }
 0xa6d   : > { %2646 = vmin.xlane.f32.xlu1 %v2645_v34  ;;  %v2316_v46 = vsel %vm623_vm11, %v2315_v55, %v2311_v12 }
 0xa6e   : > { %v2292_v41 = vpop.permute.xlu1 %2291 }
 0xa6f   : > { %v2320_v33 = vrot.slane %v2292_v41, %v4670_v2 }
 0xa71   : > { %v2321_v16 = vsel %vm630_vm12, %v2320_v33, %v2316_v46 }
 0xa72   : > { %v2295_v58 = vpop.permute.xlu1 %2294 }
 0xa73   : > { %v2325_v27 = vrot.slane %v2295_v58, %v4674_v14 }
 0xa75   : > { %v2326_v51 = vsel %vm637_vm13, %v2325_v27, %v2321_v16 }
 0xa76   : > { %v2298_v53 = vpop.permute.xlu1 %2297 }
 0xa77   : > { %v2330_v26 = vrot.slane %v2298_v53, %v4677_v61 }
 0xa79   : > { %v2331_v59 = vsel %vm644_vm14, %v2330_v26, %v2326_v51 }
 0xa7a   : > { %v2301_v38 = vpop.permute.xlu1 %2300 }
 0xa7b   : > { %v2335_v25 = vrot.slane %v2301_v38, %v4682_v45 }
 0xa7d   : > { %v2336_v54 = vsel %vm651_vm15, %v2335_v25, %v2331_v59 }
 0xa7e   : > { %v2304_v1 = vpop.permute.xlu1 %2303 }
 0xa7f   : > { %v2340_v43 = vrot.slane %v2304_v1, %v4687_v17 }
 0xa81   : > { %v2341_v49 = vsel %vm658_vm1, %v2340_v43, %v2336_v54 }
 0xa82   : > { %v2307_v35 = vpop.permute.xlu1 %2306 }
 0xa83   : > { %v2345_v11 = vrot.slane %v2307_v35, %v4694_v23 }
 0xa85   : > { %v2346_v20 = vsel %vm665_vm2, %v2345_v11, %v2341_v49 }
 0xa86   : > { %3950 = vst.msk [vmem:[%s4705_s24 + $0x10] sm:$0x1] %vm6886_vm3, %v2346_v20 }
 0xa87   : > { %v2400_v7 = vpop.permute.xlu1 %2399 }
 0xa88   : > { %v2425_v15 = vrot.slane %v2400_v7, %v4663_v42 }
 0xa8a   : > { %v2430_v19 = vsel %vm623_vm11, %v2429_v63, %v2425_v15  ;;  %v2513_v27 = vpop.permute.xlu0 %2512 }
 0xa8b   : > { %v2406_v60 = vpop.permute.xlu1 %2405  ;;  %v2538_v25 = vrot.slane %v2513_v27, %v4663_v42 }
 0xa8c   : > { %v2434_v21 = vrot.slane %v2406_v60, %v4670_v2 }
 0xa8e   : > { %v2435_v40 = vsel %vm630_vm12, %v2434_v21, %v2430_v19 }
 0xa8f   : > { %v2409_v57 = vpop.permute.xlu1 %2408 }
 0xa90   : > { %v2439_v36 = vrot.slane %v2409_v57, %v4674_v14 }
 0xa92   : > { %v2440_v50 = vsel %vm637_vm13, %v2439_v36, %v2435_v40 }
 0xa93   : > { %v2412_v48 = vpop.permute.xlu1 %2411 }
 0xa94   : > { %v2444_v52 = vrot.slane %v2412_v48, %v4677_v61 }
 0xa96   : > { %v2445_v5 = vsel %vm644_vm14, %v2444_v52, %v2440_v50 }
 0xa97   : > { %v2415_v4 = vpop.permute.xlu1 %2414 }
 0xa98   : > { %v2449_v31 = vrot.slane %v2415_v4, %v4682_v45 }
 0xa9a   : > { %v2450_v41 = vsel %vm651_vm15, %v2449_v31, %v2445_v5 }
 0xa9b   : > { %v2418_v13 = vpop.permute.xlu1 %2417 }
 0xa9c   : > { %v2454_v18 = vrot.slane %v2418_v13, %v4687_v17 }
 0xa9e   : > { %v2455_v53 = vsel %vm658_vm1, %v2454_v18, %v2450_v41 }
 0xa9f   : > { %v2421_v34 = vpop.permute.xlu1 %2420 }
 0xaa0   : > { %v2459_v58 = vrot.slane %v2421_v34, %v4694_v23 }
 0xaa2   : > { %v2460_v39 = vsel %vm665_vm2, %v2459_v58, %v2455_v53 }
 0xaa3   : > { %3951 = vst.msk [vmem:[%s4705_s24 + $0x11] sm:$0x1] %vm6887_vm4, %v2460_v39 }
 0xaa4   : > { %v2516_v38 = vpop.permute.xlu1 %2515 }
 0xaa5   : > { %v2542_v1 = vrot.slane %v2516_v38, %v4666_v56 }
 0xaa7   : > { %v2543_v35 = vsel %vm623_vm11, %v2542_v1, %v2538_v25 }
 0xaa8   : > { %v2519_v12 = vpop.permute.xlu1 %2518 }
 0xaa9   : > { %v2547_v46 = vrot.slane %v2519_v12, %v4670_v2 }
 0xaab   : > { %v2548_v49 = vsel %vm630_vm12, %v2547_v46, %v2543_v35 }
 0xaac   : > { %v2522_v33 = vpop.permute.xlu1 %2521 }
 0xaad   : > { %v2552_v16 = vrot.slane %v2522_v33, %v4674_v14 }
 0xaaf   : > { %v2553_v60 = vsel %vm637_vm13, %v2552_v16, %v2548_v49 }
 0xab0   : > { %v2525_v55 = vpop.permute.xlu1 %2524 }
 0xab1   : > { %v2557_v51 = vrot.slane %v2525_v55, %v4677_v61 }
 0xab3   : > { %v2558_v48 = vsel %vm644_vm14, %v2557_v51, %v2553_v60 }
 0xab4   : > { %v2528_v26 = vpop.permute.xlu1 %2527 }
 0xab5   : > { %v2562_v54 = vrot.slane %v2528_v26, %v4682_v45 }
 0xab7   : > { %v6009_v43 = vpop.xlane.xlu0 %2625  ;;  %v2563_v4 = vsel %vm651_vm15, %v2562_v54, %v2558_v48 }
 0xab8   : > { %vm2648_vm5 = vcmp.eq.f32.partialorder %v4289_v24, %v6009_v43  ;;  %v2531_v59 = vpop.permute.xlu1 %2530 }
 0xab9   : > { %v2656_v11 = vsel %vm2648_vm5, %v4223_v32, 0.0  ;;  %v2567_v20 = vrot.slane %v2531_v59, %v4687_v17  ;;  %v2770_v5 = vsel %vm2648_vm5, %v4220_v28, 0.0 }
 0xaba   : > { %v2664_v7 = vsel %vm389_vm0, %v2656_v11, 0.0  ;;  %v2778_v34 = vsel %vm389_vm0, %v2770_v5, 0.0 }
 0xabb   : > { %2665 = vadd.xlane.f32.xlu0 %v2664_v7  ;;  %v6024_v57 = vpop.xlane.xlu0 %2631  ;;  %v2568_v63 = vsel %vm658_vm1, %v2567_v20, %v2563_v4 }
 0xabc   : > { %vm2650_vm6 = vcmp.eq.f32.partialorder %v4289_v24, %v6024_v57  ;;  %v2534_v29 = vpop.permute.xlu1 %2533 }
 0xabd   : > { %v2572_v15 = vrot.slane %v2534_v29, %v4694_v23  ;;  %v2658_v21 = vsel %vm2650_vm6, %v4223_v32, 0.0  ;;  %v2772_v41 = vsel %vm2650_vm6, %v4220_v28, 0.0 }
 0xabe   : > { %v2670_v36 = vsel %vm389_vm0, %v2658_v21, 0.0  ;;  %v2784_v58 = vsel %vm389_vm0, %v2772_v41, 0.0 }
 0xabf   : > { %v2573_v52 = vsel %vm665_vm2, %v2572_v15, %v2568_v63  ;;  %2671 = vadd.xlane.f32.xlu0 %v2670_v36  ;;  %v6038_v13 = vpop.xlane.xlu0 %2637 }
 0xac0   : > { %3952 = vst.msk [vmem:[%s4705_s24 + $0x12] sm:$0x1] %vm6888_vm10, %v2573_v52  ;;  %vm2652_vm7 = vcmp.eq.f32.partialorder %v4289_v24, %v6038_v13 }
 0xac1   : > { %v2660_v19 = vsel %vm2652_vm7, %v4223_v32, 0.0  ;;  %v2774_v29 = vsel %vm2652_vm7, %v4220_v28, 0.0 }
 0xac2   : > { %v2676_v31 = vsel %vm389_vm0, %v2660_v19, 0.0  ;;  %v2790_v15 = vsel %vm389_vm0, %v2774_v29, 0.0 }
 0xac3   : > { %2677 = vadd.xlane.f32.xlu0 %v2676_v31  ;;  %v6049_v40 = vpop.xlane.xlu0 %2643  ;;  %v2883_v31 = vsel %vm2648_vm5, %v4227_v37, 0.0 }
 0xac4   : > { %vm2654_vm8 = vcmp.eq.f32.partialorder %v4289_v24, %v6049_v40 }
 0xac5   : > { %v2662_v18 = vsel %vm2654_vm8, %v4223_v32, 0.0  ;;  %v2776_v63 = vsel %vm2654_vm8, %v4220_v28, 0.0 }
 0xac6   : > { %v2682_v50 = vsel %vm389_vm0, %v2662_v18, 0.0  ;;  %v2796_v52 = vsel %vm389_vm0, %v2776_v63, 0.0 }
 0xac7   : > { %2683 = vadd.xlane.f32.xlu0 %v2682_v50  ;;  %v2891_v50 = vsel %vm389_vm0, %v2883_v31, 0.0 }
 0xacb   : > { %2779 = vadd.xlane.f32.xlu0 %v2778_v34  ;;  %v2885_v34 = vsel %vm2650_vm6, %v4227_v37, 0.0 }
 0xacf   : > { %2785 = vadd.xlane.f32.xlu0 %v2784_v58  ;;  %v2897_v58 = vsel %vm389_vm0, %v2885_v34, 0.0 }
 0xaee   : > { %v2629_v53 = vpop.xlane.xlu1 %2628 }
 0xaef   : > { %vm2649_vm9 = vcmp.eq.f32.partialorder %v4289_v24, %v2629_v53 }
 0xaf0   : > { %v2657_v39 = vsel %vm2649_vm9, %v4223_v32, 0.0  ;;  %v2771_v20 = vsel %vm2649_vm9, %v4220_v28, 0.0  ;;  %v2884_v7 = vsel %vm2649_vm9, %v4227_v37, 0.0  ;;  %v6160_v41 = vsel %vm2649_vm9, inf, %v5827_v8 }
 0xaf1   : > { %v2667_v38 = vsel %vm389_vm0, %v2657_v39, 0.0  ;;  %v2781_v60 = vsel %vm389_vm0, %v2771_v20, 0.0  ;;  %v2894_v48 = vsel %vm389_vm0, %v2884_v7, 0.0  ;;  %v3007_v39 = vsel %vm389_vm0, %v6160_v41, inf }
 0xaf2   : > { %2668 = vadd.xlane.f32.xlu1 %v2667_v38  ;;  %v6073_v12 = vpop.xlane.xlu1 %2634  ;;  %v2887_v38 = vsel %vm2652_vm7, %v4227_v37, 0.0 }
 0xaf3   : > { %vm2651_vm3 = vcmp.eq.f32.partialorder %v4289_v24, %v6073_v12  ;;  %v2903_v8 = vsel %vm389_vm0, %v2887_v38, 0.0 }
 0xaf4   : > { %v2659_v33 = vsel %vm2651_vm3, %v4223_v32, 0.0  ;;  %v2773_v55 = vsel %vm2651_vm3, %v4220_v28, 0.0  ;;  %v2886_v4 = vsel %vm2651_vm3, %v4227_v37, 0.0 }
 0xaf5   : > { %v2673_v27 = vsel %vm389_vm0, %v2659_v33, 0.0  ;;  %v2787_v26 = vsel %vm389_vm0, %v2773_v55, 0.0  ;;  %v2900_v21 = vsel %vm389_vm0, %v2886_v4, 0.0  ;;  %v6173_v33 = vsel %vm2650_vm6, inf, %v5838_v47 }
 0xaf6   : > { %2674 = vadd.xlane.f32.xlu1 %v2673_v27  ;;  %v6087_v1 = vpop.xlane.xlu1 %2640  ;;  %2788 = vadd.xlane.f32.xlu0 %v2787_v26  ;;  %v3010_v53 = vsel %vm389_vm0, %v6173_v33, inf  ;;  %v2889_v55 = vsel %vm2654_vm8, %v4227_v37, 0.0  ;;  %v6186_v27 = vsel %vm2652_vm7, inf, %v5849_v6  ;;  %v6195_v26 = vsel %vm2648_vm5, inf, %v5889_v62 }
 0xaf7   : > { %vm2653_vm4 = vcmp.eq.f32.partialorder %v4289_v24, %v6087_v1  ;;  %v2909_v47 = vsel %vm389_vm0, %v2889_v55, 0.0  ;;  %v3016_v57 = vsel %vm389_vm0, %v6186_v27, inf  ;;  %v6201_v6 = vsel %vm2654_vm8, inf, %v5860_v30  ;;  %v6232_v1 = vld [vmem:[%s4151_s16] sm:$0xff] }
 0xaf8   : > { %v2661_v46 = vsel %vm2653_vm4, %v4223_v32, 0.0  ;;  %v2775_v25 = vsel %vm2653_vm4, %v4220_v28, 0.0  ;;  %v2888_v36 = vsel %vm2653_vm4, %v4227_v37, 0.0  ;;  %v3004_v13 = vsel %vm389_vm0, %v6195_v26, inf }
 0xaf9   : > { %v2679_v16 = vsel %vm389_vm0, %v2661_v46, 0.0  ;;  %v2793_v51 = vsel %vm389_vm0, %v2775_v25, 0.0  ;;  %v2906_v19 = vsel %vm389_vm0, %v2888_v36, 0.0  ;;  %v3022_v46 = vsel %vm389_vm0, %v6201_v6, inf }
 0xafa   : > { %2680 = vadd.xlane.f32.xlu1 %v2679_v16  ;;  %v6101_v59 = vpop.xlane.xlu1 %2646  ;;  %2794 = vadd.xlane.f32.xlu0 %v2793_v51  ;;  %v6211_v62 = vsel %vm2651_vm3, inf, %v5897_v3  ;;  %v6219_v30 = vsel %vm2653_vm4, inf, %v5905_v44 }
 0xafb   : > { %vm2655_vm10 = vcmp.eq.f32.partialorder %v4289_v24, %v6101_v59  ;;  %v3013_v43 = vsel %vm389_vm0, %v6211_v62, inf  ;;  %v3019_v40 = vsel %vm389_vm0, %v6219_v30, inf }
 0xafc   : > { %v2663_v35 = vsel %vm2655_vm10, %v4223_v32, 0.0  ;;  %v2777_v54 = vsel %vm2655_vm10, %v4220_v28, 0.0  ;;  %v2890_v18 = vsel %vm2655_vm10, %v4227_v37, 0.0  ;;  %v6227_v3 = vsel %vm2655_vm10, inf, %v5913_v22 }
 0xafd   : > { %v2685_v11 = vsel %vm389_vm0, %v2663_v35, 0.0  ;;  %v2799_v49 = vsel %vm389_vm0, %v2777_v54, 0.0  ;;  %v2912_v5 = vsel %vm389_vm0, %v2890_v18, 0.0  ;;  %v3025_v12 = vsel %vm389_vm0, %v6227_v3, inf }
 0xafe   : > { %2686 = vadd.xlane.f32.xlu1 %v2685_v11  ;;  %2800 = vadd.xlane.f32.xlu0 %v2799_v49  ;;  %v6237_v11 = vld [vmem:[%s4151_s16 + $0x8] sm:$0xff] }
 0xb02   : > { %2782 = vadd.xlane.f32.xlu1 %v2781_v60  ;;  %2895 = vadd.xlane.f32.xlu0 %v2894_v48  ;;  %v6241_v60 = vld [vmem:[%s4151_s16 + $0x10] sm:$0xff] }
 0xb06   : > { %2791 = vadd.xlane.f32.xlu1 %v2790_v15  ;;  %2901 = vadd.xlane.f32.xlu0 %v2900_v21  ;;  %v6245_v15 = vld [vmem:[%s4151_s16 + $0x18] sm:$0xff] }
 0xb0a   : > { %2797 = vadd.xlane.f32.xlu1 %v2796_v52  ;;  %2907 = vadd.xlane.f32.xlu0 %v2906_v19  ;;  %v6249_v52 = vld [vmem:[%s4151_s16 + $0x20] sm:$0xff] }
 0xb0e   : > { %2892 = vadd.xlane.f32.xlu1 %v2891_v50  ;;  %2913 = vadd.xlane.f32.xlu0 %v2912_v5  ;;  %v6253_v50 = vld [vmem:[%s4151_s16 + $0x28] sm:$0xff] }
 0xb12   : > { %2898 = vadd.xlane.f32.xlu1 %v2897_v58  ;;  %3008 = vmin.xlane.f32.xlu0 %v3007_v39  ;;  %v6258_v39 = vld [vmem:[%s4151_s16 + $0x30] sm:$0xff] }
 0xb16   : > { %2904 = vadd.xlane.f32.xlu1 %v2903_v8  ;;  %3011 = vmin.xlane.f32.xlu0 %v3010_v53 }
 0xb1a   : > { %2910 = vadd.xlane.f32.xlu1 %v2909_v47  ;;  %3017 = vmin.xlane.f32.xlu0 %v3016_v57  ;;  %v6264_v47 = vld [vmem:[%s4151_s16 + $0x38] sm:$0xff] }
 0xb1e   : > { %3005 = vmin.xlane.f32.xlu1 %v3004_v13  ;;  %3023 = vmin.xlane.f32.xlu0 %v3022_v46 }
 0xb22   : > { %3014 = vmin.xlane.f32.xlu1 %v3013_v43 }
 0xb26   : > { %3020 = vmin.xlane.f32.xlu1 %v3019_v40 }
 0xb2a   : > { %3026 = vmin.xlane.f32.xlu1 %v3025_v12 }
 0xb48   : > { %v2666_v25 = vpop.xlane.xlu0 %2665 }
 0xb49   : > { %v2688_v44 = vsub.f32 %v2666_v25, %v6232_v1 }
 0xb4b   : > { %2705 = vperm.xlu0 %4029, %v2688_v44  }
 0xb4c   : > { %v2672_v16 = vpop.xlane.xlu0 %2671 }
 0xb4d   : > { %v2690_v48 = vsub.f32 %v2672_v16, %v6241_v60 }
 0xb4f   : > { %4032 = vset.pattern.permute.xlu0 %v4108_v9 }
 0xb50   : > { %v2678_v51 = vpop.xlane.xlu0 %2677 }
 0xb51   : > { %v2692_v19 = vsub.f32 %v2678_v51, %v6249_v52 }
 0xb54   : > { %v2684_v35 = vpop.xlane.xlu0 %2683 }
 0xb55   : > { %v2694_v38 = vsub.f32 %v2684_v35, %v6258_v39 }
 0xb58   : > { %v2780_v59 = vpop.xlane.xlu0 %2779 }
 0xb59   : > { %v2802_v43 = vsub.f32 %v2780_v59, %v6232_v1 }
 0xb5c   : > { %v2786_v22 = vpop.xlane.xlu0 %2785 }
 0xb5d   : > { %v2804_v25 = vsub.f32 %v2786_v22, %v6241_v60 }
 0xb7f   : > { %v2669_v54 = vpop.xlane.xlu1 %2668 }
 0xb80   : > { %v2689_v49 = vsub.f32 %v2669_v54, %v6237_v11 }
 0xb82   : > { %2708 = vperm.xlu1 %4030, %v2689_v49  }
 0xb83   : > { %v2675_v20 = vpop.xlane.xlu1 %2674  ;;  %v2789_v7 = vpop.xlane.xlu0 %2788 }
 0xb84   : > { %v2691_v21 = vsub.f32 %v2675_v20, %v6245_v15  ;;  %v2805_v16 = vsub.f32 %v2789_v7, %v6245_v15 }
 0xb86   : > { %2711 = vperm.xlu1 %4030, %v2690_v48  }
 0xb87   : > { %v2681_v29 = vpop.xlane.xlu1 %2680  ;;  %v2795_v4 = vpop.xlane.xlu0 %2794 }
 0xb88   : > { %v2693_v5 = vsub.f32 %v2681_v29, %v6253_v50  ;;  %v2807_v59 = vsub.f32 %v2795_v4, %v6253_v50 }
 0xb8a   : > { %2714 = vperm.xlu1 %4030, %v2691_v21  }
 0xb8b   : > { %v2687_v63 = vpop.xlane.xlu1 %2686  ;;  %v2801_v36 = vpop.xlane.xlu0 %2800 }
 0xb8c   : > { %v2695_v57 = vsub.f32 %v2687_v63, %v6264_v47  ;;  %v2809_v7 = vsub.f32 %v2801_v36, %v6264_v47 }
 0xb8e   : > { %2717 = vperm.xlu1 %4030, %v2692_v19  }
 0xb8f   : > { %v2783_v31 = vpop.xlane.xlu1 %2782  ;;  %v2896_v18 = vpop.xlane.xlu0 %2895 }
 0xb90   : > { %v2803_v34 = vsub.f32 %v2783_v31, %v6237_v11  ;;  %v2916_v53 = vsub.f32 %v2896_v18, %v6237_v11 }
 0xb92   : > { %2822 = vperm.xlu0 %4032, %v2803_v34   ;;  %2720 = vperm.xlu1 %4030, %v2693_v5  }
 0xb93   : > { %v2792_v58 = vpop.xlane.xlu1 %2791  ;;  %v2902_v8 = vpop.xlane.xlu0 %2901 }
 0xb94   : > { %v2806_v54 = vsub.f32 %v2792_v58, %v6249_v52 }
 0xb96   : > { %4034 = vset.pattern.permute.xlu0 %v4109_v10  ;;  %2723 = vperm.xlu1 %4030, %v2694_v38   ;;  %v2918_v38 = vsub.f32 %v2902_v8, %v6245_v15 }
 0xb97   : > { %v2798_v55 = vpop.xlane.xlu1 %2797  ;;  %2935 = vperm.xlu0 %4034, %v2916_v53   ;;  %v2908_v13 = vpop.xlane.xlu0 %2907 }
 0xb98   : > { %v2808_v48 = vsub.f32 %v2798_v55, %v6258_v39  ;;  %v2920_v55 = vsub.f32 %v2908_v13, %v6253_v50 }
 0xb9a   : > { %2726 = vperm.xlu1 %4030, %v2695_v57  }
 0xb9b   : > { %v2893_v46 = vpop.xlane.xlu1 %2892  ;;  %4035 = vset.pattern.permute.xlu0 %v4107_v0  ;;  %v2914_v12 = vpop.xlane.xlu0 %2913 }
 0xb9c   : > { %v2915_v31 = vsub.f32 %v2893_v46, %v6232_v1  ;;  %v2922_v46 = vsub.f32 %v2914_v12, %v6264_v47 }
 0xb9e   : > { %4031 = vset.pattern.permute.xlu1 %v4108_v9 }
 0xb9f   : > { %v2899_v40 = vpop.xlane.xlu1 %2898  ;;  %2819 = vperm.xlu1 %4031, %v2802_v43   ;;  %v3009_v51 = vpop.xlane.xlu0 %3008 }
 0xba0   : > { %v2917_v5 = vsub.f32 %v2899_v40, %v6241_v60  ;;  %vm3029_vm9 = vcmp.eq.f32.partialorder %v6160_v41, %v3009_v51 }
 0xba1   : > { %v3037_v40 = vsel %vm3029_vm9, %v4289_v24, 64.0 }
 0xba3   : > { %v2905_v44 = vpop.xlane.xlu1 %2904  ;;  %2825 = vperm.xlu1 %4031, %v2804_v25   ;;  %v3012_v49 = vpop.xlane.xlu0 %3011  ;;  %v3047_v25 = vsel %vm389_vm0, %v3037_v40, inf }
 0xba4   : > { %vm3030_vm6 = vcmp.eq.f32.partialorder %v6173_v33, %v3012_v49  ;;  %v2919_v53 = vsub.f32 %v2905_v44, %v6249_v52 }
 0xba5   : > { %v3038_v63 = vsel %vm3030_vm6, %v4289_v24, 64.0 }
 0xba6   : > { %v3050_v19 = vsel %vm389_vm0, %v3038_v63, inf }
 0xba7   : > { %v2911_v35 = vpop.xlane.xlu1 %2910  ;;  %2828 = vperm.xlu1 %4031, %v2805_v16   ;;  %v3018_v22 = vpop.xlane.xlu0 %3017 }
 0xba8   : > { %vm3032_vm7 = vcmp.eq.f32.partialorder %v6186_v27, %v3018_v22  ;;  %v2921_v57 = vsub.f32 %v2911_v35, %v6258_v39 }
 0xba9   : > { %v3040_v18 = vsel %vm3032_vm7, %v4289_v24, 64.0 }
 0xbaa   : > { %v3056_v36 = vsel %vm389_vm0, %v3040_v18, inf }
 0xbab   : > { %2831 = vperm.xlu1 %4031, %v2806_v54   ;;  %v3006_v20 = vpop.xlane.xlu1 %3005  ;;  %v3024_v4 = vpop.xlane.xlu0 %3023 }
 0xbac   : > { %vm3028_vm5 = vcmp.eq.f32.partialorder %v6195_v26, %v3006_v20  ;;  %vm3034_vm8 = vcmp.eq.f32.partialorder %v6201_v6, %v3024_v4 }
 0xbad   : > { %v3036_v29 = vsel %vm3028_vm5, %v4289_v24, 64.0  ;;  %v3042_v34 = vsel %vm3034_vm8, %v4289_v24, 64.0  ;;  %vm6889_vm5 = vcmask 516096  }
 0xbae   : > { %v3044_v21 = vsel %vm389_vm0, %v3036_v29, inf  ;;  %v3062_v58 = vsel %vm389_vm0, %v3042_v34, inf  ;;  %vm6890_vm6 = vmmov %vm6889_vm5 }
 0xbaf   : > { %2834 = vperm.xlu1 %4031, %v2807_v59   ;;  %v3015_v43 = vpop.xlane.xlu1 %3014 }
 0xbb0   : > { %vm3031_vm3 = vcmp.eq.f32.partialorder %v6211_v62, %v3015_v43 }
 0xbb1   : > { %v3039_v13 = vsel %vm3031_vm3, %v4289_v24, 64.0 }
 0xbb2   : > { %v3053_v12 = vsel %vm389_vm0, %v3039_v13, inf }
 0xbb3   : > { %2837 = vperm.xlu1 %4031, %v2808_v48   ;;  %v3021_v8 = vpop.xlane.xlu1 %3020 }
 0xbb4   : > { %vm3033_vm4 = vcmp.eq.f32.partialorder %v6219_v30, %v3021_v8 }
 0xbb5   : > { %v3041_v16 = vsel %vm3033_vm4, %v4289_v24, 64.0  ;;  %vm6891_vm4 = vmmov %vm6889_vm5 }
 0xbb6   : > { %3045 = vmin.xlane.f32.xlu0 %v3044_v21  ;;  %v3059_v51 = vsel %vm389_vm0, %v3041_v16, inf }
 0xbb7   : > { %2840 = vperm.xlu1 %4031, %v2809_v7   ;;  %v3027_v44 = vpop.xlane.xlu1 %3026 }
 0xbb8   : > { %vm3035_vm10 = vcmp.eq.f32.partialorder %v6227_v3, %v3027_v44 }
 0xbb9   : > { %v3043_v35 = vsel %vm3035_vm10, %v4289_v24, 64.0 }
 0xbba   : > { %3051 = vmin.xlane.f32.xlu0 %v3050_v19  ;;  %v3065_v49 = vsel %vm389_vm0, %v3043_v35, inf }
 0xbbb   : > { %4033 = vset.pattern.permute.xlu1 %v4109_v10 }
 0xbbc   : > { %2932 = vperm.xlu1 %4033, %v2915_v31  }
 0xbbe   : > { %3057 = vmin.xlane.f32.xlu0 %v3056_v36 }
 0xbc0   : > { %2938 = vperm.xlu1 %4033, %v2917_v5  }
 0xbc2   : > { %3063 = vmin.xlane.f32.xlu0 %v3062_v58 }
 0xbc4   : > { %2941 = vperm.xlu1 %4033, %v2918_v38  }
 0xbc8   : > { %2944 = vperm.xlu1 %4033, %v2919_v53  }
 0xbca   : > { %v2706_v22 = vpop.permute.xlu0 %2705 }
 0xbcb   : > { %v2731_v63 = vrot.slane %v2706_v22, %v4663_v42 }
 0xbcc   : > { %2947 = vperm.xlu1 %4033, %v2920_v55  }
 0xbd0   : > { %2950 = vperm.xlu1 %4033, %v2921_v57  }
 0xbd4   : > { %2953 = vperm.xlu1 %4033, %v2922_v46  }
 0xbd8   : > { %4036 = vset.pattern.permute.xlu1 %v4107_v0 }
 0xbf8   : > { %3048 = vmin.xlane.f32.xlu1 %v3047_v25 }
 0xbfc   : > { %3054 = vmin.xlane.f32.xlu1 %v3053_v12 }
 0xc00   : > { %3060 = vmin.xlane.f32.xlu1 %v3059_v51 }
 0xc01   : > { %v2709_v54 = vpop.permute.xlu1 %2708 }
 0xc02   : > { %v2735_v7 = vrot.slane %v2709_v54, %v4666_v56 }
 0xc04   : > { %3066 = vmin.xlane.f32.xlu1 %v3065_v49  ;;  %v2736_v18 = vsel %vm623_vm11, %v2735_v7, %v2731_v63 }
 0xc05   : > { %v2712_v20 = vpop.permute.xlu1 %2711 }
 0xc06   : > { %v2740_v21 = vrot.slane %v2712_v20, %v4670_v2 }
 0xc08   : > { %v2741_v5 = vsel %vm630_vm12, %v2740_v21, %v2736_v18 }
 0xc09   : > { %v2715_v59 = vpop.permute.xlu1 %2714 }
 0xc0a   : > { %v2745_v4 = vrot.slane %v2715_v59, %v4674_v14 }
 0xc0c   : > { %v2746_v58 = vsel %vm637_vm13, %v2745_v4, %v2741_v5 }
 0xc0d   : > { %v2718_v48 = vpop.permute.xlu1 %2717 }
 0xc0e   : > { %v2750_v19 = vrot.slane %v2718_v48, %v4677_v61 }
 0xc10   : > { %v2751_v38 = vsel %vm644_vm14, %v2750_v19, %v2746_v58 }
 0xc11   : > { %v2721_v29 = vpop.permute.xlu1 %2720  ;;  %v2823_v44 = vpop.permute.xlu0 %2822 }
 0xc12   : > { %v2755_v36 = vrot.slane %v2721_v29, %v4682_v45  ;;  %v2849_v35 = vrot.slane %v2823_v44, %v4666_v56 }
 0xc14   : > { %v2756_v55 = vsel %vm651_vm15, %v2755_v36, %v2751_v38 }
 0xc15   : > { %v2724_v31 = vpop.permute.xlu1 %2723 }
 0xc16   : > { %v2760_v34 = vrot.slane %v2724_v31, %v4687_v17  ;;  %v2936_v5 = vpop.permute.xlu0 %2935 }
 0xc18   : > { %v2761_v46 = vsel %vm658_vm1, %v2760_v34, %v2756_v55 }
 0xc19   : > { %v2727_v53 = vpop.permute.xlu1 %2726 }
 0xc1a   : > { %v2765_v57 = vrot.slane %v2727_v53, %v4694_v23 }
 0xc1c   : > { %v2766_v43 = vsel %vm665_vm2, %v2765_v57, %v2761_v46 }
 0xc1d   : > { %3953 = vst.msk [vmem:[%s4705_s24 + $0x14] sm:$0x1] %vm6889_vm5, %v2766_v43 }
 0xc1e   : > { %v2820_v8 = vpop.permute.xlu1 %2819 }
 0xc1f   : > { %v2845_v16 = vrot.slane %v2820_v8, %v4663_v42 }
 0xc21   : > { %v2850_v59 = vsel %vm623_vm11, %v2849_v35, %v2845_v16  ;;  %v2962_v16 = vrot.slane %v2936_v5, %v4666_v56 }
 0xc22   : > { %v2826_v40 = vpop.permute.xlu1 %2825 }
 0xc23   : > { %v2854_v51 = vrot.slane %v2826_v40, %v4670_v2 }
 0xc25   : > { %v2855_v22 = vsel %vm630_vm12, %v2854_v51, %v2850_v59 }
 0xc26   : > { %v2829_v25 = vpop.permute.xlu1 %2828 }
 0xc27   : > { %v2859_v54 = vrot.slane %v2829_v25, %v4674_v14 }
 0xc29   : > { %v2860_v7 = vsel %vm637_vm13, %v2859_v54, %v2855_v22 }
 0xc2a   : > { %v2832_v13 = vpop.permute.xlu1 %2831 }
 0xc2b   : > { %v2864_v49 = vrot.slane %v2832_v13, %v4677_v61 }
 0xc2d   : > { %v2865_v21 = vsel %vm644_vm14, %v2864_v49, %v2860_v7 }
 0xc2e   : > { %v2835_v12 = vpop.permute.xlu1 %2834 }
 0xc2f   : > { %v2869_v48 = vrot.slane %v2835_v12, %v4682_v45 }
 0xc31   : > { %v2870_v4 = vsel %vm651_vm15, %v2869_v48, %v2865_v21 }
 0xc32   : > { %v2838_v20 = vpop.permute.xlu1 %2837 }
 0xc33   : > { %v2874_v29 = vrot.slane %v2838_v20, %v4687_v17 }
 0xc35   : > { %v2875_v31 = vsel %vm658_vm1, %v2874_v29, %v2870_v4 }
 0xc36   : > { %v2841_v63 = vpop.permute.xlu1 %2840 }
 0xc37   : > { %v2879_v19 = vrot.slane %v2841_v63, %v4694_v23 }
 0xc39   : > { %v2880_v18 = vsel %vm665_vm2, %v2879_v19, %v2875_v31 }
 0xc3a   : > { %3954 = vst.msk [vmem:[%s4705_s24 + $0x15] sm:$0x1] %vm6890_vm6, %v2880_v18 }
 0xc3b   : > { %v2933_v36 = vpop.permute.xlu1 %2932 }
 0xc3c   : > { %v2958_v13 = vrot.slane %v2933_v36, %v4663_v42 }
 0xc3e   : > { %v2963_v59 = vsel %vm623_vm11, %v2962_v16, %v2958_v13 }
 0xc3f   : > { %v2939_v34 = vpop.permute.xlu1 %2938 }
 0xc40   : > { %v2967_v44 = vrot.slane %v2939_v34, %v4670_v2 }
 0xc42   : > { %v2968_v22 = vsel %vm630_vm12, %v2967_v44, %v2963_v59 }
 0xc43   : > { %v2942_v58 = vpop.permute.xlu1 %2941  ;;  %v6343_v38 = vpop.xlane.xlu0 %3045 }
 0xc44   : > { %vm3068_vm7 = vcmp.eq.f32.partialorder %v4289_v24, %v6343_v38  ;;  %v2972_v51 = vrot.slane %v2942_v58, %v4674_v14 }
 0xc45   : > { %v3076_v53 = vsel %vm3068_vm7, %v4223_v32, 0.0 }
 0xc46   : > { %v3084_v55 = vsel %vm389_vm0, %v3076_v53, 0.0  ;;  %v2973_v21 = vsel %vm637_vm13, %v2972_v51, %v2968_v22 }
 0xc47   : > { %v2945_v57 = vpop.permute.xlu1 %2944  ;;  %3085 = vadd.xlane.f32.xlu0 %v3084_v55  ;;  %v6352_v46 = vpop.xlane.xlu0 %3051 }
 0xc48   : > { %vm3070_vm8 = vcmp.eq.f32.partialorder %v4289_v24, %v6352_v46  ;;  %v2977_v54 = vrot.slane %v2945_v57, %v4677_v61 }
 0xc49   : > { %v3078_v43 = vsel %vm3070_vm8, %v4223_v32, 0.0 }
 0xc4a   : > { %v3090_v8 = vsel %vm389_vm0, %v3078_v43, 0.0  ;;  %v2978_v4 = vsel %vm644_vm14, %v2977_v54, %v2973_v21  ;;  %v3303_v21 = vsel %vm3068_vm7, %v4227_v37, 0.0 }
 0xc4b   : > { %v2948_v40 = vpop.permute.xlu1 %2947  ;;  %3091 = vadd.xlane.f32.xlu0 %v3090_v8  ;;  %v6361_v25 = vpop.xlane.xlu0 %3057  ;;  %v3192_v8 = vsel %vm3070_vm8, %v4220_v28, 0.0 }
 0xc4c   : > { %vm3072_vm9 = vcmp.eq.f32.partialorder %v4289_v24, %v6361_v25  ;;  %v2982_v48 = vrot.slane %v2948_v40, %v4682_v45  ;;  %v3204_v44 = vsel %vm389_vm0, %v3192_v8, 0.0 }
 0xc4d   : > { %v3080_v12 = vsel %vm3072_vm9, %v4223_v32, 0.0  ;;  %v3194_v16 = vsel %vm3072_vm9, %v4220_v28, 0.0 }
 0xc4e   : > { %v3096_v35 = vsel %vm389_vm0, %v3080_v12, 0.0  ;;  %v2983_v31 = vsel %vm651_vm15, %v2982_v48, %v2978_v4  ;;  %v3210_v54 = vsel %vm389_vm0, %v3194_v16, 0.0  ;;  %v3311_v4 = vsel %vm389_vm0, %v3303_v21, 0.0 }
 0xc4f   : > { %v2951_v49 = vpop.permute.xlu1 %2950  ;;  %3097 = vadd.xlane.f32.xlu0 %v3096_v35  ;;  %v6375_v20 = vpop.xlane.xlu0 %3063  ;;  %v6532_v21 = vsel %vm3070_vm8, inf, %v6173_v33  ;;  %v6548_v33 = vsel %vm3072_vm9, inf, %v6186_v27 }
 0xc50   : > { %vm3074_vm3 = vcmp.eq.f32.partialorder %v4289_v24, %v6375_v20  ;;  %v2987_v29 = vrot.slane %v2951_v49, %v4687_v17  ;;  %v3436_v46 = vsel %vm389_vm0, %v6548_v33, inf }
 0xc51   : > { %v3082_v7 = vsel %vm3074_vm3, %v4223_v32, 0.0  ;;  %v3196_v59 = vsel %vm3074_vm3, %v4220_v28, 0.0  ;;  %v6564_v27 = vsel %vm3074_vm3, inf, %v6201_v6 }
 0xc52   : > { %v3102_v63 = vsel %vm389_vm0, %v3082_v7, 0.0  ;;  %v2988_v36 = vsel %vm658_vm1, %v2987_v29, %v2983_v31  ;;  %v3216_v29 = vsel %vm389_vm0, %v3196_v59, 0.0  ;;  %v3190_v7 = vsel %vm3068_vm7, %v4220_v28, 0.0 }
 0xc53   : > { %v2954_v19 = vpop.permute.xlu1 %2953  ;;  %3103 = vadd.xlane.f32.xlu0 %v3102_v63  ;;  %v3198_v63 = vsel %vm389_vm0, %v3190_v7, 0.0  ;;  %v3305_v31 = vsel %vm3070_vm8, %v4227_v37, 0.0  ;;  %v3442_v25 = vsel %vm389_vm0, %v6564_v27, inf }
 0xc54   : > { %v2992_v18 = vrot.slane %v2954_v19, %v4694_v23 }
 0xc56   : > { %v2993_v5 = vsel %vm665_vm2, %v2992_v18, %v2988_v36  ;;  %v3317_v36 = vsel %vm389_vm0, %v3305_v31, 0.0 }
 0xc57   : > { %3955 = vst.msk [vmem:[%s4705_s24 + $0x16] sm:$0x1] %vm6891_vm4, %v2993_v5 }
 0xc85   : > { %v6396_v34 = vpop.xlane.xlu1 %3048 }
 0xc86   : > { %vm3069_vm10 = vcmp.eq.f32.partialorder %v4289_v24, %v6396_v34 }
 0xc87   : > { %v3077_v58 = vsel %vm3069_vm10, %v4223_v32, 0.0  ;;  %v3191_v53 = vsel %vm3069_vm10, %v4220_v28, 0.0  ;;  %v6510_v59 = vsel %vm3069_vm10, inf, %v6160_v41  ;;  %v6524_v41 = vsel %vm3068_vm7, inf, %v6195_v26 }
 0xc88   : > { %v3087_v55 = vsel %vm389_vm0, %v3077_v58, 0.0  ;;  %v3201_v57 = vsel %vm389_vm0, %v3191_v53, 0.0  ;;  %v3424_v34 = vsel %vm389_vm0, %v6524_v41, inf }
 0xc89   : > { %3088 = vadd.xlane.f32.xlu1 %v3087_v55  ;;  %v6410_v43 = vpop.xlane.xlu1 %3054  ;;  %3202 = vadd.xlane.f32.xlu0 %v3201_v57 }
 0xc8a   : > { %vm3071_vm5 = vcmp.eq.f32.partialorder %v4289_v24, %v6410_v43 }
 0xc8b   : > { %v3079_v40 = vsel %vm3071_vm5, %v4223_v32, 0.0  ;;  %v3193_v19 = vsel %vm3071_vm5, %v4220_v28, 0.0  ;;  %v3306_v58 = vsel %vm3071_vm5, %v4227_v37, 0.0  ;;  %v6540_v26 = vsel %vm3071_vm5, inf, %v6211_v62 }
 0xc8c   : > { %v3093_v13 = vsel %vm389_vm0, %v3079_v40, 0.0  ;;  %v3207_v18 = vsel %vm389_vm0, %v3193_v19, 0.0  ;;  %v3320_v55 = vsel %vm389_vm0, %v3306_v58, 0.0  ;;  %v3433_v38 = vsel %vm389_vm0, %v6540_v26, inf }
 0xc8d   : > { %3094 = vadd.xlane.f32.xlu1 %v3093_v13  ;;  %v6424_v12 = vpop.xlane.xlu1 %3060  ;;  %3205 = vadd.xlane.f32.xlu0 %v3204_v44  ;;  %v3304_v44 = vsel %vm3069_vm10, %v4227_v37, 0.0 }
 0xc8e   : > { %vm3073_vm6 = vcmp.eq.f32.partialorder %v4289_v24, %v6424_v12 }
 0xc8f   : > { %v3081_v51 = vsel %vm3073_vm6, %v4223_v32, 0.0  ;;  %v3195_v5 = vsel %vm3073_vm6, %v4220_v28, 0.0  ;;  %v3308_v8 = vsel %vm3073_vm6, %v4227_v37, 0.0  ;;  %v6556_v62 = vsel %vm3073_vm6, inf, %v6219_v30 }
 0xc90   : > { %v3099_v35 = vsel %vm389_vm0, %v3081_v51, 0.0  ;;  %v3213_v53 = vsel %vm389_vm0, %v3195_v5, 0.0  ;;  %v3326_v13 = vsel %vm389_vm0, %v3308_v8, 0.0  ;;  %v3314_v51 = vsel %vm389_vm0, %v3304_v44, 0.0 }
 0xc91   : > { %3100 = vadd.xlane.f32.xlu1 %v3099_v35  ;;  %v6438_v49 = vpop.xlane.xlu1 %3066  ;;  %3211 = vadd.xlane.f32.xlu0 %v3210_v54  ;;  %v3307_v54 = vsel %vm3072_vm9, %v4227_v37, 0.0  ;;  %v3439_v43 = vsel %vm389_vm0, %v6556_v62, inf }
 0xc92   : > { %vm3075_vm4 = vcmp.eq.f32.partialorder %v4289_v24, %v6438_v49 }
 0xc93   : > { %v3083_v48 = vsel %vm3075_vm4, %v4223_v32, 0.0  ;;  %v3197_v57 = vsel %vm3075_vm4, %v4220_v28, 0.0  ;;  %v3310_v16 = vsel %vm3075_vm4, %v4227_v37, 0.0  ;;  %v6572_v30 = vsel %vm3075_vm4, inf, %v6227_v3 }
 0xc94   : > { %v3105_v22 = vsel %vm389_vm0, %v3083_v48, 0.0  ;;  %v3219_v40 = vsel %vm389_vm0, %v3197_v57, 0.0  ;;  %v3332_v35 = vsel %vm389_vm0, %v3310_v16, 0.0  ;;  %v3323_v48 = vsel %vm389_vm0, %v3307_v54, 0.0 }
 0xc95   : > { %3106 = vadd.xlane.f32.xlu1 %v3105_v22  ;;  %3217 = vadd.xlane.f32.xlu0 %v3216_v29  ;;  %v3427_v22 = vsel %vm389_vm0, %v6510_v59, inf  ;;  %v3309_v29 = vsel %vm3074_vm3, %v4227_v37, 0.0  ;;  %v3445_v12 = vsel %vm389_vm0, %v6572_v30, inf }
 0xc96   : > { %v3329_v7 = vsel %vm389_vm0, %v3309_v29, 0.0 }
 0xc99   : > { %3199 = vadd.xlane.f32.xlu1 %v3198_v63  ;;  %3312 = vadd.xlane.f32.xlu0 %v3311_v4  ;;  %v3430_v63 = vsel %vm389_vm0, %v6532_v21, inf }
 0xc9d   : > { %3208 = vadd.xlane.f32.xlu1 %v3207_v18  ;;  %3318 = vadd.xlane.f32.xlu0 %v3317_v36 }
 0xca1   : > { %3214 = vadd.xlane.f32.xlu1 %v3213_v53  ;;  %3321 = vadd.xlane.f32.xlu0 %v3320_v55 }
 0xca5   : > { %3220 = vadd.xlane.f32.xlu1 %v3219_v40  ;;  %3327 = vadd.xlane.f32.xlu0 %v3326_v13 }
 0xca9   : > { %3315 = vadd.xlane.f32.xlu1 %v3314_v51  ;;  %3333 = vadd.xlane.f32.xlu0 %v3332_v35 }
 0xcad   : > { %3324 = vadd.xlane.f32.xlu1 %v3323_v48  ;;  %3428 = vmin.xlane.f32.xlu0 %v3427_v22 }
 0xcb1   : > { %3330 = vadd.xlane.f32.xlu1 %v3329_v7 }
 0xcb5   : > { %3425 = vmin.xlane.f32.xlu1 %v3424_v34 }
 0xcb9   : > { %3431 = vmin.xlane.f32.xlu1 %v3430_v63 }
 0xcbd   : > { %3434 = vmin.xlane.f32.xlu1 %v3433_v38 }
 0xcc1   : > { %3437 = vmin.xlane.f32.xlu1 %v3436_v46 }
 0xcc5   : > { %3440 = vmin.xlane.f32.xlu1 %v3439_v43 }
 0xcc9   : > { %3443 = vmin.xlane.f32.xlu1 %v3442_v25 }
 0xccd   : > { %3446 = vmin.xlane.f32.xlu1 %v3445_v12 }
 0xcd4   : > { %v3086_v4 = vpop.xlane.xlu0 %3085 }
 0xcd5   : > { %v3108_v19 = vsub.f32 %v3086_v4, %v6232_v1 }
 0xcd7   : > { %3125 = vperm.xlu0 %4035, %v3108_v19  }
 0xcd8   : > { %v3092_v6 = vpop.xlane.xlu0 %3091 }
 0xcd9   : > { %v3110_v58 = vsub.f32 %v3092_v6, %v6241_v60 }
 0xcdb   : > { %4037 = vset.pattern.permute.xlu0 %v4108_v9 }
 0xcdc   : > { %v3098_v20 = vpop.xlane.xlu0 %3097 }
 0xcdd   : > { %v3112_v40 = vsub.f32 %v3098_v20, %v6249_v52 }
 0xce0   : > { %v3104_v31 = vpop.xlane.xlu0 %3103 }
 0xce1   : > { %v3114_v54 = vsub.f32 %v3104_v31, %v6258_v39 }
 0xd16   : > { %v3089_v18 = vpop.xlane.xlu1 %3088  ;;  %v3203_v36 = vpop.xlane.xlu0 %3202 }
 0xd17   : > { %v3109_v5 = vsub.f32 %v3089_v18, %v6237_v11  ;;  %v3223_v63 = vsub.f32 %v3203_v36, %v6237_v11 }
 0xd19   : > { %3128 = vperm.xlu1 %4036, %v3109_v5  }
 0xd1a   : > { %v3095_v3 = vpop.xlane.xlu1 %3094  ;;  %v3206_v49 = vpop.xlane.xlu0 %3205 }
 0xd1b   : > { %v3111_v55 = vsub.f32 %v3095_v3, %v6245_v15  ;;  %v3224_v43 = vsub.f32 %v3206_v49, %v6241_v60 }
 0xd1d   : > { %3131 = vperm.xlu1 %4036, %v3110_v58  }
 0xd1e   : > { %v3101_v53 = vpop.xlane.xlu1 %3100  ;;  %v3212_v57 = vpop.xlane.xlu0 %3211 }
 0xd1f   : > { %v3113_v16 = vsub.f32 %v3101_v53, %v6253_v50  ;;  %v3226_v31 = vsub.f32 %v3212_v57, %v6249_v52 }
 0xd21   : > { %3134 = vperm.xlu1 %4036, %v3111_v55  }
 0xd22   : > { %v3107_v8 = vpop.xlane.xlu1 %3106  ;;  %v3218_v13 = vpop.xlane.xlu0 %3217 }
 0xd23   : > { %v3115_v29 = vsub.f32 %v3107_v8, %v6264_v47  ;;  %v3228_v36 = vsub.f32 %v3218_v13, %v6258_v39 }
 0xd25   : > { %3137 = vperm.xlu1 %4036, %v3112_v40  }
 0xd26   : > { %v3200_v44 = vpop.xlane.xlu1 %3199  ;;  %v3313_v48 = vpop.xlane.xlu0 %3312 }
 0xd27   : > { %v3222_v51 = vsub.f32 %v3200_v44, %v6232_v1  ;;  %v3335_v49 = vsub.f32 %v3313_v48, %v6232_v1 }
 0xd29   : > { %3239 = vperm.xlu0 %4037, %v3222_v51   ;;  %3140 = vperm.xlu1 %4036, %v3113_v16  }
 0xd2a   : > { %v3209_v35 = vpop.xlane.xlu1 %3208  ;;  %v3319_v7 = vpop.xlane.xlu0 %3318 }
 0xd2b   : > { %v3225_v19 = vsub.f32 %v3209_v35, %v6245_v15  ;;  %v3337_v53 = vsub.f32 %v3319_v7, %v6241_v60 }
 0xd2d   : > { %3143 = vperm.xlu1 %4036, %v3114_v54   ;;  %4040 = vset.pattern.permute.xlu0 %v4109_v10 }
 0xd2e   : > { %v3215_v22 = vpop.xlane.xlu1 %3214  ;;  %v3322_v25 = vpop.xlane.xlu0 %3321 }
 0xd2f   : > { %v3338_v4 = vsub.f32 %v3322_v25, %v6245_v15 }
 0xd31   : > { %3146 = vperm.xlu1 %4036, %v3115_v29  }
 0xd32   : > { %v3221_v34 = vpop.xlane.xlu1 %3220  ;;  %v3328_v55 = vpop.xlane.xlu0 %3327 }
 0xd33   : > { %v3229_v15 = vsub.f32 %v3221_v34, %v6264_v47  ;;  %v3340_v40 = vsub.f32 %v3328_v55, %v6253_v50 }
 0xd35   : > { %4038 = vset.pattern.permute.xlu1 %v4108_v9 }
 0xd36   : > { %v3316_v38 = vpop.xlane.xlu1 %3315  ;;  %3242 = vperm.xlu1 %4038, %v3223_v63   ;;  %v3334_v1 = vpop.xlane.xlu0 %3333 }
 0xd37   : > { %v3336_v46 = vsub.f32 %v3316_v38, %v6237_v11  ;;  %v3227_v11 = vsub.f32 %v3215_v22, %v6253_v50 }
 0xd39   : > { %3355 = vperm.xlu0 %4040, %v3336_v46  }
 0xd3a   : > { %v3325_v12 = vpop.xlane.xlu1 %3324  ;;  %3245 = vperm.xlu1 %4038, %v3224_v43   ;;  %v3429_v54 = vpop.xlane.xlu0 %3428 }
 0xd3b   : > { %v3339_v57 = vsub.f32 %v3325_v12, %v6249_v52  ;;  %v3342_v52 = vsub.f32 %v3334_v1, %v6264_v47  ;;  %vm3449_vm5 = vcmp.eq.f32.partialorder %v6510_v59, %v3429_v54 }
 0xd3d   : > { %3361 = vperm.xlu0 %4040, %v3338_v4  }
 0xd3e   : > { %v3331_v6 = vpop.xlane.xlu1 %3330  ;;  %3248 = vperm.xlu1 %4038, %v3225_v19  }
 0xd3f   : > { %v3341_v20 = vsub.f32 %v3331_v6, %v6258_v39 }
 0xd41   : > { %3370 = vperm.xlu0 %4040, %v3341_v20  }
 0xd42   : > { %v3426_v18 = vpop.xlane.xlu1 %3425  ;;  %3251 = vperm.xlu1 %4038, %v3226_v31  }
 0xd43   : > { %vm3448_vm7 = vcmp.eq.f32.partialorder %v6524_v41, %v3426_v18 }
 0xd44   : > { %v3456_v8 = vsel %vm3448_vm7, %v4289_v24, 64.0  ;;  %vm6892_vm7 = vcmask 516096  }
 0xd45   : > { %4042 = vset.pattern.permute.xlu0 %v4107_v0  ;;  %v3464_v13 = vsel %vm389_vm0, %v3456_v8, inf }
 0xd46   : > { %3254 = vperm.xlu1 %4038, %v3227_v11   ;;  %v3432_v5 = vpop.xlane.xlu1 %3431 }
 0xd47   : > { %vm3450_vm8 = vcmp.eq.f32.partialorder %v6532_v21, %v3432_v5 }
 0xd48   : > { %v3458_v60 = vsel %vm3450_vm8, %v4289_v24, 64.0  ;;  %vm6893_vm8 = vmmov %vm6892_vm7 }
 0xd49   : > { %v3470_v41 = vsel %vm389_vm0, %v3458_v60, inf }
 0xd4a   : > { %3257 = vperm.xlu1 %4038, %v3228_v36   ;;  %v3435_v3 = vpop.xlane.xlu1 %3434 }
 0xd4b   : > { %vm3451_vm9 = vcmp.eq.f32.partialorder %v6540_v26, %v3435_v3 }
 0xd4c   : > { %v3459_v50 = vsel %vm3451_vm9, %v4289_v24, 64.0  ;;  %vm6894_vm9 = vmmov %vm6892_vm7 }
 0xd4d   : > { %v3473_v16 = vsel %vm389_vm0, %v3459_v50, inf }
 0xd4e   : > { %3260 = vperm.xlu1 %4038, %v3229_v15   ;;  %v3438_v58 = vpop.xlane.xlu1 %3437 }
 0xd4f   : > { %vm3452_vm6 = vcmp.eq.f32.partialorder %v6548_v33, %v3438_v58 }
 0xd52   : > { %4039 = vset.pattern.permute.xlu1 %v4109_v10  ;;  %v3441_v39 = vpop.xlane.xlu1 %3440 }
 0xd53   : > { %3352 = vperm.xlu1 %4039, %v3335_v49   ;;  %vm3453_vm3 = vcmp.eq.f32.partialorder %v6556_v62, %v3441_v39  ;;  %v3457_v62 = vsel %vm3449_vm5, %v4289_v24, 64.0 }
 0xd54   : > { %v3461_v51 = vsel %vm3453_vm3, %v4289_v24, 64.0  ;;  %v3467_v48 = vsel %vm389_vm0, %v3457_v62, inf }
 0xd55   : > { %v3479_v47 = vsel %vm389_vm0, %v3461_v51, inf }
 0xd56   : > { %v3444_v44 = vpop.xlane.xlu1 %3443  ;;  %v3126_v33 = vpop.permute.xlu0 %3125 }
 0xd57   : > { %3358 = vperm.xlu1 %4039, %v3337_v53   ;;  %vm3454_vm4 = vcmp.eq.f32.partialorder %v6564_v27, %v3444_v44  ;;  %v3151_v27 = vrot.slane %v3126_v33, %v4663_v42 }
 0xd58   : > { %v3462_v29 = vsel %vm3454_vm4, %v4289_v24, 64.0 }
 0xd59   : > { %v3482_v7 = vsel %vm389_vm0, %v3462_v29, inf }
 0xd5a   : > { %v3447_v21 = vpop.xlane.xlu1 %3446 }
 0xd5b   : > { %3364 = vperm.xlu1 %4039, %v3339_v57   ;;  %vm3455_vm10 = vcmp.eq.f32.partialorder %v6572_v30, %v3447_v21  ;;  %v3460_v30 = vsel %vm3452_vm6, %v4289_v24, 64.0 }
 0xd5c   : > { %v3463_v26 = vsel %vm3455_vm10, %v4289_v24, 64.0  ;;  %v3476_v22 = vsel %vm389_vm0, %v3460_v30, inf }
 0xd5d   : > { %v3485_v35 = vsel %vm389_vm0, %v3463_v26, inf }
 0xd5f   : > { %3367 = vperm.xlu1 %4039, %v3340_v40  }
 0xd60   : > { %3465 = vmin.xlane.f32.xlu0 %v3464_v13 }
 0xd63   : > { %3373 = vperm.xlu1 %4039, %v3342_v52  }
 0xd64   : > { %3471 = vmin.xlane.f32.xlu0 %v3470_v41 }
 0xd67   : > { %4041 = vset.pattern.permute.xlu1 %v4107_v0 }
 0xd68   : > { %3474 = vmin.xlane.f32.xlu0 %v3473_v16 }
 0xd6c   : > { %3480 = vmin.xlane.f32.xlu0 %v3479_v47 }
 0xd70   : > { %3486 = vmin.xlane.f32.xlu0 %v3485_v35 }
 0xd87   : > { %3468 = vmin.xlane.f32.xlu1 %v3467_v48 }
 0xd8b   : > { %3477 = vmin.xlane.f32.xlu1 %v3476_v22 }
 0xd8f   : > { %3483 = vmin.xlane.f32.xlu1 %v3482_v7 }
 0xd98   : > { %v3129_v59 = vpop.permute.xlu1 %3128 }
 0xd99   : > { %v3155_v43 = vrot.slane %v3129_v59, %v4666_v56 }
 0xd9b   : > { %v3156_v6 = vsel %vm623_vm11, %v3155_v43, %v3151_v27 }
 0xd9c   : > { %v3132_v34 = vpop.permute.xlu1 %3131 }
 0xd9d   : > { %v3160_v25 = vrot.slane %v3132_v34, %v4670_v2 }
 0xd9f   : > { %v3161_v31 = vsel %vm630_vm12, %v3160_v25, %v3156_v6 }
 0xda0   : > { %v3135_v63 = vpop.permute.xlu1 %3134 }
 0xda1   : > { %v3165_v12 = vrot.slane %v3135_v63, %v4674_v14 }
 0xda3   : > { %v3166_v11 = vsel %vm637_vm13, %v3165_v12, %v3161_v31 }
 0xda4   : > { %v3138_v38 = vpop.permute.xlu1 %3137 }
 0xda5   : > { %v3170_v4 = vrot.slane %v3138_v38, %v4677_v61 }
 0xda7   : > { %v3171_v36 = vsel %vm644_vm14, %v3170_v4, %v3166_v11 }
 0xda8   : > { %v3141_v46 = vpop.permute.xlu1 %3140  ;;  %v3240_v8 = vpop.permute.xlu0 %3239 }
 0xda9   : > { %v3175_v20 = vrot.slane %v3141_v46, %v4682_v45  ;;  %v3265_v44 = vrot.slane %v3240_v8, %v4663_v42 }
 0xdab   : > { %v3176_v15 = vsel %vm651_vm15, %v3175_v20, %v3171_v36 }
 0xdac   : > { %v3144_v19 = vpop.permute.xlu1 %3143 }
 0xdad   : > { %v3180_v18 = vrot.slane %v3144_v19, %v4687_v17 }
 0xdaf   : > { %v3181_v49 = vsel %vm658_vm1, %v3180_v18, %v3176_v15 }
 0xdb0   : > { %v3147_v5 = vpop.permute.xlu1 %3146 }
 0xdb1   : > { %v3185_v3 = vrot.slane %v3147_v5, %v4694_v23 }
 0xdb3   : > { %v3186_v58 = vsel %vm665_vm2, %v3185_v3, %v3181_v49 }
 0xdb4   : > { %3956 = vst.msk [vmem:[%s4705_s24 + $0x18] sm:$0x1] %vm6892_vm7, %v3186_v58 }
 0xdb5   : > { %v3243_v53 = vpop.permute.xlu1 %3242 }
 0xdb6   : > { %v3269_v1 = vrot.slane %v3243_v53, %v4666_v56 }
 0xdb8   : > { %v3270_v50 = vsel %vm623_vm11, %v3269_v1, %v3265_v44  ;;  %v3356_v29 = vpop.permute.xlu0 %3355 }
 0xdb9   : > { %v3246_v55 = vpop.permute.xlu1 %3245  ;;  %v3382_v63 = vrot.slane %v3356_v29, %v4666_v56 }
 0xdba   : > { %v3274_v13 = vrot.slane %v3246_v55, %v4670_v2 }
 0xdbc   : > { %v3275_v16 = vsel %vm630_vm12, %v3274_v13, %v3270_v50  ;;  %v3362_v38 = vpop.permute.xlu0 %3361 }
 0xdbd   : > { %v3249_v57 = vpop.permute.xlu1 %3248  ;;  %v3392_v27 = vrot.slane %v3362_v38, %v4674_v14 }
 0xdbe   : > { %v3279_v60 = vrot.slane %v3249_v57, %v4674_v14 }
 0xdc0   : > { %v3280_v47 = vsel %vm637_vm13, %v3279_v60, %v3275_v16  ;;  %v3371_v4 = vpop.permute.xlu0 %3370 }
 0xdc1   : > { %v3252_v39 = vpop.permute.xlu1 %3251  ;;  %v3407_v18 = vrot.slane %v3371_v4, %v4687_v17 }
 0xdc2   : > { %v3284_v52 = vrot.slane %v3252_v39, %v4677_v61 }
 0xdc4   : > { %v3285_v26 = vsel %vm644_vm14, %v3284_v52, %v3280_v47 }
 0xdc5   : > { %v3255_v40 = vpop.permute.xlu1 %3254 }
 0xdc6   : > { %v3289_v21 = vrot.slane %v3255_v40, %v4682_v45 }
 0xdc8   : > { %v3290_v54 = vsel %vm651_vm15, %v3289_v21, %v3285_v26 }
 0xdc9   : > { %v3258_v41 = vpop.permute.xlu1 %3257 }
 0xdca   : > { %v3294_v51 = vrot.slane %v3258_v41, %v4687_v17 }
 0xdcc   : > { %v3295_v48 = vsel %vm658_vm1, %v3294_v51, %v3290_v54 }
 0xdcd   : > { %v3261_v35 = vpop.permute.xlu1 %3260 }
 0xdce   : > { %v3299_v62 = vrot.slane %v3261_v35, %v4694_v23 }
 0xdd0   : > { %v3300_v30 = vsel %vm665_vm2, %v3299_v62, %v3295_v48 }
 0xdd1   : > { %3957 = vst.msk [vmem:[%s4705_s24 + $0x19] sm:$0x1] %vm6893_vm8, %v3300_v30 }
 0xdd2   : > { %v3353_v22 = vpop.permute.xlu1 %3352 }
 0xdd3   : > { %v3378_v59 = vrot.slane %v3353_v22, %v4663_v42 }
 0xdd5   : > { %v3383_v46 = vsel %vm623_vm11, %v3382_v63, %v3378_v59 }
 0xdd6   : > { %v3359_v7 = vpop.permute.xlu1 %3358 }
 0xdd7   : > { %v3387_v34 = vrot.slane %v3359_v7, %v4670_v2 }
 0xdd9   : > { %v3388_v43 = vsel %vm630_vm12, %v3387_v34, %v3383_v46 }
 0xdda   : > { %v3365_v33 = vpop.permute.xlu1 %3364  ;;  %v3393_v19 = vsel %vm637_vm13, %v3392_v27, %v3388_v43 }
 0xddb   : > { %v3397_v25 = vrot.slane %v3365_v33, %v4677_v61 }
 0xddd   : > { %v3398_v20 = vsel %vm644_vm14, %v3397_v25, %v3393_v19 }
 0xdde   : > { %v3368_v12 = vpop.permute.xlu1 %3367 }
 0xddf   : > { %v3402_v6 = vrot.slane %v3368_v12, %v4682_v45 }
 0xde1   : > { %v3403_v31 = vsel %vm651_vm15, %v3402_v6, %v3398_v20 }
 0xde2   : > { %v3374_v11 = vpop.permute.xlu1 %3373  ;;  %v3408_v5 = vsel %vm658_vm1, %v3407_v18, %v3403_v31 }
 0xde3   : > { %v3412_v36 = vrot.slane %v3374_v11, %v4694_v23 }
 0xde5   : > { %v3413_v15 = vsel %vm665_vm2, %v3412_v36, %v3408_v5 }
 0xde6   : > { %3958 = vst.msk [vmem:[%s4705_s24 + $0x1a] sm:$0x1] %vm6894_vm9, %v3413_v15 }
 0xded   : > { %v3466_v3 = vpop.xlane.xlu0 %3465 }
 0xdee   : > { %vm3488_vm3 = vcmp.eq.f32.partialorder %v4289_v24, %v3466_v3 }
 0xdef   : > { %v3496_v49 = vsel %vm3488_vm3, %v4223_v32, 0.0  ;;  %v3610_v54 = vsel %vm3488_vm3, %v4220_v28, 0.0  ;;  %v3723_v22 = vsel %vm3488_vm3, %v4227_v37, 0.0 }
 0xdf0   : > { %v3504_v58 = vsel %vm389_vm0, %v3496_v49, 0.0  ;;  %v3618_v48 = vsel %vm389_vm0, %v3610_v54, 0.0  ;;  %v3731_v7 = vsel %vm389_vm0, %v3723_v22, 0.0 }
 0xdf1   : > { %3505 = vadd.xlane.f32.xlu1 %v3504_v58  ;;  %v3472_v53 = vpop.xlane.xlu0 %3471 }
 0xdf2   : > { %vm3490_vm10 = vcmp.eq.f32.partialorder %v4289_v24, %v3472_v53 }
 0xdf3   : > { %v3498_v55 = vsel %vm3490_vm10, %v4223_v32, 0.0  ;;  %v3612_v33 = vsel %vm3490_vm10, %v4220_v28, 0.0  ;;  %v3725_v27 = vsel %vm3490_vm10, %v4227_v37, 0.0 }
 0xdf4   : > { %v3510_v57 = vsel %vm389_vm0, %v3498_v55, 0.0  ;;  %v3624_v43 = vsel %vm389_vm0, %v3612_v33, 0.0  ;;  %v3737_v4 = vsel %vm389_vm0, %v3725_v27, 0.0 }
 0xdf5   : > { %3511 = vadd.xlane.f32.xlu1 %v3510_v57  ;;  %v3475_v39 = vpop.xlane.xlu0 %3474 }
 0xdf6   : > { %vm3491_vm5 = vcmp.eq.f32.partialorder %v4289_v24, %v3475_v39  ;;  %v4075_v39 = vld [vmem:[%s4151_s16] sm:$0xff] }
 0xdf7   : > { %v3499_v60 = vsel %vm3491_vm5, %v4223_v32, 0.0  ;;  %v3726_v34 = vsel %vm3491_vm5, %v4227_v37, 0.0  ;;  %v3613_v6 = vsel %vm3491_vm5, %v4220_v28, 0.0 }
 0xdf8   : > { %v3513_v21 = vsel %vm389_vm0, %v3499_v60, 0.0  ;;  %v3740_v38 = vsel %vm389_vm0, %v3726_v34, 0.0  ;;  %v3627_v31 = vsel %vm389_vm0, %v3613_v6, 0.0  ;;  %v4077_v60 = vld [vmem:[%s4151_s16 + $0x8] sm:$0xff] }
 0xdf9   : > { %v6691_v8 = vpop.xlane.xlu0 %3480 }
 0xdfa   : > { %vm3493_vm4 = vcmp.eq.f32.partialorder %v4289_v24, %v6691_v8 }
 0xdfb   : > { %v3501_v51 = vsel %vm3493_vm4, %v4223_v32, 0.0  ;;  %v3728_v12 = vsel %vm3493_vm4, %v4227_v37, 0.0  ;;  %v3615_v3 = vsel %vm3493_vm4, %v4220_v28, 0.0 }
 0xdfc   : > { %v3519_v35 = vsel %vm389_vm0, %v3501_v51, 0.0  ;;  %v3746_v19 = vsel %vm389_vm0, %v3728_v12, 0.0  ;;  %v3633_v49 = vsel %vm389_vm0, %v3615_v3, 0.0 }
 0xdfd   : > { %v6705_v52 = vpop.xlane.xlu0 %3486 }
 0xdfe   : > { %vm3495_vm8 = vcmp.eq.f32.partialorder %v4289_v24, %v6705_v52  ;;  %v4078_v52 = vld [vmem:[%s4151_s16 + $0x20] sm:$0xff] }
 0xdff   : > { %v3503_v62 = vsel %vm3495_vm8, %v4223_v32, 0.0  ;;  %v3730_v36 = vsel %vm3495_vm8, %v4227_v37, 0.0  ;;  %v3617_v53 = vsel %vm3495_vm8, %v4220_v28, 0.0 }
 0xe00   : > { %v3525_v30 = vsel %vm389_vm0, %v3503_v62, 0.0  ;;  %v3752_v15 = vsel %vm389_vm0, %v3730_v36, 0.0  ;;  %v3639_v55 = vsel %vm389_vm0, %v3617_v53, 0.0 }
 0xe14   : > { %v3469_v40 = vpop.xlane.xlu1 %3468 }
 0xe15   : > { %vm3489_vm6 = vcmp.eq.f32.partialorder %v4289_v24, %v3469_v40 }
 0xe16   : > { %v3497_v1 = vsel %vm3489_vm6, %v4223_v32, 0.0  ;;  %v3611_v29 = vsel %vm3489_vm6, %v4220_v28, 0.0 }
 0xe17   : > { %v3507_v13 = vsel %vm389_vm0, %v3497_v1, 0.0  ;;  %v3621_v59 = vsel %vm389_vm0, %v3611_v29, 0.0  ;;  %v4076_v1 = vld [vmem:[%s4151_s16 + $0x10] sm:$0xff] }
 0xe18   : > { %3508 = vadd.xlane.f32.xlu0 %v3507_v13  ;;  %v3478_v44 = vpop.xlane.xlu1 %3477 }
 0xe19   : > { %vm3492_vm7 = vcmp.eq.f32.partialorder %v4289_v24, %v3478_v44 }
 0xe1a   : > { %v3500_v41 = vsel %vm3492_vm7, %v4223_v32, 0.0  ;;  %v3727_v46 = vsel %vm3492_vm7, %v4227_v37, 0.0  ;;  %v3614_v11 = vsel %vm3492_vm7, %v4220_v28, 0.0 }
 0xe1b   : > { %v3516_v50 = vsel %vm389_vm0, %v3500_v41, 0.0  ;;  %v3743_v25 = vsel %vm389_vm0, %v3727_v46, 0.0  ;;  %v3630_v5 = vsel %vm389_vm0, %v3614_v11, 0.0 }
 0xe1c   : > { %v3484_v16 = vpop.xlane.xlu1 %3483  ;;  %3517 = vadd.xlane.f32.xlu1 %v3516_v50  ;;  %3514 = vadd.xlane.f32.xlu0 %v3513_v21  ;;  %v4079_v21 = vld [vmem:[%s4151_s16 + $0x18] sm:$0xff] }
 0xe1d   : > { %vm3494_vm9 = vcmp.eq.f32.partialorder %v4289_v24, %v3484_v16 }
 0xe1e   : > { %v3502_v47 = vsel %vm3494_vm9, %v4223_v32, 0.0  ;;  %v3724_v32 = vsel %vm3489_vm6, %v4227_v37, 0.0  ;;  %v3729_v20 = vsel %vm3494_vm9, %v4227_v37, 0.0  ;;  %v3616_v37 = vsel %vm3494_vm9, %v4220_v28, 0.0 }
 0xe1f   : > { %v3522_v26 = vsel %vm389_vm0, %v3502_v47, 0.0  ;;  %v3734_v63 = vsel %vm389_vm0, %v3724_v32, 0.0  ;;  %v3749_v18 = vsel %vm389_vm0, %v3729_v20, 0.0  ;;  %v3636_v58 = vsel %vm389_vm0, %v3616_v37, 0.0  ;;  %v4082_v37 = vld [vmem:[%s4151_s16 + $0x38] sm:$0xff] }
 0xe20   : > { %3523 = vadd.xlane.f32.xlu1 %v3522_v26  ;;  %3520 = vadd.xlane.f32.xlu0 %v3519_v35  ;;  %v4080_v26 = vld [vmem:[%s4151_s16 + $0x28] sm:$0xff]  ;;  %vm6895_vm0 = vcmask 516096  }
 0xe24   : > { %3619 = vadd.xlane.f32.xlu1 %v3618_v48  ;;  %3526 = vadd.xlane.f32.xlu0 %v3525_v30 }
 0xe28   : > { %3732 = vadd.xlane.f32.xlu1 %v3731_v7  ;;  %3622 = vadd.xlane.f32.xlu0 %v3621_v59 }
 0xe2c   : > { %3735 = vadd.xlane.f32.xlu1 %v3734_v63  ;;  %3741 = vadd.xlane.f32.xlu0 %v3740_v38 }
 0xe30   : > { %3625 = vadd.xlane.f32.xlu1 %v3624_v43  ;;  %3744 = vadd.xlane.f32.xlu0 %v3743_v25 }
 0xe34   : > { %3738 = vadd.xlane.f32.xlu1 %v3737_v4  ;;  %3747 = vadd.xlane.f32.xlu0 %v3746_v19 }
 0xe38   : > { %3628 = vadd.xlane.f32.xlu1 %v3627_v31  ;;  %3750 = vadd.xlane.f32.xlu0 %v3749_v18 }
 0xe3c   : > { %3631 = vadd.xlane.f32.xlu1 %v3630_v5  ;;  %3753 = vadd.xlane.f32.xlu0 %v3752_v15  ;;  %v4081_v5 = vld [vmem:[%s4151_s16 + $0x30] sm:$0xff] }
 0xe40   : > { %3634 = vadd.xlane.f32.xlu1 %v3633_v49 }
 0xe44   : > { %3637 = vadd.xlane.f32.xlu1 %v3636_v58 }
 0xe48   : > { %3640 = vadd.xlane.f32.xlu1 %v3639_v55 }
 0xe7e   : > { %v3506_v57 = vpop.xlane.xlu1 %3505 }
 0xe7f   : > { %v3528_v8 = vsub.f32 %v3506_v57, %v4075_v39 }
 0xe81   : > { %3545 = vperm.xlu1 %4041, %v3528_v8  }
 0xe82   : > { %v3512_v40 = vpop.xlane.xlu1 %3511 }
 0xe83   : > { %v3530_v13 = vsub.f32 %v3512_v40, %v4076_v1 }
 0xe85   : > { %3551 = vperm.xlu1 %4041, %v3530_v13  }
 0xea5   : > { %v3509_v44 = vpop.xlane.xlu0 %3508 }
 0xea6   : > { %v3529_v41 = vsub.f32 %v3509_v44, %v4077_v60 }
 0xea8   : > { %3548 = vperm.xlu0 %4042, %v3529_v41  }
 0xea9   : > { %v3518_v24 = vpop.xlane.xlu1 %3517  ;;  %v3515_v28 = vpop.xlane.xlu0 %3514 }
 0xeaa   : > { %v3532_v50 = vsub.f32 %v3518_v24, %v4078_v52  ;;  %v3531_v16 = vsub.f32 %v3515_v28, %v4079_v21 }
 0xeac   : > { %3557 = vperm.xlu0 %4042, %v3532_v50   ;;  %3554 = vperm.xlu1 %4041, %v3531_v16  }
 0xead   : > { %v3524_v51 = vpop.xlane.xlu1 %3523  ;;  %v3521_v47 = vpop.xlane.xlu0 %3520 }
 0xeae   : > { %v3533_v35 = vsub.f32 %v3521_v47, %v4080_v26  ;;  %v3534_v3 = vsub.f32 %v3524_v51, %v4081_v5 }
 0xeb0   : > { %3560 = vperm.xlu1 %4041, %v3533_v35   ;;  %4044 = vset.pattern.permute.xlu0 %v4108_v9 }
 0xeb1   : > { %v3620_v54 = vpop.xlane.xlu1 %3619  ;;  %v3527_v62 = vpop.xlane.xlu0 %3526 }
 0xeb2   : > { %v3642_v48 = vsub.f32 %v3620_v54, %v4075_v39  ;;  %v3535_v58 = vsub.f32 %v3527_v62, %v4082_v37 }
 0xeb4   : > { %4043 = vset.pattern.permute.xlu1 %v4108_v9 }
 0xeb5   : > { %v3733_v30 = vpop.xlane.xlu1 %3732  ;;  %3659 = vperm.xlu1 %4043, %v3642_v48   ;;  %v3623_v22 = vpop.xlane.xlu0 %3622 }
 0xeb6   : > { %v3643_v29 = vsub.f32 %v3623_v22, %v4077_v60  ;;  %v3755_v7 = vsub.f32 %v3733_v30, %v4075_v39 }
 0xeb8   : > { %3662 = vperm.xlu0 %4044, %v3643_v29  }
 0xeb9   : > { %v3736_v59 = vpop.xlane.xlu1 %3735  ;;  %4045 = vset.pattern.permute.xlu1 %v4109_v10  ;;  %v3742_v38 = vpop.xlane.xlu0 %3741 }
 0xeba   : > { %3772 = vperm.xlu1 %4045, %v3755_v7   ;;  %v3756_v32 = vsub.f32 %v3736_v59, %v4077_v60  ;;  %v3758_v27 = vsub.f32 %v3742_v38, %v4079_v21 }
 0xebd   : > { %v3626_v34 = vpop.xlane.xlu1 %3625  ;;  %v3745_v43 = vpop.xlane.xlu0 %3744 }
 0xebe   : > { %v3644_v63 = vsub.f32 %v3626_v34, %v4076_v1  ;;  %3775 = vperm.xlu1 %4045, %v3756_v32   ;;  %v3759_v19 = vsub.f32 %v3745_v43, %v4078_v52 }
 0xec0   : > { %3665 = vperm.xlu0 %4044, %v3644_v63  }
 0xec1   : > { %v3739_v33 = vpop.xlane.xlu1 %3738  ;;  %v3748_v20 = vpop.xlane.xlu0 %3747 }
 0xec2   : > { %v3757_v46 = vsub.f32 %v3739_v33, %v4076_v1  ;;  %v3760_v18 = vsub.f32 %v3748_v20, %v4080_v26 }
 0xec4   : > { %3778 = vperm.xlu1 %4045, %v3757_v46  }
 0xec5   : > { %v3629_v25 = vpop.xlane.xlu1 %3628  ;;  %v3751_v49 = vpop.xlane.xlu0 %3750 }
 0xec6   : > { %v3645_v12 = vsub.f32 %v3629_v25, %v4079_v21  ;;  %v3761_v53 = vsub.f32 %v3751_v49, %v4081_v5 }
 0xec8   : > { %3668 = vperm.xlu0 %4044, %v3645_v12   ;;  %3781 = vperm.xlu1 %4045, %v3758_v27  }
 0xec9   : > { %v3632_v4 = vpop.xlane.xlu1 %3631  ;;  %v3754_v55 = vpop.xlane.xlu0 %3753 }
 0xeca   : > { %v3646_v6 = vsub.f32 %v3632_v4, %v4078_v52  ;;  %v3762_v39 = vsub.f32 %v3754_v55, %v4082_v37 }
 0xecc   : > { %3671 = vperm.xlu0 %4044, %v3646_v6   ;;  %3784 = vperm.xlu1 %4045, %v3759_v19  }
 0xecd   : > { %v3635_v31 = vpop.xlane.xlu1 %3634 }
 0xece   : > { %v3647_v11 = vsub.f32 %v3635_v31, %v4080_v26 }
 0xed0   : > { %3674 = vperm.xlu0 %4044, %v3647_v11   ;;  %3787 = vperm.xlu1 %4045, %v3760_v18  }
 0xed1   : > { %v3638_v36 = vpop.xlane.xlu1 %3637 }
 0xed2   : > { %v3648_v15 = vsub.f32 %v3638_v36, %v4081_v5 }
 0xed4   : > { %4046 = vset.pattern.permute.xlu0 %v4107_v0  ;;  %4047 = vset.pattern.permute.xlu1 %v4108_v9 }
 0xed5   : > { %3563 = vperm.xlu0 %4046, %v3534_v3   ;;  %3677 = vperm.xlu1 %4047, %v3648_v15   ;;  %v3641_v57 = vpop.xlane.xlu1 %3640 }
 0xed6   : > { %v3649_v8 = vsub.f32 %v3641_v57, %v4082_v37 }
 0xed9   : > { %3566 = vperm.xlu0 %4046, %v3535_v58   ;;  %4048 = vset.pattern.permute.xlu1 %v4109_v10 }
 0xeda   : > { %3790 = vperm.xlu1 %4048, %v3761_v53  }
 0xedd   : > { %4050 = vset.pattern.permute.xlu0 %v4109_v10 }
 0xede   : > { %4049 = vset.pattern.permute.xlu1 %v4108_v9  ;;  %3793 = vperm.xlu0 %4050, %v3762_v39  }
 0xedf   : > { %3680 = vperm.xlu1 %4049, %v3649_v8  }
 0xf00   : > { %v3546_v0 = vpop.permute.xlu1 %3545 }
 0xf01   : > { %v3571_v26 = vrot.slane %v3546_v0, %v4663_v42 }
 0xf04   : > { %v3552_v40 = vpop.permute.xlu1 %3551 }
 0xf05   : > { %v3580_v30 = vrot.slane %v3552_v40, %v4670_v2 }
 0xf27   : > { %v3549_v60 = vpop.permute.xlu0 %3548 }
 0xf28   : > { %v3575_v9 = vrot.slane %v3549_v60, %v4666_v56 }
 0xf2a   : > { %v3576_v62 = vsel %vm623_vm11, %v3575_v9, %v3571_v26 }
 0xf2b   : > { %v3555_v1 = vpop.permute.xlu1 %3554  ;;  %v3558_v24 = vpop.permute.xlu0 %3557  ;;  %v3581_v22 = vsel %vm630_vm12, %v3580_v30, %v3576_v62 }
 0xf2c   : > { %v3585_v48 = vrot.slane %v3555_v1, %v4674_v14  ;;  %v3590_v29 = vrot.slane %v3558_v24, %v4677_v61 }
 0xf2e   : > { %v3586_v7 = vsel %vm637_vm13, %v3585_v48, %v3581_v22 }
 0xf2f   : > { %v3561_v13 = vpop.permute.xlu1 %3560  ;;  %v3591_v46 = vsel %vm644_vm14, %v3590_v29, %v3586_v7 }
 0xf30   : > { %v3595_v59 = vrot.slane %v3561_v13, %v4682_v45 }
 0xf32   : > { %v3596_v27 = vsel %vm651_vm15, %v3595_v59, %v3591_v46 }
 0xf34   : > { %v3660_v44 = vpop.permute.xlu1 %3659 }
 0xf35   : > { %v3685_v43 = vrot.slane %v3660_v44, %v4663_v42 }
 0xf37   : > { %v3663_v28 = vpop.permute.xlu0 %3662 }
 0xf38   : > { %v3689_v63 = vrot.slane %v3663_v28, %v4666_v56 }
 0xf39   : > { %v3773_v41 = vpop.permute.xlu1 %3772 }
 0xf3a   : > { %v3798_v12 = vrot.slane %v3773_v41, %v4663_v42  ;;  %v3690_v20 = vsel %vm623_vm11, %v3689_v63, %v3685_v43 }
 0xf3d   : > { %v3776_v52 = vpop.permute.xlu1 %3775 }
 0xf3e   : > { %v3802_v38 = vrot.slane %v3776_v52, %v4666_v56 }
 0xf3f   : > { %v3666_v50 = vpop.permute.xlu0 %3665 }
 0xf40   : > { %v3694_v4 = vrot.slane %v3666_v50, %v4670_v2  ;;  %v3803_v36 = vsel %vm623_vm11, %v3802_v38, %v3798_v12  ;;  %vm6896_vm11 = vmmov %vm6895_vm0 }
 0xf42   : > { %v3695_v37 = vsel %vm630_vm12, %v3694_v4, %v3690_v20 }
 0xf43   : > { %v3779_v21 = vpop.permute.xlu1 %3778 }
 0xf44   : > { %v3807_v25 = vrot.slane %v3779_v21, %v4670_v2 }
 0xf46   : > { %v3808_v15 = vsel %vm630_vm12, %v3807_v25, %v3803_v36  ;;  %vm6897_vm12 = vmmov %vm6895_vm0 }
 0xf47   : > { %v3782_v16 = vpop.permute.xlu1 %3781  ;;  %v3669_v51 = vpop.permute.xlu0 %3668 }
 0xf48   : > { %v3812_v19 = vrot.slane %v3782_v16, %v4674_v14  ;;  %v3699_v56 = vrot.slane %v3669_v51, %v4674_v14 }
 0xf4a   : > { %v3813_v58 = vsel %vm637_vm13, %v3812_v19, %v3808_v15 }
 0xf4b   : > { %v3785_v47 = vpop.permute.xlu1 %3784  ;;  %v3672_v10 = vpop.permute.xlu0 %3671 }
 0xf4c   : > { %v3817_v31 = vrot.slane %v3785_v47, %v4677_v61  ;;  %v3704_v5 = vrot.slane %v3672_v10, %v4677_v61  ;;  %v3700_v61 = vsel %vm637_vm13, %v3699_v56, %v3695_v37 }
 0xf4e   : > { %v3818_v55 = vsel %vm644_vm14, %v3817_v31, %v3813_v58 }
 0xf4f   : > { %v3788_v35 = vpop.permute.xlu1 %3787  ;;  %v3675_v54 = vpop.permute.xlu0 %3674 }
 0xf50   : > { %v3822_v42 = vrot.slane %v3788_v35, %v4682_v45  ;;  %v3709_v3 = vrot.slane %v3675_v54, %v4682_v45  ;;  %v3705_v45 = vsel %vm644_vm14, %v3704_v5, %v3700_v61 }
 0xf52   : > { %v3823_v39 = vsel %vm651_vm15, %v3822_v42, %v3818_v55  ;;  %v3710_v40 = vsel %vm651_vm15, %v3709_v3, %v3705_v45 }
 0xf54   : > { %v3678_v32 = vpop.permute.xlu1 %3677  ;;  %v3564_v34 = vpop.permute.xlu0 %3563 }
 0xf55   : > { %v3600_v33 = vrot.slane %v3564_v34, %v4687_v17  ;;  %v3714_v53 = vrot.slane %v3678_v32, %v4687_v17 }
 0xf57   : > { %v3601_v2 = vsel %vm658_vm1, %v3600_v33, %v3596_v27  ;;  %v3715_v13 = vsel %vm658_vm1, %v3714_v53, %v3710_v40 }
 0xf58   : > { %v3567_v6 = vpop.permute.xlu0 %3566 }
 0xf59   : > { %v3605_v18 = vrot.slane %v3567_v6, %v4694_v23  ;;  %v3791_v11 = vpop.permute.xlu1 %3790 }
 0xf5a   : > { %v3827_v14 = vrot.slane %v3791_v11, %v4687_v17 }
 0xf5b   : > { %v3606_v49 = vsel %vm665_vm2, %v3605_v18, %v3601_v2 }
 0xf5c   : > { %3959 = vst.msk [vmem:[%s4705_s24 + $0x1c] sm:$0x1] %vm6895_vm0, %v3606_v49  ;;  %v3828_v1 = vsel %vm658_vm1, %v3827_v14, %v3823_v39 }
 0xf5d   : > { %v3794_v57 = vpop.permute.xlu0 %3793 }
 0xf5e   : > { %v3832_v8 = vrot.slane %v3794_v57, %v4694_v23  ;;  %v3681_v0 = vpop.permute.xlu1 %3680 }
 0xf5f   : > { %v3719_v17 = vrot.slane %v3681_v0, %v4694_v23 }
 0xf60   : > { %v3833_v44 = vsel %vm665_vm2, %v3832_v8, %v3828_v1 }
 0xf61   : > { %3961 = vst.msk [vmem:[%s4705_s24 + $0x1e] sm:$0x1] %vm6896_vm11, %v3833_v44  ;;  %v3720_v60 = vsel %vm665_vm2, %v3719_v17, %v3715_v13 }
 0xf62   : > { %3960 = vst.msk [vmem:[%s4705_s24 + $0x1d] sm:$0x1] %vm6897_vm12, %v3720_v60 }
 0xf63 PF: > { %s12_s11 = sadd.s32 1, %s4105_s11   ;;  %s6898_s9 = smov %s4101_s10 }
 0xf64   : > { %p9_p5 = scmp.ge.s32.totalorder %s12_s11, 4   ;;  %s6899_s10 = smov %s6901_s12 }
 0xf66   :  { %11 = sbr.rel (!%p9_p5) target bundleno = 2 (0x2), region = 68 }

</bundles_post_ra>
